<compile_context>
chip_gen: v7x
topology: tpu7x:2x2x1
jax: 0.10.0
libtpu: 0.0.40
codegen_flags: <defaults>
</compile_context>

<pallas_src>
import jax
import jax.numpy as jnp
from jax.experimental import pallas as pl
from jax.experimental.pallas import tpu as pltpu


# ----------------------------------------------------------------------------------
# Kernel 1: fused attention pooling (Linear -> tanh -> Linear -> softmax(N) -> sum),
# all segments (b) handled in ONE program.
#   x2d  : (B*N, D)   flattened inputs
#   pool : (B, B*N)   one-hot segment-membership matrix (constant)
#   w1   : (D, D) bf16, b1: (1, D) f32
#   w2   : (1, D) f32  (second Linear's weight, stored as a row for a VPU reduce;
#                       its bias is a per-score constant and cancels in the softmax)
# ----------------------------------------------------------------------------------
def attn_pool_kernel(x_ref, pool_ref, w1_ref, b1_ref, w2_ref, o_ref):
    x = x_ref[...]                                                    # (BN, D) f32
    h = jnp.tanh(jnp.dot(x.astype(jnp.bfloat16), w1_ref[...],
                         preferred_element_type=jnp.float32) + b1_ref[...])
    s = jnp.sum(h * w2_ref[...], axis=-1, keepdims=True)             # (BN, 1) scores (VPU/XLU)
    # Global max shift is the same constant inside every segment -> softmax-invariant.
    e = jnp.exp(s - jnp.max(s, axis=0, keepdims=True))               # (BN, 1)
    num = jnp.dot(pool_ref[...], e * x,
                  preferred_element_type=jnp.float32)                # (B, D) sum_n e*x per segment
    den = jnp.dot(pool_ref[...], e,
                  preferred_element_type=jnp.float32)                # (B, 1) sum_n e per segment
    o_ref[...] = num / den                                           # softmax-weighted pooling


def attention_pool(x, w1, b1, w2):
    """x: (B, N, D) -> (B, D); softmax over N within each b."""
    B, N, D = x.shape
    x2d = x.reshape(B * N, D)
    pool = jnp.repeat(jnp.eye(B, dtype=jnp.float32), N, axis=1)      # (B, B*N), compile-time const
    return pl.pallas_call(
        attn_pool_kernel,
        out_shape=jax.ShapeDtypeStruct((B, D), jnp.float32),
    )(x2d, pool, w1, b1, w2)


# ----------------------------------------------------------------------------------
# Kernel 2: fused linear (x @ W + b) -- used to hoist the GRU input-to-hidden
# projection (all timesteps, all gates, both directions) out of the serial time loop.
# ----------------------------------------------------------------------------------
def linear_kernel(x_ref, w_ref, b_ref, o_ref):
    o_ref[...] = jnp.dot(x_ref[...].astype(jnp.bfloat16), w_ref[...],
                         preferred_element_type=jnp.float32) + b_ref[...]


def linear(x, w, b):
    return pl.pallas_call(
        linear_kernel,
        out_shape=jax.ShapeDtypeStruct((x.shape[0], w.shape[1]), jnp.float32),
    )(x, w, b)


# ----------------------------------------------------------------------------------
# Kernel 3: bidirectional GRU recurrence.
#   grid = (2, T): axis 0 = direction ("parallel", so v7x can shard fwd/bwd over its
#   two TensorCores), axis 1 = time ("arbitrary", hidden state carried in VMEM scratch).
#   gx  : (T, B, 6H) precomputed x @ Wih + bih  (fwd gates in [:3H], bwd in [3H:])
#   whh : (2, H, 3H) bf16 fused recurrent weights (r|z|n), bhh: (2, 1, 3H) f32
#   out : (T, B, 2H) -- both directions write lane-dense (B, H=128) blocks of the
#         shared output, aligned to the INPUT time index (PyTorch convention).
# ----------------------------------------------------------------------------------
def gru_step_kernel(gx_ref, whh_ref, bhh_ref, o_ref, h_ref):
    # Re-init the carried hidden state at the first TIME step of each direction.
    @pl.when(pl.program_id(1) == 0)
    def _():
        h_ref[...] = jnp.zeros_like(h_ref)

    gx = gx_ref[0]                                                    # (B, 3H) f32
    h = h_ref[...]                                                    # (B, H)  f32
    gh = jnp.dot(h.astype(jnp.bfloat16), whh_ref[0],
                 preferred_element_type=jnp.float32) + bhh_ref[0]     # (B, 3H): single fused matmul
    hd = h.shape[-1]
    r = jax.nn.sigmoid(gx[:, :hd] + gh[:, :hd])
    z = jax.nn.sigmoid(gx[:, hd:2 * hd] + gh[:, hd:2 * hd])
    n = jnp.tanh(gx[:, 2 * hd:] + r * gh[:, 2 * hd:])                 # PyTorch: tanh(Wx+b + r*(Wh h+b))
    h_new = (1.0 - z) * n + z * h
    h_ref[...] = h_new
    o_ref[...] = h_new[None]


def gru_recurrence(gx, whh, bhh):
    T, B, _ = gx.shape
    H = whh.shape[1]
    H3 = 3 * H

    def io_time(d, t):
        return t + d * (T - 1 - 2 * t)            # direction 0: t ; direction 1: T-1-t

    return pl.pallas_call(
        gru_step_kernel,
        out_shape=jax.ShapeDtypeStruct((T, B, 2 * H), jnp.float32),
        grid=(2, T),
        in_specs=[
            pl.BlockSpec((1, B, H3), lambda d, t: (io_time(d, t), 0, d)),
            pl.BlockSpec((1, H, H3), lambda d, t: (d, 0, 0)),
            pl.BlockSpec((1, 1, H3), lambda d, t: (d, 0, 0)),
        ],
        out_specs=pl.BlockSpec((1, B, H), lambda d, t: (io_time(d, t), 0, d)),
        scratch_shapes=[pltpu.VMEM((B, H), jnp.float32)],
        compiler_params=pltpu.CompilerParams(
            dimension_semantics=("parallel", "arbitrary")),
    )(gx, whh, bhh)


def gru_bidirectional(x_btd, layers):
    """Batch-first bidirectional multi-layer GRU (eval mode): (B, T, Din) -> (B, T, 2H)."""
    xt = jnp.transpose(x_btd, (1, 0, 2))                              # (T, B, Din) time-major
    for (wih, bih, whh, bhh) in layers:
        T, B, Din = xt.shape
        H = whh.shape[1]
        # Hoisted input-to-hidden projection: one matmul for all T, all gates, both dirs.
        gx = linear(xt.reshape(T * B, Din), wih, bih).reshape(T, B, 6 * H)
        xt = gru_recurrence(gx, whh, bhh)                             # (T, B, 2H)
    return jnp.transpose(xt, (1, 0, 2))                               # (B, T, 2H)


# ----------------------------------------------------------------------------------
# Kernel 4: Siamese head -- Linear + ReLU + Linear + Sigmoid, with the cross-document
# concat fused in (w1 split into two halves, one dot per document).
# ----------------------------------------------------------------------------------
def head_kernel(a_ref, b_ref, w1a_ref, w1b_ref, b1_ref, w2_ref, b2_ref, o_ref):
    h = (jnp.dot(a_ref[...].astype(jnp.bfloat16), w1a_ref[...],
                 preferred_element_type=jnp.float32)
         + jnp.dot(b_ref[...].astype(jnp.bfloat16), w1b_ref[...],
                   preferred_element_type=jnp.float32)
         + b1_ref[...])
    h = jnp.maximum(h, 0.0)
    y = jnp.sum(h * w2_ref[...], axis=-1, keepdims=True) + b2_ref[...]   # (1, 1)
    o_ref[...] = jax.nn.sigmoid(y)


def mlp_head(o1, o2, w1a, w1b, b1, w2, b2):
    return pl.pallas_call(
        head_kernel,
        out_shape=jax.ShapeDtypeStruct((o1.shape[0], 1), jnp.float32),
    )(o1, o2, w1a, w1b, b1, w2, b2)


# ----------------------------------------------------------------------------------
# Parameter construction (deterministic, synthetic).  Weights feeding the MXU are bf16.
# ----------------------------------------------------------------------------------
def attn_params(key, d, scale=0.08):
    k1, k2, k3 = jax.random.split(key, 3)
    w1 = (jax.random.normal(k1, (d, d), jnp.float32) * scale).astype(jnp.bfloat16)
    b1 = jax.random.normal(k2, (1, d), jnp.float32) * scale
    w2 = jax.random.normal(k3, (1, d), jnp.float32) * scale           # D->1 Linear, stored as a row
    return (w1, b1, w2)


def gru_layer_params(key, din, h, scale=0.08):
    ks = jax.random.split(key, 4)
    wih = (jax.random.normal(ks[0], (din, 6 * h), jnp.float32) * scale).astype(jnp.bfloat16)
    bih = jax.random.normal(ks[1], (1, 6 * h), jnp.float32) * scale
    whh = (jax.random.normal(ks[2], (2, h, 3 * h), jnp.float32) * scale).astype(jnp.bfloat16)
    bhh = jax.random.normal(ks[3], (2, 1, 3 * h), jnp.float32) * scale
    return (wih, bih, whh, bhh)


def gru_params(key, din, h, num_layers=2):
    layers = []
    for layer in range(num_layers):
        k = jax.random.fold_in(key, layer)
        in_dim = din if layer == 0 else 2 * h
        layers.append(gru_layer_params(k, in_dim, h))
    return layers


def init_params(key, D, H):
    ks = iter(jax.random.split(key, 16))
    p = {}
    # WordEncoder
    p["we_att"] = attn_params(next(ks), D)
    # SentEncoder
    p["se_att_w"] = attn_params(next(ks), D)
    p["se_att_s"] = attn_params(next(ks), D)
    p["se_gru"] = gru_params(next(ks), D, H)
    # ParaEncoder
    p["pe_att1"] = attn_params(next(ks), D)
    p["pe_att2"] = attn_params(next(ks), D)
    p["pe_att3"] = attn_params(next(ks), D)
    p["pe_gru_sent"] = gru_params(next(ks), D, H)
    p["pe_gru_para"] = gru_params(next(ks), D, H)
    # Siamese head (scaled: Linear(2*3*D, D)+ReLU, Linear(D, 1)+Sigmoid)
    k1, k2, k3, k4, k5 = jax.random.split(next(ks), 5)
    scale = 0.05
    p["head_w1a"] = (jax.random.normal(k1, (3 * D, D), jnp.float32) * scale).astype(jnp.bfloat16)
    p["head_w1b"] = (jax.random.normal(k2, (3 * D, D), jnp.float32) * scale).astype(jnp.bfloat16)
    p["head_b1"] = jax.random.normal(k3, (1, D), jnp.float32) * scale
    p["head_w2"] = jax.random.normal(k4, (1, D), jnp.float32) * scale
    p["head_b2"] = jax.random.normal(k5, (1, 1), jnp.float32) * scale
    return p


# ----------------------------------------------------------------------------------
# Forward pass (glue is plain JAX reshapes; all hot paths are Pallas kernels above).
# ----------------------------------------------------------------------------------
def mash_rnn(p, X):
    P_, S_, W_, D = X.shape

    # --- WordEncoder: single attention pool over all P*S*W words ---
    x1 = attention_pool(X.reshape(1, P_ * S_ * W_, D), *p["we_att"])      # (1, D)

    # --- SentEncoder: word attention per sentence -> GRU -> sentence attention ---
    xs = X.reshape(P_ * S_, W_, D)
    fla = attention_pool(xs, *p["se_att_w"])                              # (P*S, D)
    g = gru_bidirectional(fla[None], p["se_gru"])                         # (1, P*S, D)
    x2 = attention_pool(g, *p["se_att_s"])                                # (1, D)

    # --- ParaEncoder: word attn -> GRU_Sent -> sent attn -> GRU_para -> para attn ---
    fla_p = attention_pool(xs, *p["pe_att1"]).reshape(P_, S_, D)          # (P, S, D)
    g1 = gru_bidirectional(fla_p, p["pe_gru_sent"])                       # (P, S, D)
    sla = attention_pool(g1, *p["pe_att2"])                               # (P, D)
    g2 = gru_bidirectional(sla[None], p["pe_gru_para"])                   # (1, P, D)
    x3 = attention_pool(g2, *p["pe_att3"])                                # (1, D)

    return jnp.concatenate([x1, x2, x3], axis=1)                          # (1, 3D)


def siamese_forward(p, xa, xb):
    o1 = mash_rnn(p, xa)                                                  # (1, 3D)
    o2 = mash_rnn(p, xb)                                                  # (1, 3D)
    return mlp_head(o1, o2, p["head_w1a"], p["head_w1b"],
                    p["head_b1"], p["head_w2"], p["head_b2"])             # (1, 1)


# ----------------------------------------------------------------------------------
if __name__ == "__main__":
    D = 256            # embedding / hidden dim (scaled down from 1024)
    H = D // 2         # GRU hidden per direction = 128 -> lane-dense (128) output blocks
    P, S, W = 2, 3, 4  # paragraphs, sentences, words

    key = jax.random.PRNGKey(0)
    k1, k2 = jax.random.split(key)
    x1 = jax.random.normal(k1, (P, S, W, D), jnp.float32)
    x2 = jax.random.normal(k2, (P, S, W, D), jnp.float32)

    params = init_params(jax.random.PRNGKey(42), D, H)

    fwd = jax.jit(siamese_forward)
    out = jax.block_until_ready(fwd(params, x1, x2))

    assert out.shape == (1, 1), out.shape
    assert bool(jnp.all(jnp.isfinite(out)))
    assert bool(jnp.all((out >= 0.0) & (out <= 1.0)))  # sigmoid output
    print("KERNEL_OK")
</pallas_src>

<mosaic_0001>
module attributes {stable_mosaic.version = 11 : i64} {
  func.func @attn_pool_kernel(%arg0: memref<24x256xf32, #tpu.memory_space<vmem>>, %arg1: memref<6x24xf32, #tpu.memory_space<vmem>>, %arg2: memref<256x256xbf16, #tpu.memory_space<vmem>>, %arg3: memref<1x256xf32, #tpu.memory_space<vmem>>, %arg4: memref<1x256xf32, #tpu.memory_space<vmem>>, %arg5: memref<6x256xf32, #tpu.memory_space<vmem>>) attributes {dimension_semantics = [], scalar_prefetch = 0 : i64, scratch_operands = 0 : i64, tpu.core_type = #tpu.core_type<tc>} {
    %c0 = arith.constant 0 : index
    %c0_0 = arith.constant 0 : index
    %0 = vector.load %arg0[%c0, %c0_0] : memref<24x256xf32, #tpu.memory_space<vmem>>, vector<24x256xf32>
    %1 = arith.truncf %0 : vector<24x256xf32> to vector<24x256xbf16>
    %c0_1 = arith.constant 0 : index
    %c0_2 = arith.constant 0 : index
    %2 = vector.load %arg2[%c0_1, %c0_2] : memref<256x256xbf16, #tpu.memory_space<vmem>>, vector<256x256xbf16>
    %cst = arith.constant dense<0.000000e+00> : vector<24x256xf32>
    %3 = tpu.matmul %1, %2, %cst {dimension_numbers = #tpu.dot_dimension_numbers<[1], [0], [0], [1], [0, 0, 1, 1], [], []>} : vector<24x256xbf16>, vector<256x256xbf16>, vector<24x256xf32> -> vector<24x256xf32>
    %c0_3 = arith.constant 0 : index
    %c0_4 = arith.constant 0 : index
    %4 = vector.load %arg3[%c0_3, %c0_4] : memref<1x256xf32, #tpu.memory_space<vmem>>, vector<1x256xf32>
    %5 = vector.broadcast %4 : vector<1x256xf32> to vector<24x256xf32>
    %6 = arith.addf %3, %5 : vector<24x256xf32>
    %7 = math.tanh %6 : vector<24x256xf32>
    %c0_5 = arith.constant 0 : index
    %c0_6 = arith.constant 0 : index
    %8 = vector.load %arg4[%c0_5, %c0_6] : memref<1x256xf32, #tpu.memory_space<vmem>>, vector<1x256xf32>
    %9 = vector.broadcast %8 : vector<1x256xf32> to vector<24x256xf32>
    %10 = arith.mulf %7, %9 : vector<24x256xf32>
    %cst_7 = arith.constant dense<0.000000e+00> : vector<24xf32>
    %11 = vector.multi_reduction <add>, %10, %cst_7 [1] : vector<24x256xf32> to vector<24xf32>
    %12 = vector.shape_cast %11 : vector<24xf32> to vector<24x1xf32>
    %cst_8 = arith.constant dense<0xFF800000> : vector<1xf32>
    %13 = vector.multi_reduction <maximumf>, %12, %cst_8 [0] : vector<24x1xf32> to vector<1xf32>
    %14 = vector.shape_cast %13 : vector<1xf32> to vector<1x1xf32>
    %15 = vector.broadcast %14 : vector<1x1xf32> to vector<24x1xf32>
    %16 = arith.subf %12, %15 : vector<24x1xf32>
    %17 = math.exp %16 : vector<24x1xf32>
    %c0_9 = arith.constant 0 : index
    %c0_10 = arith.constant 0 : index
    %18 = vector.load %arg1[%c0_9, %c0_10] : memref<6x24xf32, #tpu.memory_space<vmem>>, vector<6x24xf32>
    %19 = vector.broadcast %17 : vector<24x1xf32> to vector<24x256xf32>
    %20 = arith.mulf %19, %0 : vector<24x256xf32>
    %cst_11 = arith.constant dense<0.000000e+00> : vector<6x256xf32>
    %21 = tpu.matmul %18, %20, %cst_11 {dimension_numbers = #tpu.dot_dimension_numbers<[1], [0], [0], [1], [0, 0, 1, 1], [], []>} : vector<6x24xf32>, vector<24x256xf32>, vector<6x256xf32> -> vector<6x256xf32>
    %c0_12 = arith.constant 0 : index
    %c0_13 = arith.constant 0 : index
    %22 = vector.load %arg1[%c0_12, %c0_13] : memref<6x24xf32, #tpu.memory_space<vmem>>, vector<6x24xf32>
    %cst_14 = arith.constant dense<0.000000e+00> : vector<6x1xf32>
    %23 = tpu.matmul %22, %17, %cst_14 {dimension_numbers = #tpu.dot_dimension_numbers<[1], [0], [0], [1], [0, 0, 1, 1], [], []>} : vector<6x24xf32>, vector<24x1xf32>, vector<6x1xf32> -> vector<6x1xf32>
    %24 = vector.broadcast %23 : vector<6x1xf32> to vector<6x256xf32>
    %25 = arith.divf %21, %24 : vector<6x256xf32>
    %c0_15 = arith.constant 0 : index
    %c0_16 = arith.constant 0 : index
    %26 = vector.load %arg5[%c0_15, %c0_16] : memref<6x256xf32, #tpu.memory_space<vmem>>, vector<6x256xf32>
    tpu.vector_store %arg5[%c0_15, %c0_16], %25 {strides = array<i32>} : memref<6x256xf32, #tpu.memory_space<vmem>>, vector<6x256xf32>,
    return
  }
}

module attributes {stable_mosaic.version = 11 : i64} {
  func.func @attn_pool_kernel(%arg0: memref<24x256xf32, #tpu.memory_space<vmem>>, %arg1: memref<1x24xf32, #tpu.memory_space<vmem>>, %arg2: memref<256x256xbf16, #tpu.memory_space<vmem>>, %arg3: memref<1x256xf32, #tpu.memory_space<vmem>>, %arg4: memref<1x256xf32, #tpu.memory_space<vmem>>, %arg5: memref<1x256xf32, #tpu.memory_space<vmem>>) attributes {dimension_semantics = [], scalar_prefetch = 0 : i64, scratch_operands = 0 : i64, tpu.core_type = #tpu.core_type<tc>} {
    %c0 = arith.constant 0 : index
    %c0_0 = arith.constant 0 : index
    %0 = vector.load %arg0[%c0, %c0_0] : memref<24x256xf32, #tpu.memory_space<vmem>>, vector<24x256xf32>
    %1 = arith.truncf %0 : vector<24x256xf32> to vector<24x256xbf16>
    %c0_1 = arith.constant 0 : index
    %c0_2 = arith.constant 0 : index
    %2 = vector.load %arg2[%c0_1, %c0_2] : memref<256x256xbf16, #tpu.memory_space<vmem>>, vector<256x256xbf16>
    %cst = arith.constant dense<0.000000e+00> : vector<24x256xf32>
    %3 = tpu.matmul %1, %2, %cst {dimension_numbers = #tpu.dot_dimension_numbers<[1], [0], [0], [1], [0, 0, 1, 1], [], []>} : vector<24x256xbf16>, vector<256x256xbf16>, vector<24x256xf32> -> vector<24x256xf32>
    %c0_3 = arith.constant 0 : index
    %c0_4 = arith.constant 0 : index
    %4 = vector.load %arg3[%c0_3, %c0_4] : memref<1x256xf32, #tpu.memory_space<vmem>>, vector<1x256xf32>
    %5 = vector.broadcast %4 : vector<1x256xf32> to vector<24x256xf32>
    %6 = arith.addf %3, %5 : vector<24x256xf32>
    %7 = math.tanh %6 : vector<24x256xf32>
    %c0_5 = arith.constant 0 : index
    %c0_6 = arith.constant 0 : index
    %8 = vector.load %arg4[%c0_5, %c0_6] : memref<1x256xf32, #tpu.memory_space<vmem>>, vector<1x256xf32>
    %9 = vector.broadcast %8 : vector<1x256xf32> to vector<24x256xf32>
    %10 = arith.mulf %7, %9 : vector<24x256xf32>
    %cst_7 = arith.constant dense<0.000000e+00> : vector<24xf32>
    %11 = vector.multi_reduction <add>, %10, %cst_7 [1] : vector<24x256xf32> to vector<24xf32>
    %12 = vector.shape_cast %11 : vector<24xf32> to vector<24x1xf32>
    %cst_8 = arith.constant dense<0xFF800000> : vector<1xf32>
    %13 = vector.multi_reduction <maximumf>, %12, %cst_8 [0] : vector<24x1xf32> to vector<1xf32>
    %14 = vector.shape_cast %13 : vector<1xf32> to vector<1x1xf32>
    %15 = vector.broadcast %14 : vector<1x1xf32> to vector<24x1xf32>
    %16 = arith.subf %12, %15 : vector<24x1xf32>
    %17 = math.exp %16 : vector<24x1xf32>
    %c0_9 = arith.constant 0 : index
    %c0_10 = arith.constant 0 : index
    %18 = vector.load %arg1[%c0_9, %c0_10] : memref<1x24xf32, #tpu.memory_space<vmem>>, vector<1x24xf32>
    %19 = vector.broadcast %17 : vector<24x1xf32> to vector<24x256xf32>
    %20 = arith.mulf %19, %0 : vector<24x256xf32>
    %cst_11 = arith.constant dense<0.000000e+00> : vector<1x256xf32>
    %21 = tpu.matmul %18, %20, %cst_11 {dimension_numbers = #tpu.dot_dimension_numbers<[1], [0], [0], [1], [0, 0, 1, 1], [], []>} : vector<1x24xf32>, vector<24x256xf32>, vector<1x256xf32> -> vector<1x256xf32>
    %c0_12 = arith.constant 0 : index
    %c0_13 = arith.constant 0 : index
    %22 = vector.load %arg1[%c0_12, %c0_13] : memref<1x24xf32, #tpu.memory_space<vmem>>, vector<1x24xf32>
    %cst_14 = arith.constant dense<0.000000e+00> : vector<1x1xf32>
    %23 = tpu.matmul %22, %17, %cst_14 {dimension_numbers = #tpu.dot_dimension_numbers<[1], [0], [0], [1], [0, 0, 1, 1], [], []>} : vector<1x24xf32>, vector<24x1xf32>, vector<1x1xf32> -> vector<1x1xf32>
    %24 = vector.broadcast %23 : vector<1x1xf32> to vector<1x256xf32>
    %25 = arith.divf %21, %24 : vector<1x256xf32>
    %c0_15 = arith.constant 0 : index
    %c0_16 = arith.constant 0 : index
    %26 = vector.load %arg5[%c0_15, %c0_16] : memref<1x256xf32, #tpu.memory_space<vmem>>, vector<1x256xf32>
    tpu.vector_store %arg5[%c0_15, %c0_16], %25 {strides = array<i32>} : memref<1x256xf32, #tpu.memory_space<vmem>>, vector<1x256xf32>,
    return
  }
}

module attributes {stable_mosaic.version = 11 : i64} {
  func.func @attn_pool_kernel(%arg0: memref<24x256xf32, #tpu.memory_space<vmem>>, %arg1: memref<6x24xf32, #tpu.memory_space<vmem>>, %arg2: memref<256x256xbf16, #tpu.memory_space<vmem>>, %arg3: memref<1x256xf32, #tpu.memory_space<vmem>>, %arg4: memref<1x256xf32, #tpu.memory_space<vmem>>, %arg5: memref<6x256xf32, #tpu.memory_space<vmem>>) attributes {dimension_semantics = [], scalar_prefetch = 0 : i64, scratch_operands = 0 : i64, tpu.core_type = #tpu.core_type<tc>} {
    %c0 = arith.constant 0 : index
    %c0_0 = arith.constant 0 : index
    %0 = vector.load %arg0[%c0, %c0_0] : memref<24x256xf32, #tpu.memory_space<vmem>>, vector<24x256xf32>
    %1 = arith.truncf %0 : vector<24x256xf32> to vector<24x256xbf16>
    %c0_1 = arith.constant 0 : index
    %c0_2 = arith.constant 0 : index
    %2 = vector.load %arg2[%c0_1, %c0_2] : memref<256x256xbf16, #tpu.memory_space<vmem>>, vector<256x256xbf16>
    %cst = arith.constant dense<0.000000e+00> : vector<24x256xf32>
    %3 = tpu.matmul %1, %2, %cst {dimension_numbers = #tpu.dot_dimension_numbers<[1], [0], [0], [1], [0, 0, 1, 1], [], []>} : vector<24x256xbf16>, vector<256x256xbf16>, vector<24x256xf32> -> vector<24x256xf32>
    %c0_3 = arith.constant 0 : index
    %c0_4 = arith.constant 0 : index
    %4 = vector.load %arg3[%c0_3, %c0_4] : memref<1x256xf32, #tpu.memory_space<vmem>>, vector<1x256xf32>
    %5 = vector.broadcast %4 : vector<1x256xf32> to vector<24x256xf32>
    %6 = arith.addf %3, %5 : vector<24x256xf32>
    %7 = math.tanh %6 : vector<24x256xf32>
    %c0_5 = arith.constant 0 : index
    %c0_6 = arith.constant 0 : index
    %8 = vector.load %arg4[%c0_5, %c0_6] : memref<1x256xf32, #tpu.memory_space<vmem>>, vector<1x256xf32>
    %9 = vector.broadcast %8 : vector<1x256xf32> to vector<24x256xf32>
    %10 = arith.mulf %7, %9 : vector<24x256xf32>
    %cst_7 = arith.constant dense<0.000000e+00> : vector<24xf32>
    %11 = vector.multi_reduction <add>, %10, %cst_7 [1] : vector<24x256xf32> to vector<24xf32>
    %12 = vector.shape_cast %11 : vector<24xf32> to vector<24x1xf32>
    %cst_8 = arith.constant dense<0xFF800000> : vector<1xf32>
    %13 = vector.multi_reduction <maximumf>, %12, %cst_8 [0] : vector<24x1xf32> to vector<1xf32>
    %14 = vector.shape_cast %13 : vector<1xf32> to vector<1x1xf32>
    %15 = vector.broadcast %14 : vector<1x1xf32> to vector<24x1xf32>
    %16 = arith.subf %12, %15 : vector<24x1xf32>
    %17 = math.exp %16 : vector<24x1xf32>
    %c0_9 = arith.constant 0 : index
    %c0_10 = arith.constant 0 : index
    %18 = vector.load %arg1[%c0_9, %c0_10] : memref<6x24xf32, #tpu.memory_space<vmem>>, vector<6x24xf32>
    %19 = vector.broadcast %17 : vector<24x1xf32> to vector<24x256xf32>
    %20 = arith.mulf %19, %0 : vector<24x256xf32>
    %cst_11 = arith.constant dense<0.000000e+00> : vector<6x256xf32>
    %21 = tpu.matmul %18, %20, %cst_11 {dimension_numbers = #tpu.dot_dimension_numbers<[1], [0], [0], [1], [0, 0, 1, 1], [], []>} : vector<6x24xf32>, vector<24x256xf32>, vector<6x256xf32> -> vector<6x256xf32>
    %c0_12 = arith.constant 0 : index
    %c0_13 = arith.constant 0 : index
    %22 = vector.load %arg1[%c0_12, %c0_13] : memref<6x24xf32, #tpu.memory_space<vmem>>, vector<6x24xf32>
    %cst_14 = arith.constant dense<0.000000e+00> : vector<6x1xf32>
    %23 = tpu.matmul %22, %17, %cst_14 {dimension_numbers = #tpu.dot_dimension_numbers<[1], [0], [0], [1], [0, 0, 1, 1], [], []>} : vector<6x24xf32>, vector<24x1xf32>, vector<6x1xf32> -> vector<6x1xf32>
    %24 = vector.broadcast %23 : vector<6x1xf32> to vector<6x256xf32>
    %25 = arith.divf %21, %24 : vector<6x256xf32>
    %c0_15 = arith.constant 0 : index
    %c0_16 = arith.constant 0 : index
    %26 = vector.load %arg5[%c0_15, %c0_16] : memref<6x256xf32, #tpu.memory_space<vmem>>, vector<6x256xf32>
    tpu.vector_store %arg5[%c0_15, %c0_16], %25 {strides = array<i32>} : memref<6x256xf32, #tpu.memory_space<vmem>>, vector<6x256xf32>,
    return
  }
}

module attributes {stable_mosaic.version = 11 : i64} {
  func.func @linear_kernel(%arg0: memref<6x256xf32, #tpu.memory_space<vmem>>, %arg1: memref<256x768xbf16, #tpu.memory_space<vmem>>, %arg2: memref<1x768xf32, #tpu.memory_space<vmem>>, %arg3: memref<6x768xf32, #tpu.memory_space<vmem>>) attributes {dimension_semantics = [], scalar_prefetch = 0 : i64, scratch_operands = 0 : i64, tpu.core_type = #tpu.core_type<tc>} {
    %c0 = arith.constant 0 : index
    %c0_0 = arith.constant 0 : index
    %0 = vector.load %arg0[%c0, %c0_0] : memref<6x256xf32, #tpu.memory_space<vmem>>, vector<6x256xf32>
    %1 = arith.truncf %0 : vector<6x256xf32> to vector<6x256xbf16>
    %c0_1 = arith.constant 0 : index
    %c0_2 = arith.constant 0 : index
    %2 = vector.load %arg1[%c0_1, %c0_2] : memref<256x768xbf16, #tpu.memory_space<vmem>>, vector<256x768xbf16>
    %cst = arith.constant dense<0.000000e+00> : vector<6x768xf32>
    %3 = tpu.matmul %1, %2, %cst {dimension_numbers = #tpu.dot_dimension_numbers<[1], [0], [0], [1], [0, 0, 1, 1], [], []>} : vector<6x256xbf16>, vector<256x768xbf16>, vector<6x768xf32> -> vector<6x768xf32>
    %c0_3 = arith.constant 0 : index
    %c0_4 = arith.constant 0 : index
    %4 = vector.load %arg2[%c0_3, %c0_4] : memref<1x768xf32, #tpu.memory_space<vmem>>, vector<1x768xf32>
    %5 = vector.broadcast %4 : vector<1x768xf32> to vector<6x768xf32>
    %6 = arith.addf %3, %5 : vector<6x768xf32>
    %c0_5 = arith.constant 0 : index
    %c0_6 = arith.constant 0 : index
    %7 = vector.load %arg3[%c0_5, %c0_6] : memref<6x768xf32, #tpu.memory_space<vmem>>, vector<6x768xf32>
    tpu.vector_store %arg3[%c0_5, %c0_6], %6 {strides = array<i32>} : memref<6x768xf32, #tpu.memory_space<vmem>>, vector<6x768xf32>,
    return
  }
}

module attributes {stable_mosaic.version = 11 : i64} {
  func.func @gru_step_kernel(%arg0: i32, %arg1: i32, %arg2: memref<1x2x384xf32, #tpu.memory_space<vmem>>, %arg3: memref<1x128x384xbf16, #tpu.memory_space<vmem>>, %arg4: memref<1x1x384xf32, #tpu.memory_space<vmem>>, %arg5: memref<1x2x128xf32, #tpu.memory_space<vmem>>, %arg6: memref<2x128xf32, #tpu.memory_space<vmem>>) attributes {dimension_semantics = [#tpu.dimension_semantics<parallel>, #tpu.dimension_semantics<arbitrary>], iteration_bounds = array<i64: 2, 3>, scalar_prefetch = 0 : i64, scratch_operands = 1 : i64, tpu.core_type = #tpu.core_type<tc>, window_params = [{transform_indices = @transform_0, window_bounds = array<i64: 1, 2, 384>}, {transform_indices = @transform_1, window_bounds = array<i64: 1, 128, 384>}, {transform_indices = @transform_2, window_bounds = array<i64: 1, 1, 384>}, {transform_indices = @transform_3, window_bounds = array<i64: 1, 2, 128>}]} {
    %c0_i32 = arith.constant 0 : i32
    %0 = arith.cmpi eq, %arg1, %c0_i32 : i32
    %1 = arith.extui %0 : i1 to i32
    %c0_i32_0 = arith.constant 0 : i32
    %2 = arith.cmpi ne, %1, %c0_i32_0 : i32
    scf.if %2 {
      %cst_19 = arith.constant 0.000000e+00 : f32
      %43 = vector.broadcast %cst_19 : f32 to vector<2x128xf32>
      %c0_20 = arith.constant 0 : index
      %c0_21 = arith.constant 0 : index
      %44 = vector.load %arg6[%c0_20, %c0_21] : memref<2x128xf32, #tpu.memory_space<vmem>>, vector<2x128xf32>
      tpu.vector_store %arg6[%c0_20, %c0_21], %43 {strides = array<i32>} : memref<2x128xf32, #tpu.memory_space<vmem>>, vector<2x128xf32>,
    } else {
    }
    %c0 = arith.constant 0 : index
    %c0_1 = arith.constant 0 : index
    %c0_2 = arith.constant 0 : index
    %3 = vector.load %arg2[%c0, %c0_1, %c0_2] : memref<1x2x384xf32, #tpu.memory_space<vmem>>, vector<1x2x384xf32>
    %4 = vector.shape_cast %3 : vector<1x2x384xf32> to vector<2x384xf32>
    %c0_3 = arith.constant 0 : index
    %c0_4 = arith.constant 0 : index
    %5 = vector.load %arg6[%c0_3, %c0_4] : memref<2x128xf32, #tpu.memory_space<vmem>>, vector<2x128xf32>
    %6 = arith.truncf %5 : vector<2x128xf32> to vector<2x128xbf16>
    %c0_5 = arith.constant 0 : index
    %c0_6 = arith.constant 0 : index
    %c0_7 = arith.constant 0 : index
    %7 = vector.load %arg3[%c0_5, %c0_6, %c0_7] : memref<1x128x384xbf16, #tpu.memory_space<vmem>>, vector<1x128x384xbf16>
    %8 = vector.shape_cast %7 : vector<1x128x384xbf16> to vector<128x384xbf16>
    %cst = arith.constant dense<0.000000e+00> : vector<2x384xf32>
    %9 = tpu.matmul %6, %8, %cst {dimension_numbers = #tpu.dot_dimension_numbers<[1], [0], [0], [1], [0, 0, 1, 1], [], []>} : vector<2x128xbf16>, vector<128x384xbf16>, vector<2x384xf32> -> vector<2x384xf32>
    %c0_8 = arith.constant 0 : index
    %c0_9 = arith.constant 0 : index
    %c0_10 = arith.constant 0 : index
    %10 = vector.load %arg4[%c0_8, %c0_9, %c0_10] : memref<1x1x384xf32, #tpu.memory_space<vmem>>, vector<1x1x384xf32>
    %11 = vector.shape_cast %10 : vector<1x1x384xf32> to vector<1x384xf32>
    %12 = vector.broadcast %11 : vector<1x384xf32> to vector<2x384xf32>
    %13 = arith.addf %9, %12 : vector<2x384xf32>
    %14 = vector.extract_strided_slice %4 {offsets = [0, 0], sizes = [2, 128], strides = [1, 1]} : vector<2x384xf32> to vector<2x128xf32>
    %15 = vector.extract_strided_slice %13 {offsets = [0, 0], sizes = [2, 128], strides = [1, 1]} : vector<2x384xf32> to vector<2x128xf32>
    %16 = arith.addf %14, %15 : vector<2x128xf32>
    %17 = arith.negf %16 : vector<2x128xf32>
    %18 = math.exp %17 : vector<2x128xf32>
    %cst_11 = arith.constant 1.000000e+00 : f32
    %19 = vector.broadcast %cst_11 : f32 to vector<2x128xf32>
    %20 = arith.addf %19, %18 : vector<2x128xf32>
    %21 = arith.divf %19, %20 : vector<2x128xf32>
    %22 = vector.extract_strided_slice %4 {offsets = [0, 128], sizes = [2, 128], strides = [1, 1]} : vector<2x384xf32> to vector<2x128xf32>
    %23 = vector.extract_strided_slice %13 {offsets = [0, 128], sizes = [2, 128], strides = [1, 1]} : vector<2x384xf32> to vector<2x128xf32>
    %24 = arith.addf %22, %23 : vector<2x128xf32>
    %25 = arith.negf %24 : vector<2x128xf32>
    %26 = math.exp %25 : vector<2x128xf32>
    %cst_12 = arith.constant 1.000000e+00 : f32
    %27 = vector.broadcast %cst_12 : f32 to vector<2x128xf32>
    %28 = arith.addf %27, %26 : vector<2x128xf32>
    %29 = arith.divf %27, %28 : vector<2x128xf32>
    %30 = vector.extract_strided_slice %4 {offsets = [0, 256], sizes = [2, 128], strides = [1, 1]} : vector<2x384xf32> to vector<2x128xf32>
    %31 = vector.extract_strided_slice %13 {offsets = [0, 256], sizes = [2, 128], strides = [1, 1]} : vector<2x384xf32> to vector<2x128xf32>
    %32 = arith.mulf %21, %31 : vector<2x128xf32>
    %33 = arith.addf %30, %32 : vector<2x128xf32>
    %34 = math.tanh %33 : vector<2x128xf32>
    %cst_13 = arith.constant 1.000000e+00 : f32
    %35 = vector.broadcast %cst_13 : f32 to vector<2x128xf32>
    %36 = arith.subf %35, %29 : vector<2x128xf32>
    %37 = arith.mulf %36, %34 : vector<2x128xf32>
    %38 = arith.mulf %29, %5 : vector<2x128xf32>
    %39 = arith.addf %37, %38 : vector<2x128xf32>
    %c0_14 = arith.constant 0 : index
    %c0_15 = arith.constant 0 : index
    %40 = vector.load %arg6[%c0_14, %c0_15] : memref<2x128xf32, #tpu.memory_space<vmem>>, vector<2x128xf32>
    tpu.vector_store %arg6[%c0_14, %c0_15], %39 {strides = array<i32>} : memref<2x128xf32, #tpu.memory_space<vmem>>, vector<2x128xf32>,
    %41 = vector.shape_cast %39 : vector<2x128xf32> to vector<1x2x128xf32>
    %c0_16 = arith.constant 0 : index
    %c0_17 = arith.constant 0 : index
    %c0_18 = arith.constant 0 : index
    %42 = vector.load %arg5[%c0_16, %c0_17, %c0_18] : memref<1x2x128xf32, #tpu.memory_space<vmem>>, vector<1x2x128xf32>
    tpu.vector_store %arg5[%c0_16, %c0_17, %c0_18], %41 {strides = array<i32>} : memref<1x2x128xf32, #tpu.memory_space<vmem>>, vector<1x2x128xf32>,
    return
  }
  func.func @transform_0(%arg0: i32, %arg1: i32) -> (i32, i32, i32) {
    %c2_i32 = arith.constant 2 : i32
    %0 = arith.muli %c2_i32, %arg1 : i32
    %c2_i32_0 = arith.constant 2 : i32
    %1 = arith.subi %c2_i32_0, %0 : i32
    %2 = arith.muli %arg0, %1 : i32
    %3 = arith.addi %arg1, %2 : i32
    %c0_i32 = arith.constant 0 : i32
    %c0_i32_1 = arith.constant 0 : i32
    return %3, %c0_i32, %arg0 : i32, i32, i32
  }
  func.func @transform_1(%arg0: i32, %arg1: i32) -> (i32, i32, i32) {
    %c0_i32 = arith.constant 0 : i32
    %c0_i32_0 = arith.constant 0 : i32
    %c0_i32_1 = arith.constant 0 : i32
    return %arg0, %c0_i32, %c0_i32_0 : i32, i32, i32
  }
  func.func @transform_2(%arg0: i32, %arg1: i32) -> (i32, i32, i32) {
    %c0_i32 = arith.constant 0 : i32
    %c0_i32_0 = arith.constant 0 : i32
    %c0_i32_1 = arith.constant 0 : i32
    return %arg0, %c0_i32, %c0_i32_0 : i32, i32, i32
  }
  func.func @transform_3(%arg0: i32, %arg1: i32) -> (i32, i32, i32) {
    %c2_i32 = arith.constant 2 : i32
    %0 = arith.muli %c2_i32, %arg1 : i32
    %c2_i32_0 = arith.constant 2 : i32
    %1 = arith.subi %c2_i32_0, %0 : i32
    %2 = arith.muli %arg0, %1 : i32
    %3 = arith.addi %arg1, %2 : i32
    %c0_i32 = arith.constant 0 : i32
    %c0_i32_1 = arith.constant 0 : i32
    return %3, %c0_i32, %arg0 : i32, i32, i32
  }
}

module attributes {stable_mosaic.version = 11 : i64} {
  func.func @attn_pool_kernel(%arg0: memref<6x256xf32, #tpu.memory_space<vmem>>, %arg1: memref<2x6xf32, #tpu.memory_space<vmem>>, %arg2: memref<256x256xbf16, #tpu.memory_space<vmem>>, %arg3: memref<1x256xf32, #tpu.memory_space<vmem>>, %arg4: memref<1x256xf32, #tpu.memory_space<vmem>>, %arg5: memref<2x256xf32, #tpu.memory_space<vmem>>) attributes {dimension_semantics = [], scalar_prefetch = 0 : i64, scratch_operands = 0 : i64, tpu.core_type = #tpu.core_type<tc>} {
    %c0 = arith.constant 0 : index
    %c0_0 = arith.constant 0 : index
    %0 = vector.load %arg0[%c0, %c0_0] : memref<6x256xf32, #tpu.memory_space<vmem>>, vector<6x256xf32>
    %1 = arith.truncf %0 : vector<6x256xf32> to vector<6x256xbf16>
    %c0_1 = arith.constant 0 : index
    %c0_2 = arith.constant 0 : index
    %2 = vector.load %arg2[%c0_1, %c0_2] : memref<256x256xbf16, #tpu.memory_space<vmem>>, vector<256x256xbf16>
    %cst = arith.constant dense<0.000000e+00> : vector<6x256xf32>
    %3 = tpu.matmul %1, %2, %cst {dimension_numbers = #tpu.dot_dimension_numbers<[1], [0], [0], [1], [0, 0, 1, 1], [], []>} : vector<6x256xbf16>, vector<256x256xbf16>, vector<6x256xf32> -> vector<6x256xf32>
    %c0_3 = arith.constant 0 : index
    %c0_4 = arith.constant 0 : index
    %4 = vector.load %arg3[%c0_3, %c0_4] : memref<1x256xf32, #tpu.memory_space<vmem>>, vector<1x256xf32>
    %5 = vector.broadcast %4 : vector<1x256xf32> to vector<6x256xf32>
    %6 = arith.addf %3, %5 : vector<6x256xf32>
    %7 = math.tanh %6 : vector<6x256xf32>
    %c0_5 = arith.constant 0 : index
    %c0_6 = arith.constant 0 : index
    %8 = vector.load %arg4[%c0_5, %c0_6] : memref<1x256xf32, #tpu.memory_space<vmem>>, vector<1x256xf32>
    %9 = vector.broadcast %8 : vector<1x256xf32> to vector<6x256xf32>
    %10 = arith.mulf %7, %9 : vector<6x256xf32>
    %cst_7 = arith.constant dense<0.000000e+00> : vector<6xf32>
    %11 = vector.multi_reduction <add>, %10, %cst_7 [1] : vector<6x256xf32> to vector<6xf32>
    %12 = vector.shape_cast %11 : vector<6xf32> to vector<6x1xf32>
    %cst_8 = arith.constant dense<0xFF800000> : vector<1xf32>
    %13 = vector.multi_reduction <maximumf>, %12, %cst_8 [0] : vector<6x1xf32> to vector<1xf32>
    %14 = vector.shape_cast %13 : vector<1xf32> to vector<1x1xf32>
    %15 = vector.broadcast %14 : vector<1x1xf32> to vector<6x1xf32>
    %16 = arith.subf %12, %15 : vector<6x1xf32>
    %17 = math.exp %16 : vector<6x1xf32>
    %c0_9 = arith.constant 0 : index
    %c0_10 = arith.constant 0 : index
    %18 = vector.load %arg1[%c0_9, %c0_10] : memref<2x6xf32, #tpu.memory_space<vmem>>, vector<2x6xf32>
    %19 = vector.broadcast %17 : vector<6x1xf32> to vector<6x256xf32>
    %20 = arith.mulf %19, %0 : vector<6x256xf32>
    %cst_11 = arith.constant dense<0.000000e+00> : vector<2x256xf32>
    %21 = tpu.matmul %18, %20, %cst_11 {dimension_numbers = #tpu.dot_dimension_numbers<[1], [0], [0], [1], [0, 0, 1, 1], [], []>} : vector<2x6xf32>, vector<6x256xf32>, vector<2x256xf32> -> vector<2x256xf32>
    %c0_12 = arith.constant 0 : index
    %c0_13 = arith.constant 0 : index
    %22 = vector.load %arg1[%c0_12, %c0_13] : memref<2x6xf32, #tpu.memory_space<vmem>>, vector<2x6xf32>
    %cst_14 = arith.constant dense<0.000000e+00> : vector<2x1xf32>
    %23 = tpu.matmul %22, %17, %cst_14 {dimension_numbers = #tpu.dot_dimension_numbers<[1], [0], [0], [1], [0, 0, 1, 1], [], []>} : vector<2x6xf32>, vector<6x1xf32>, vector<2x1xf32> -> vector<2x1xf32>
    %24 = vector.broadcast %23 : vector<2x1xf32> to vector<2x256xf32>
    %25 = arith.divf %21, %24 : vector<2x256xf32>
    %c0_15 = arith.constant 0 : index
    %c0_16 = arith.constant 0 : index
    %26 = vector.load %arg5[%c0_15, %c0_16] : memref<2x256xf32, #tpu.memory_space<vmem>>, vector<2x256xf32>
    tpu.vector_store %arg5[%c0_15, %c0_16], %25 {strides = array<i32>} : memref<2x256xf32, #tpu.memory_space<vmem>>, vector<2x256xf32>,
    return
  }
}

module attributes {stable_mosaic.version = 11 : i64} {
  func.func @linear_kernel(%arg0: memref<2x256xf32, #tpu.memory_space<vmem>>, %arg1: memref<256x768xbf16, #tpu.memory_space<vmem>>, %arg2: memref<1x768xf32, #tpu.memory_space<vmem>>, %arg3: memref<2x768xf32, #tpu.memory_space<vmem>>) attributes {dimension_semantics = [], scalar_prefetch = 0 : i64, scratch_operands = 0 : i64, tpu.core_type = #tpu.core_type<tc>} {
    %c0 = arith.constant 0 : index
    %c0_0 = arith.constant 0 : index
    %0 = vector.load %arg0[%c0, %c0_0] : memref<2x256xf32, #tpu.memory_space<vmem>>, vector<2x256xf32>
    %1 = arith.truncf %0 : vector<2x256xf32> to vector<2x256xbf16>
    %c0_1 = arith.constant 0 : index
    %c0_2 = arith.constant 0 : index
    %2 = vector.load %arg1[%c0_1, %c0_2] : memref<256x768xbf16, #tpu.memory_space<vmem>>, vector<256x768xbf16>
    %cst = arith.constant dense<0.000000e+00> : vector<2x768xf32>
    %3 = tpu.matmul %1, %2, %cst {dimension_numbers = #tpu.dot_dimension_numbers<[1], [0], [0], [1], [0, 0, 1, 1], [], []>} : vector<2x256xbf16>, vector<256x768xbf16>, vector<2x768xf32> -> vector<2x768xf32>
    %c0_3 = arith.constant 0 : index
    %c0_4 = arith.constant 0 : index
    %4 = vector.load %arg2[%c0_3, %c0_4] : memref<1x768xf32, #tpu.memory_space<vmem>>, vector<1x768xf32>
    %5 = vector.broadcast %4 : vector<1x768xf32> to vector<2x768xf32>
    %6 = arith.addf %3, %5 : vector<2x768xf32>
    %c0_5 = arith.constant 0 : index
    %c0_6 = arith.constant 0 : index
    %7 = vector.load %arg3[%c0_5, %c0_6] : memref<2x768xf32, #tpu.memory_space<vmem>>, vector<2x768xf32>
    tpu.vector_store %arg3[%c0_5, %c0_6], %6 {strides = array<i32>} : memref<2x768xf32, #tpu.memory_space<vmem>>, vector<2x768xf32>,
    return
  }
}

module attributes {stable_mosaic.version = 11 : i64} {
  func.func @gru_step_kernel(%arg0: i32, %arg1: i32, %arg2: memref<1x1x384xf32, #tpu.memory_space<vmem>>, %arg3: memref<1x128x384xbf16, #tpu.memory_space<vmem>>, %arg4: memref<1x1x384xf32, #tpu.memory_space<vmem>>, %arg5: memref<1x1x128xf32, #tpu.memory_space<vmem>>, %arg6: memref<1x128xf32, #tpu.memory_space<vmem>>) attributes {dimension_semantics = [#tpu.dimension_semantics<parallel>, #tpu.dimension_semantics<arbitrary>], iteration_bounds = array<i64: 2, 2>, scalar_prefetch = 0 : i64, scratch_operands = 1 : i64, tpu.core_type = #tpu.core_type<tc>, window_params = [{transform_indices = @transform_0, window_bounds = array<i64: 1, 1, 384>}, {transform_indices = @transform_1, window_bounds = array<i64: 1, 128, 384>}, {transform_indices = @transform_2, window_bounds = array<i64: 1, 1, 384>}, {transform_indices = @transform_3, window_bounds = array<i64: 1, 1, 128>}]} {
    %c0_i32 = arith.constant 0 : i32
    %0 = arith.cmpi eq, %arg1, %c0_i32 : i32
    %1 = arith.extui %0 : i1 to i32
    %c0_i32_0 = arith.constant 0 : i32
    %2 = arith.cmpi ne, %1, %c0_i32_0 : i32
    scf.if %2 {
      %cst_19 = arith.constant 0.000000e+00 : f32
      %42 = vector.broadcast %cst_19 : f32 to vector<1x128xf32>
      %c0_20 = arith.constant 0 : index
      %c0_21 = arith.constant 0 : index
      %43 = vector.load %arg6[%c0_20, %c0_21] : memref<1x128xf32, #tpu.memory_space<vmem>>, vector<1x128xf32>
      tpu.vector_store %arg6[%c0_20, %c0_21], %42 {strides = array<i32>} : memref<1x128xf32, #tpu.memory_space<vmem>>, vector<1x128xf32>,
    } else {
    }
    %c0 = arith.constant 0 : index
    %c0_1 = arith.constant 0 : index
    %c0_2 = arith.constant 0 : index
    %3 = vector.load %arg2[%c0, %c0_1, %c0_2] : memref<1x1x384xf32, #tpu.memory_space<vmem>>, vector<1x1x384xf32>
    %4 = vector.shape_cast %3 : vector<1x1x384xf32> to vector<1x384xf32>
    %c0_3 = arith.constant 0 : index
    %c0_4 = arith.constant 0 : index
    %5 = vector.load %arg6[%c0_3, %c0_4] : memref<1x128xf32, #tpu.memory_space<vmem>>, vector<1x128xf32>
    %6 = arith.truncf %5 : vector<1x128xf32> to vector<1x128xbf16>
    %c0_5 = arith.constant 0 : index
    %c0_6 = arith.constant 0 : index
    %c0_7 = arith.constant 0 : index
    %7 = vector.load %arg3[%c0_5, %c0_6, %c0_7] : memref<1x128x384xbf16, #tpu.memory_space<vmem>>, vector<1x128x384xbf16>
    %8 = vector.shape_cast %7 : vector<1x128x384xbf16> to vector<128x384xbf16>
    %cst = arith.constant dense<0.000000e+00> : vector<1x384xf32>
    %9 = tpu.matmul %6, %8, %cst {dimension_numbers = #tpu.dot_dimension_numbers<[1], [0], [0], [1], [0, 0, 1, 1], [], []>} : vector<1x128xbf16>, vector<128x384xbf16>, vector<1x384xf32> -> vector<1x384xf32>
    %c0_8 = arith.constant 0 : index
    %c0_9 = arith.constant 0 : index
    %c0_10 = arith.constant 0 : index
    %10 = vector.load %arg4[%c0_8, %c0_9, %c0_10] : memref<1x1x384xf32, #tpu.memory_space<vmem>>, vector<1x1x384xf32>
    %11 = vector.shape_cast %10 : vector<1x1x384xf32> to vector<1x384xf32>
    %12 = arith.addf %9, %11 : vector<1x384xf32>
    %13 = vector.extract_strided_slice %4 {offsets = [0, 0], sizes = [1, 128], strides = [1, 1]} : vector<1x384xf32> to vector<1x128xf32>
    %14 = vector.extract_strided_slice %12 {offsets = [0, 0], sizes = [1, 128], strides = [1, 1]} : vector<1x384xf32> to vector<1x128xf32>
    %15 = arith.addf %13, %14 : vector<1x128xf32>
    %16 = arith.negf %15 : vector<1x128xf32>
    %17 = math.exp %16 : vector<1x128xf32>
    %cst_11 = arith.constant 1.000000e+00 : f32
    %18 = vector.broadcast %cst_11 : f32 to vector<1x128xf32>
    %19 = arith.addf %18, %17 : vector<1x128xf32>
    %20 = arith.divf %18, %19 : vector<1x128xf32>
    %21 = vector.extract_strided_slice %4 {offsets = [0, 128], sizes = [1, 128], strides = [1, 1]} : vector<1x384xf32> to vector<1x128xf32>
    %22 = vector.extract_strided_slice %12 {offsets = [0, 128], sizes = [1, 128], strides = [1, 1]} : vector<1x384xf32> to vector<1x128xf32>
    %23 = arith.addf %21, %22 : vector<1x128xf32>
    %24 = arith.negf %23 : vector<1x128xf32>
    %25 = math.exp %24 : vector<1x128xf32>
    %cst_12 = arith.constant 1.000000e+00 : f32
    %26 = vector.broadcast %cst_12 : f32 to vector<1x128xf32>
    %27 = arith.addf %26, %25 : vector<1x128xf32>
    %28 = arith.divf %26, %27 : vector<1x128xf32>
    %29 = vector.extract_strided_slice %4 {offsets = [0, 256], sizes = [1, 128], strides = [1, 1]} : vector<1x384xf32> to vector<1x128xf32>
    %30 = vector.extract_strided_slice %12 {offsets = [0, 256], sizes = [1, 128], strides = [1, 1]} : vector<1x384xf32> to vector<1x128xf32>
    %31 = arith.mulf %20, %30 : vector<1x128xf32>
    %32 = arith.addf %29, %31 : vector<1x128xf32>
    %33 = math.tanh %32 : vector<1x128xf32>
    %cst_13 = arith.constant 1.000000e+00 : f32
    %34 = vector.broadcast %cst_13 : f32 to vector<1x128xf32>
    %35 = arith.subf %34, %28 : vector<1x128xf32>
    %36 = arith.mulf %35, %33 : vector<1x128xf32>
    %37 = arith.mulf %28, %5 : vector<1x128xf32>
    %38 = arith.addf %36, %37 : vector<1x128xf32>
    %c0_14 = arith.constant 0 : index
    %c0_15 = arith.constant 0 : index
    %39 = vector.load %arg6[%c0_14, %c0_15] : memref<1x128xf32, #tpu.memory_space<vmem>>, vector<1x128xf32>
    tpu.vector_store %arg6[%c0_14, %c0_15], %38 {strides = array<i32>} : memref<1x128xf32, #tpu.memory_space<vmem>>, vector<1x128xf32>,
    %40 = vector.shape_cast %38 : vector<1x128xf32> to vector<1x1x128xf32>
    %c0_16 = arith.constant 0 : index
    %c0_17 = arith.constant 0 : index
    %c0_18 = arith.constant 0 : index
    %41 = vector.load %arg5[%c0_16, %c0_17, %c0_18] : memref<1x1x128xf32, #tpu.memory_space<vmem>>, vector<1x1x128xf32>
    tpu.vector_store %arg5[%c0_16, %c0_17, %c0_18], %40 {strides = array<i32>} : memref<1x1x128xf32, #tpu.memory_space<vmem>>, vector<1x1x128xf32>,
    return
  }
  func.func @transform_0(%arg0: i32, %arg1: i32) -> (i32, i32, i32) {
    %c2_i32 = arith.constant 2 : i32
    %0 = arith.muli %c2_i32, %arg1 : i32
    %c1_i32 = arith.constant 1 : i32
    %1 = arith.subi %c1_i32, %0 : i32
    %2 = arith.muli %arg0, %1 : i32
    %3 = arith.addi %arg1, %2 : i32
    %c0_i32 = arith.constant 0 : i32
    %c0_i32_0 = arith.constant 0 : i32
    return %3, %c0_i32, %arg0 : i32, i32, i32
  }
  func.func @transform_1(%arg0: i32, %arg1: i32) -> (i32, i32, i32) {
    %c0_i32 = arith.constant 0 : i32
    %c0_i32_0 = arith.constant 0 : i32
    %c0_i32_1 = arith.constant 0 : i32
    return %arg0, %c0_i32, %c0_i32_0 : i32, i32, i32
  }
  func.func @transform_2(%arg0: i32, %arg1: i32) -> (i32, i32, i32) {
    %c0_i32 = arith.constant 0 : i32
    %c0_i32_0 = arith.constant 0 : i32
    %c0_i32_1 = arith.constant 0 : i32
    return %arg0, %c0_i32, %c0_i32_0 : i32, i32, i32
  }
  func.func @transform_3(%arg0: i32, %arg1: i32) -> (i32, i32, i32) {
    %c2_i32 = arith.constant 2 : i32
    %0 = arith.muli %c2_i32, %arg1 : i32
    %c1_i32 = arith.constant 1 : i32
    %1 = arith.subi %c1_i32, %0 : i32
    %2 = arith.muli %arg0, %1 : i32
    %3 = arith.addi %arg1, %2 : i32
    %c0_i32 = arith.constant 0 : i32
    %c0_i32_0 = arith.constant 0 : i32
    return %3, %c0_i32, %arg0 : i32, i32, i32
  }
}

module attributes {stable_mosaic.version = 11 : i64} {
  func.func @attn_pool_kernel(%arg0: memref<2x256xf32, #tpu.memory_space<vmem>>, %arg1: memref<1x2xf32, #tpu.memory_space<vmem>>, %arg2: memref<256x256xbf16, #tpu.memory_space<vmem>>, %arg3: memref<1x256xf32, #tpu.memory_space<vmem>>, %arg4: memref<1x256xf32, #tpu.memory_space<vmem>>, %arg5: memref<1x256xf32, #tpu.memory_space<vmem>>) attributes {dimension_semantics = [], scalar_prefetch = 0 : i64, scratch_operands = 0 : i64, tpu.core_type = #tpu.core_type<tc>} {
    %c0 = arith.constant 0 : index
    %c0_0 = arith.constant 0 : index
    %0 = vector.load %arg0[%c0, %c0_0] : memref<2x256xf32, #tpu.memory_space<vmem>>, vector<2x256xf32>
    %1 = arith.truncf %0 : vector<2x256xf32> to vector<2x256xbf16>
    %c0_1 = arith.constant 0 : index
    %c0_2 = arith.constant 0 : index
    %2 = vector.load %arg2[%c0_1, %c0_2] : memref<256x256xbf16, #tpu.memory_space<vmem>>, vector<256x256xbf16>
    %cst = arith.constant dense<0.000000e+00> : vector<2x256xf32>
    %3 = tpu.matmul %1, %2, %cst {dimension_numbers = #tpu.dot_dimension_numbers<[1], [0], [0], [1], [0, 0, 1, 1], [], []>} : vector<2x256xbf16>, vector<256x256xbf16>, vector<2x256xf32> -> vector<2x256xf32>
    %c0_3 = arith.constant 0 : index
    %c0_4 = arith.constant 0 : index
    %4 = vector.load %arg3[%c0_3, %c0_4] : memref<1x256xf32, #tpu.memory_space<vmem>>, vector<1x256xf32>
    %5 = vector.broadcast %4 : vector<1x256xf32> to vector<2x256xf32>
    %6 = arith.addf %3, %5 : vector<2x256xf32>
    %7 = math.tanh %6 : vector<2x256xf32>
    %c0_5 = arith.constant 0 : index
    %c0_6 = arith.constant 0 : index
    %8 = vector.load %arg4[%c0_5, %c0_6] : memref<1x256xf32, #tpu.memory_space<vmem>>, vector<1x256xf32>
    %9 = vector.broadcast %8 : vector<1x256xf32> to vector<2x256xf32>
    %10 = arith.mulf %7, %9 : vector<2x256xf32>
    %cst_7 = arith.constant dense<0.000000e+00> : vector<2xf32>
    %11 = vector.multi_reduction <add>, %10, %cst_7 [1] : vector<2x256xf32> to vector<2xf32>
    %12 = vector.shape_cast %11 : vector<2xf32> to vector<2x1xf32>
    %cst_8 = arith.constant dense<0xFF800000> : vector<1xf32>
    %13 = vector.multi_reduction <maximumf>, %12, %cst_8 [0] : vector<2x1xf32> to vector<1xf32>
    %14 = vector.shape_cast %13 : vector<1xf32> to vector<1x1xf32>
    %15 = vector.broadcast %14 : vector<1x1xf32> to vector<2x1xf32>
    %16 = arith.subf %12, %15 : vector<2x1xf32>
    %17 = math.exp %16 : vector<2x1xf32>
    %c0_9 = arith.constant 0 : index
    %c0_10 = arith.constant 0 : index
    %18 = vector.load %arg1[%c0_9, %c0_10] : memref<1x2xf32, #tpu.memory_space<vmem>>, vector<1x2xf32>
    %19 = vector.broadcast %17 : vector<2x1xf32> to vector<2x256xf32>
    %20 = arith.mulf %19, %0 : vector<2x256xf32>
    %cst_11 = arith.constant dense<0.000000e+00> : vector<1x256xf32>
    %21 = tpu.matmul %18, %20, %cst_11 {dimension_numbers = #tpu.dot_dimension_numbers<[1], [0], [0], [1], [0, 0, 1, 1], [], []>} : vector<1x2xf32>, vector<2x256xf32>, vector<1x256xf32> -> vector<1x256xf32>
    %c0_12 = arith.constant 0 : index
    %c0_13 = arith.constant 0 : index
    %22 = vector.load %arg1[%c0_12, %c0_13] : memref<1x2xf32, #tpu.memory_space<vmem>>, vector<1x2xf32>
    %cst_14 = arith.constant dense<0.000000e+00> : vector<1x1xf32>
    %23 = tpu.matmul %22, %17, %cst_14 {dimension_numbers = #tpu.dot_dimension_numbers<[1], [0], [0], [1], [0, 0, 1, 1], [], []>} : vector<1x2xf32>, vector<2x1xf32>, vector<1x1xf32> -> vector<1x1xf32>
    %24 = vector.broadcast %23 : vector<1x1xf32> to vector<1x256xf32>
    %25 = arith.divf %21, %24 : vector<1x256xf32>
    %c0_15 = arith.constant 0 : index
    %c0_16 = arith.constant 0 : index
    %26 = vector.load %arg5[%c0_15, %c0_16] : memref<1x256xf32, #tpu.memory_space<vmem>>, vector<1x256xf32>
    tpu.vector_store %arg5[%c0_15, %c0_16], %25 {strides = array<i32>} : memref<1x256xf32, #tpu.memory_space<vmem>>, vector<1x256xf32>,
    return
  }
}

module attributes {stable_mosaic.version = 11 : i64} {
  func.func @attn_pool_kernel(%arg0: memref<6x256xf32, #tpu.memory_space<vmem>>, %arg1: memref<1x6xf32, #tpu.memory_space<vmem>>, %arg2: memref<256x256xbf16, #tpu.memory_space<vmem>>, %arg3: memref<1x256xf32, #tpu.memory_space<vmem>>, %arg4: memref<1x256xf32, #tpu.memory_space<vmem>>, %arg5: memref<1x256xf32, #tpu.memory_space<vmem>>) attributes {dimension_semantics = [], scalar_prefetch = 0 : i64, scratch_operands = 0 : i64, tpu.core_type = #tpu.core_type<tc>} {
    %c0 = arith.constant 0 : index
    %c0_0 = arith.constant 0 : index
    %0 = vector.load %arg0[%c0, %c0_0] : memref<6x256xf32, #tpu.memory_space<vmem>>, vector<6x256xf32>
    %1 = arith.truncf %0 : vector<6x256xf32> to vector<6x256xbf16>
    %c0_1 = arith.constant 0 : index
    %c0_2 = arith.constant 0 : index
    %2 = vector.load %arg2[%c0_1, %c0_2] : memref<256x256xbf16, #tpu.memory_space<vmem>>, vector<256x256xbf16>
    %cst = arith.constant dense<0.000000e+00> : vector<6x256xf32>
    %3 = tpu.matmul %1, %2, %cst {dimension_numbers = #tpu.dot_dimension_numbers<[1], [0], [0], [1], [0, 0, 1, 1], [], []>} : vector<6x256xbf16>, vector<256x256xbf16>, vector<6x256xf32> -> vector<6x256xf32>
    %c0_3 = arith.constant 0 : index
    %c0_4 = arith.constant 0 : index
    %4 = vector.load %arg3[%c0_3, %c0_4] : memref<1x256xf32, #tpu.memory_space<vmem>>, vector<1x256xf32>
    %5 = vector.broadcast %4 : vector<1x256xf32> to vector<6x256xf32>
    %6 = arith.addf %3, %5 : vector<6x256xf32>
    %7 = math.tanh %6 : vector<6x256xf32>
    %c0_5 = arith.constant 0 : index
    %c0_6 = arith.constant 0 : index
    %8 = vector.load %arg4[%c0_5, %c0_6] : memref<1x256xf32, #tpu.memory_space<vmem>>, vector<1x256xf32>
    %9 = vector.broadcast %8 : vector<1x256xf32> to vector<6x256xf32>
    %10 = arith.mulf %7, %9 : vector<6x256xf32>
    %cst_7 = arith.constant dense<0.000000e+00> : vector<6xf32>
    %11 = vector.multi_reduction <add>, %10, %cst_7 [1] : vector<6x256xf32> to vector<6xf32>
    %12 = vector.shape_cast %11 : vector<6xf32> to vector<6x1xf32>
    %cst_8 = arith.constant dense<0xFF800000> : vector<1xf32>
    %13 = vector.multi_reduction <maximumf>, %12, %cst_8 [0] : vector<6x1xf32> to vector<1xf32>
    %14 = vector.shape_cast %13 : vector<1xf32> to vector<1x1xf32>
    %15 = vector.broadcast %14 : vector<1x1xf32> to vector<6x1xf32>
    %16 = arith.subf %12, %15 : vector<6x1xf32>
    %17 = math.exp %16 : vector<6x1xf32>
    %c0_9 = arith.constant 0 : index
    %c0_10 = arith.constant 0 : index
    %18 = vector.load %arg1[%c0_9, %c0_10] : memref<1x6xf32, #tpu.memory_space<vmem>>, vector<1x6xf32>
    %19 = vector.broadcast %17 : vector<6x1xf32> to vector<6x256xf32>
    %20 = arith.mulf %19, %0 : vector<6x256xf32>
    %cst_11 = arith.constant dense<0.000000e+00> : vector<1x256xf32>
    %21 = tpu.matmul %18, %20, %cst_11 {dimension_numbers = #tpu.dot_dimension_numbers<[1], [0], [0], [1], [0, 0, 1, 1], [], []>} : vector<1x6xf32>, vector<6x256xf32>, vector<1x256xf32> -> vector<1x256xf32>
    %c0_12 = arith.constant 0 : index
    %c0_13 = arith.constant 0 : index
    %22 = vector.load %arg1[%c0_12, %c0_13] : memref<1x6xf32, #tpu.memory_space<vmem>>, vector<1x6xf32>
    %cst_14 = arith.constant dense<0.000000e+00> : vector<1x1xf32>
    %23 = tpu.matmul %22, %17, %cst_14 {dimension_numbers = #tpu.dot_dimension_numbers<[1], [0], [0], [1], [0, 0, 1, 1], [], []>} : vector<1x6xf32>, vector<6x1xf32>, vector<1x1xf32> -> vector<1x1xf32>
    %24 = vector.broadcast %23 : vector<1x1xf32> to vector<1x256xf32>
    %25 = arith.divf %21, %24 : vector<1x256xf32>
    %c0_15 = arith.constant 0 : index
    %c0_16 = arith.constant 0 : index
    %26 = vector.load %arg5[%c0_15, %c0_16] : memref<1x256xf32, #tpu.memory_space<vmem>>, vector<1x256xf32>
    tpu.vector_store %arg5[%c0_15, %c0_16], %25 {strides = array<i32>} : memref<1x256xf32, #tpu.memory_space<vmem>>, vector<1x256xf32>,
    return
  }
}

module attributes {stable_mosaic.version = 11 : i64} {
  func.func @head_kernel(%arg0: memref<1x768xf32, #tpu.memory_space<vmem>>, %arg1: memref<1x768xf32, #tpu.memory_space<vmem>>, %arg2: memref<768x256xbf16, #tpu.memory_space<vmem>>, %arg3: memref<768x256xbf16, #tpu.memory_space<vmem>>, %arg4: memref<1x256xf32, #tpu.memory_space<vmem>>, %arg5: memref<1x256xf32, #tpu.memory_space<vmem>>, %arg6: memref<1x1xf32, #tpu.memory_space<vmem>>, %arg7: memref<1x1xf32, #tpu.memory_space<vmem>>) attributes {dimension_semantics = [], scalar_prefetch = 0 : i64, scratch_operands = 0 : i64, tpu.core_type = #tpu.core_type<tc>} {
    %c0 = arith.constant 0 : index
    %c0_0 = arith.constant 0 : index
    %0 = vector.load %arg0[%c0, %c0_0] : memref<1x768xf32, #tpu.memory_space<vmem>>, vector<1x768xf32>
    %1 = arith.truncf %0 : vector<1x768xf32> to vector<1x768xbf16>
    %c0_1 = arith.constant 0 : index
    %c0_2 = arith.constant 0 : index
    %2 = vector.load %arg2[%c0_1, %c0_2] : memref<768x256xbf16, #tpu.memory_space<vmem>>, vector<768x256xbf16>
    %cst = arith.constant dense<0.000000e+00> : vector<1x256xf32>
    %3 = tpu.matmul %1, %2, %cst {dimension_numbers = #tpu.dot_dimension_numbers<[1], [0], [0], [1], [0, 0, 1, 1], [], []>} : vector<1x768xbf16>, vector<768x256xbf16>, vector<1x256xf32> -> vector<1x256xf32>
    %c0_3 = arith.constant 0 : index
    %c0_4 = arith.constant 0 : index
    %4 = vector.load %arg1[%c0_3, %c0_4] : memref<1x768xf32, #tpu.memory_space<vmem>>, vector<1x768xf32>
    %5 = arith.truncf %4 : vector<1x768xf32> to vector<1x768xbf16>
    %c0_5 = arith.constant 0 : index
    %c0_6 = arith.constant 0 : index
    %6 = vector.load %arg3[%c0_5, %c0_6] : memref<768x256xbf16, #tpu.memory_space<vmem>>, vector<768x256xbf16>
    %cst_7 = arith.constant dense<0.000000e+00> : vector<1x256xf32>
    %7 = tpu.matmul %5, %6, %cst_7 {dimension_numbers = #tpu.dot_dimension_numbers<[1], [0], [0], [1], [0, 0, 1, 1], [], []>} : vector<1x768xbf16>, vector<768x256xbf16>, vector<1x256xf32> -> vector<1x256xf32>
    %8 = arith.addf %3, %7 : vector<1x256xf32>
    %c0_8 = arith.constant 0 : index
    %c0_9 = arith.constant 0 : index
    %9 = vector.load %arg4[%c0_8, %c0_9] : memref<1x256xf32, #tpu.memory_space<vmem>>, vector<1x256xf32>
    %10 = arith.addf %8, %9 : vector<1x256xf32>
    %cst_10 = arith.constant 0.000000e+00 : f32
    %11 = vector.broadcast %cst_10 : f32 to vector<1x256xf32>
    %12 = arith.maximumf %10, %11 : vector<1x256xf32>
    %c0_11 = arith.constant 0 : index
    %c0_12 = arith.constant 0 : index
    %13 = vector.load %arg5[%c0_11, %c0_12] : memref<1x256xf32, #tpu.memory_space<vmem>>, vector<1x256xf32>
    %14 = arith.mulf %12, %13 : vector<1x256xf32>
    %cst_13 = arith.constant dense<0.000000e+00> : vector<1xf32>
    %15 = vector.multi_reduction <add>, %14, %cst_13 [1] : vector<1x256xf32> to vector<1xf32>
    %16 = vector.shape_cast %15 : vector<1xf32> to vector<1x1xf32>
    %c0_14 = arith.constant 0 : index
    %c0_15 = arith.constant 0 : index
    %17 = vector.load %arg6[%c0_14, %c0_15] : memref<1x1xf32, #tpu.memory_space<vmem>>, vector<1x1xf32>
    %18 = arith.addf %16, %17 : vector<1x1xf32>
    %19 = arith.negf %18 : vector<1x1xf32>
    %20 = math.exp %19 : vector<1x1xf32>
    %cst_16 = arith.constant 1.000000e+00 : f32
    %21 = vector.broadcast %cst_16 : f32 to vector<1x1xf32>
    %22 = arith.addf %21, %20 : vector<1x1xf32>
    %23 = arith.divf %21, %22 : vector<1x1xf32>
    %c0_17 = arith.constant 0 : index
    %c0_18 = arith.constant 0 : index
    %24 = vector.load %arg7[%c0_17, %c0_18] : memref<1x1xf32, #tpu.memory_space<vmem>>, vector<1x1xf32>
    tpu.vector_store %arg7[%c0_17, %c0_18], %23 {strides = array<i32>} : memref<1x1xf32, #tpu.memory_space<vmem>>, vector<1x1xf32>,
    return
  }
}

module attributes {stable_mosaic.version = 11 : i64} {
  func.func @gru_step_kernel(%arg0: i32, %arg1: i32, %arg2: memref<1x1x384xf32, #tpu.memory_space<vmem>>, %arg3: memref<1x128x384xbf16, #tpu.memory_space<vmem>>, %arg4: memref<1x1x384xf32, #tpu.memory_space<vmem>>, %arg5: memref<1x1x128xf32, #tpu.memory_space<vmem>>, %arg6: memref<1x128xf32, #tpu.memory_space<vmem>>) attributes {dimension_semantics = [#tpu.dimension_semantics<parallel>, #tpu.dimension_semantics<arbitrary>], iteration_bounds = array<i64: 2, 6>, scalar_prefetch = 0 : i64, scratch_operands = 1 : i64, tpu.core_type = #tpu.core_type<tc>, window_params = [{transform_indices = @transform_0, window_bounds = array<i64: 1, 1, 384>}, {transform_indices = @transform_1, window_bounds = array<i64: 1, 128, 384>}, {transform_indices = @transform_2, window_bounds = array<i64: 1, 1, 384>}, {transform_indices = @transform_3, window_bounds = array<i64: 1, 1, 128>}]} {
    %c0_i32 = arith.constant 0 : i32
    %0 = arith.cmpi eq, %arg1, %c0_i32 : i32
    %1 = arith.extui %0 : i1 to i32
    %c0_i32_0 = arith.constant 0 : i32
    %2 = arith.cmpi ne, %1, %c0_i32_0 : i32
    scf.if %2 {
      %cst_19 = arith.constant 0.000000e+00 : f32
      %42 = vector.broadcast %cst_19 : f32 to vector<1x128xf32>
      %c0_20 = arith.constant 0 : index
      %c0_21 = arith.constant 0 : index
      %43 = vector.load %arg6[%c0_20, %c0_21] : memref<1x128xf32, #tpu.memory_space<vmem>>, vector<1x128xf32>
      tpu.vector_store %arg6[%c0_20, %c0_21], %42 {strides = array<i32>} : memref<1x128xf32, #tpu.memory_space<vmem>>, vector<1x128xf32>,
    } else {
    }
    %c0 = arith.constant 0 : index
    %c0_1 = arith.constant 0 : index
    %c0_2 = arith.constant 0 : index
    %3 = vector.load %arg2[%c0, %c0_1, %c0_2] : memref<1x1x384xf32, #tpu.memory_space<vmem>>, vector<1x1x384xf32>
    %4 = vector.shape_cast %3 : vector<1x1x384xf32> to vector<1x384xf32>
    %c0_3 = arith.constant 0 : index
    %c0_4 = arith.constant 0 : index
    %5 = vector.load %arg6[%c0_3, %c0_4] : memref<1x128xf32, #tpu.memory_space<vmem>>, vector<1x128xf32>
    %6 = arith.truncf %5 : vector<1x128xf32> to vector<1x128xbf16>
    %c0_5 = arith.constant 0 : index
    %c0_6 = arith.constant 0 : index
    %c0_7 = arith.constant 0 : index
    %7 = vector.load %arg3[%c0_5, %c0_6, %c0_7] : memref<1x128x384xbf16, #tpu.memory_space<vmem>>, vector<1x128x384xbf16>
    %8 = vector.shape_cast %7 : vector<1x128x384xbf16> to vector<128x384xbf16>
    %cst = arith.constant dense<0.000000e+00> : vector<1x384xf32>
    %9 = tpu.matmul %6, %8, %cst {dimension_numbers = #tpu.dot_dimension_numbers<[1], [0], [0], [1], [0, 0, 1, 1], [], []>} : vector<1x128xbf16>, vector<128x384xbf16>, vector<1x384xf32> -> vector<1x384xf32>
    %c0_8 = arith.constant 0 : index
    %c0_9 = arith.constant 0 : index
    %c0_10 = arith.constant 0 : index
    %10 = vector.load %arg4[%c0_8, %c0_9, %c0_10] : memref<1x1x384xf32, #tpu.memory_space<vmem>>, vector<1x1x384xf32>
    %11 = vector.shape_cast %10 : vector<1x1x384xf32> to vector<1x384xf32>
    %12 = arith.addf %9, %11 : vector<1x384xf32>
    %13 = vector.extract_strided_slice %4 {offsets = [0, 0], sizes = [1, 128], strides = [1, 1]} : vector<1x384xf32> to vector<1x128xf32>
    %14 = vector.extract_strided_slice %12 {offsets = [0, 0], sizes = [1, 128], strides = [1, 1]} : vector<1x384xf32> to vector<1x128xf32>
    %15 = arith.addf %13, %14 : vector<1x128xf32>
    %16 = arith.negf %15 : vector<1x128xf32>
    %17 = math.exp %16 : vector<1x128xf32>
    %cst_11 = arith.constant 1.000000e+00 : f32
    %18 = vector.broadcast %cst_11 : f32 to vector<1x128xf32>
    %19 = arith.addf %18, %17 : vector<1x128xf32>
    %20 = arith.divf %18, %19 : vector<1x128xf32>
    %21 = vector.extract_strided_slice %4 {offsets = [0, 128], sizes = [1, 128], strides = [1, 1]} : vector<1x384xf32> to vector<1x128xf32>
    %22 = vector.extract_strided_slice %12 {offsets = [0, 128], sizes = [1, 128], strides = [1, 1]} : vector<1x384xf32> to vector<1x128xf32>
    %23 = arith.addf %21, %22 : vector<1x128xf32>
    %24 = arith.negf %23 : vector<1x128xf32>
    %25 = math.exp %24 : vector<1x128xf32>
    %cst_12 = arith.constant 1.000000e+00 : f32
    %26 = vector.broadcast %cst_12 : f32 to vector<1x128xf32>
    %27 = arith.addf %26, %25 : vector<1x128xf32>
    %28 = arith.divf %26, %27 : vector<1x128xf32>
    %29 = vector.extract_strided_slice %4 {offsets = [0, 256], sizes = [1, 128], strides = [1, 1]} : vector<1x384xf32> to vector<1x128xf32>
    %30 = vector.extract_strided_slice %12 {offsets = [0, 256], sizes = [1, 128], strides = [1, 1]} : vector<1x384xf32> to vector<1x128xf32>
    %31 = arith.mulf %20, %30 : vector<1x128xf32>
    %32 = arith.addf %29, %31 : vector<1x128xf32>
    %33 = math.tanh %32 : vector<1x128xf32>
    %cst_13 = arith.constant 1.000000e+00 : f32
    %34 = vector.broadcast %cst_13 : f32 to vector<1x128xf32>
    %35 = arith.subf %34, %28 : vector<1x128xf32>
    %36 = arith.mulf %35, %33 : vector<1x128xf32>
    %37 = arith.mulf %28, %5 : vector<1x128xf32>
    %38 = arith.addf %36, %37 : vector<1x128xf32>
    %c0_14 = arith.constant 0 : index
    %c0_15 = arith.constant 0 : index
    %39 = vector.load %arg6[%c0_14, %c0_15] : memref<1x128xf32, #tpu.memory_space<vmem>>, vector<1x128xf32>
    tpu.vector_store %arg6[%c0_14, %c0_15], %38 {strides = array<i32>} : memref<1x128xf32, #tpu.memory_space<vmem>>, vector<1x128xf32>,
    %40 = vector.shape_cast %38 : vector<1x128xf32> to vector<1x1x128xf32>
    %c0_16 = arith.constant 0 : index
    %c0_17 = arith.constant 0 : index
    %c0_18 = arith.constant 0 : index
    %41 = vector.load %arg5[%c0_16, %c0_17, %c0_18] : memref<1x1x128xf32, #tpu.memory_space<vmem>>, vector<1x1x128xf32>
    tpu.vector_store %arg5[%c0_16, %c0_17, %c0_18], %40 {strides = array<i32>} : memref<1x1x128xf32, #tpu.memory_space<vmem>>, vector<1x1x128xf32>,
    return
  }
  func.func @transform_0(%arg0: i32, %arg1: i32) -> (i32, i32, i32) {
    %c2_i32 = arith.constant 2 : i32
    %0 = arith.muli %c2_i32, %arg1 : i32
    %c5_i32 = arith.constant 5 : i32
    %1 = arith.subi %c5_i32, %0 : i32
    %2 = arith.muli %arg0, %1 : i32
    %3 = arith.addi %arg1, %2 : i32
    %c0_i32 = arith.constant 0 : i32
    %c0_i32_0 = arith.constant 0 : i32
    return %3, %c0_i32, %arg0 : i32, i32, i32
  }
  func.func @transform_1(%arg0: i32, %arg1: i32) -> (i32, i32, i32) {
    %c0_i32 = arith.constant 0 : i32
    %c0_i32_0 = arith.constant 0 : i32
    %c0_i32_1 = arith.constant 0 : i32
    return %arg0, %c0_i32, %c0_i32_0 : i32, i32, i32
  }
  func.func @transform_2(%arg0: i32, %arg1: i32) -> (i32, i32, i32) {
    %c0_i32 = arith.constant 0 : i32
    %c0_i32_0 = arith.constant 0 : i32
    %c0_i32_1 = arith.constant 0 : i32
    return %arg0, %c0_i32, %c0_i32_0 : i32, i32, i32
  }
  func.func @transform_3(%arg0: i32, %arg1: i32) -> (i32, i32, i32) {
    %c2_i32 = arith.constant 2 : i32
    %0 = arith.muli %c2_i32, %arg1 : i32
    %c5_i32 = arith.constant 5 : i32
    %1 = arith.subi %c5_i32, %0 : i32
    %2 = arith.muli %arg0, %1 : i32
    %3 = arith.addi %arg1, %2 : i32
    %c0_i32 = arith.constant 0 : i32
    %c0_i32_0 = arith.constant 0 : i32
    return %3, %c0_i32, %arg0 : i32, i32, i32
  }
}

</mosaic_0001>

<bundles_post_ra>
// kernel: siamese_forward.38
= control target key start
LH: loop header
LB: loop body
LE: loop exit
PB: predicated region body
PF: predicated region fallthrough
CT: control target
= control target key end

     0   :  { %v64_v42 = vlaneseq  ;;  %vm342_vm0 = vcmask 195584   ;;  %vm631_vm1 = vmmov 0   ;;  %s818_s2 = inlined_call_operand.vmem [shape: bf16[256,256], index: 2, kind: input, shape index: {}]   ;;  %s819_s0 = inlined_call_operand.vmem [shape: f32[24,256], index: 0, kind: input, shape index: {}]   ;;  %s820_s3 = inlined_call_operand.vmem [shape: f32[1,256], index: 3, kind: input, shape index: {}]   ;;  %s821_s4 = inlined_call_operand.vmem [shape: f32[1,256], index: 4, kind: input, shape index: {}]   ;;  %s822_s1 = inlined_call_operand.vmem [shape: f32[6,24], index: 1, kind: input, shape index: {}]   ;;  %s823_s5 = inlined_call_operand.vmem [shape: f32[6,256], index: 5, kind: output, shape index: {}]  }
   0x1   :  { %v561_v0 = vld [vmem:[%s818_s2 + $0x4] ss:$8 sps:$4 sm:$0xff]   ;;  %v563_v1 = vld [vmem:[%s818_s2] ss:$8 sps:$4 sm:$0xff]   ;;  %v564_v2 = vld [vmem:[%s818_s2 + $0x14] ss:$8 sps:$4 sm:$0xff]  }
   0x2   :  { %234 = vmatprep.subr.bf16.mxu0 %v561_v0  ;;  %v566_v3 = vld [vmem:[%s818_s2 + $0x10] ss:$8 sps:$4 sm:$0xff]   ;;  %v567_v4 = vld [vmem:[%s818_s2 + $0x24] ss:$8 sps:$4 sm:$0xff]   ;;  %v569_v5 = vld [vmem:[%s818_s2 + $0x20] ss:$8 sps:$4 sm:$0xff]  }
   0x3   :  { %235 = vmatpush1.bf16.msra.mxu0 %v563_v1  ;;  %v570_v6 = vld [vmem:[%s818_s2 + $0x34] ss:$8 sps:$4 sm:$0xff]   ;;  %v572_v7 = vld [vmem:[%s818_s2 + $0x30] ss:$8 sps:$4 sm:$0xff]   ;;  %v573_v8 = vld [vmem:[%s818_s2 + $0x44] ss:$8 sps:$4 sm:$0xff]  }
   0x4   :  { %236 = vmatprep.subr.bf16.mxu0 %v564_v2  ;;  %v575_v9 = vld [vmem:[%s818_s2 + $0x40] ss:$8 sps:$4 sm:$0xff]   ;;  %v576_v10 = vld [vmem:[%s818_s2 + $0x54] ss:$8 sps:$4 sm:$0xff]   ;;  %v578_v11 = vld [vmem:[%s818_s2 + $0x50] ss:$8 sps:$4 sm:$0xff]  }
   0x5   :  { %v579_v12 = vld [vmem:[%s818_s2 + $0x64] ss:$8 sps:$4 sm:$0xff]   ;;  %v710_v14 = vld [vmem:[%s819_s0 + $0x18] sm:$0xff]  ;;  %v581_v16 = vld [vmem:[%s818_s2 + $0x60] ss:$8 sps:$4 sm:$0xff]   ;;  %v65_v43 = vshrl.u32 %v64_v42, 7 }
   0x6   :  { %v705_v13 = vld [vmem:[%s819_s0 + $0x8] sm:$0xff]  ;;  %v582_v17 = vld [vmem:[%s818_s2 + $0x74] ss:$8 sps:$4 sm:$0xff]   ;;  %v584_v18 = vld [vmem:[%s818_s2 + $0x70] ss:$8 sps:$4 sm:$0xff]  }
   0x7   :  { %237 = vmatpush1.bf16.msra.mxu0 %v566_v3  ;;  %v27_v15 = vpack.c.bf16 %v710_v14, %v705_v13  ;;  %v585_v19 = vld [vmem:[%s818_s2 + $0x84] ss:$8 sps:$4 sm:$0xff]   ;;  %v587_v20 = vld [vmem:[%s818_s2 + $0x80] ss:$8 sps:$4 sm:$0xff]   ;;  %v588_v21 = vld [vmem:[%s818_s2 + $0x94] ss:$8 sps:$4 sm:$0xff]  }
   0x8   :  { %238 = vmatprep.subr.bf16.mxu0 %v567_v4  ;;  %v590_v22 = vld [vmem:[%s818_s2 + $0x90] ss:$8 sps:$4 sm:$0xff]   ;;  %v591_v23 = vld [vmem:[%s818_s2 + $0xa4] ss:$8 sps:$4 sm:$0xff]   ;;  %v593_v24 = vld [vmem:[%s818_s2 + $0xa0] ss:$8 sps:$4 sm:$0xff]  }
   0x9   :  { %266 = vmatprep.mubr.bf16.mxu0 %v27_v15  ;;  %v594_v25 = vld [vmem:[%s818_s2 + $0xb4] ss:$8 sps:$4 sm:$0xff]   ;;  %v596_v26 = vld [vmem:[%s818_s2 + $0xb0] ss:$8 sps:$4 sm:$0xff]   ;;  %v597_v27 = vld [vmem:[%s818_s2 + $0xc4] ss:$8 sps:$4 sm:$0xff]  }
   0xa   :  { %v599_v28 = vld [vmem:[%s818_s2 + $0xc0] ss:$8 sps:$4 sm:$0xff]   ;;  %v600_v29 = vld [vmem:[%s818_s2 + $0xd4] ss:$8 sps:$4 sm:$0xff]   ;;  %v602_v30 = vld [vmem:[%s818_s2 + $0xd0] ss:$8 sps:$4 sm:$0xff]  }
   0xb   :  { %239 = vmatpush1.bf16.msra.mxu0 %v569_v5  ;;  %v603_v31 = vld [vmem:[%s818_s2 + $0xe4] ss:$8 sps:$4 sm:$0xff]   ;;  %v605_v32 = vld [vmem:[%s818_s2 + $0xe0] ss:$8 sps:$4 sm:$0xff]   ;;  %v606_v33 = vld [vmem:[%s818_s2 + $0xf4] ss:$8 sps:$4 sm:$0xff]  }
   0xc   :  { %240 = vmatprep.subr.bf16.mxu0 %v570_v6  ;;  %v608_v34 = vld [vmem:[%s818_s2 + $0xf0] ss:$8 sps:$4 sm:$0xff]   ;;  %v774_v35 = vld [vmem:[%s819_s0] sm:$0xff]  ;;  %v784_v37 = vld [vmem:[%s819_s0 + $0x28] sm:$0xff]  ;;  %v66_v44 = vsub.s32 0, %v65_v43  ;;  %v70_v46 = vsub.s32 1, %v65_v43 }
   0xd   :  { %v779_v36 = vld [vmem:[%s819_s0 + $0x10] sm:$0xff]  ;;  %v29_v39 = vpack.c.bf16 %v784_v37, %v784_v37  ;;  %v793_v40 = vld [vmem:[%s819_s0 + $0x20] sm:$0xff] }
   0xe   :  { %v26_v38 = vpack.c.bf16 %v779_v36, %v774_v35  ;;  %v28_v41 = vpack.c.bf16 %v793_v40, %v793_v40  ;;  %v62_v45 = vld [vmem:[%s820_s3] sm:$0x3] }
   0xf   :  { %241 = vmatpush1.bf16.msra.mxu0 %v572_v7  ;;  %v67_v47 = vrot.slane %v62_v45, %v66_v44  ;;  %v71_v48 = vrot.slane %v62_v45, %v70_v46  ;;  %v291_v57 = vld [vmem:[%s821_s4] sm:$0x3] }
  0x10   :  { %242 = vmatprep.subr.bf16.mxu0 %v573_v8  ;;  %v296_v63 = vrot.slane %v291_v57, %v66_v44  ;;  %v300_v1 = vrot.slane %v291_v57, %v70_v46 }
  0x13   :  { %243 = vmatpush1.bf16.msra.mxu0 %v575_v9 }
  0x14   :  { %244 = vmatprep.subr.bf16.mxu0 %v576_v10 }
  0x17   :  { %245 = vmatpush1.bf16.msra.mxu0 %v578_v11 }
  0x18   :  { %246 = vmatprep.subr.bf16.mxu0 %v579_v12 }
  0x1b   :  { %247 = vmatpush1.bf16.msra.mxu0 %v581_v16 }
  0x1c   :  { %248 = vmatprep.subr.bf16.mxu0 %v582_v17 }
  0x1f   :  { %249 = vmatpush1.bf16.msra.mxu0 %v584_v18 }
  0x20   :  { %250 = vmatprep.subr.bf16.mxu0 %v585_v19  ;;  %v629_v19 = vmov 0.0  }
  0x21   :  { %410 = vmatprep.mubr.f32.mxu1 %v629_v19 }
  0x23   :  { %251 = vmatpush1.bf16.msra.mxu0 %v587_v20 }
  0x24   :  { %252 = vmatprep.subr.bf16.mxu0 %v588_v21 }
  0x27   :  { %253 = vmatpush1.bf16.msra.mxu0 %v590_v22 }
  0x28   :  { %254 = vmatprep.subr.bf16.mxu0 %v591_v23 }
  0x2b   :  { %255 = vmatpush1.bf16.msra.mxu0 %v593_v24 }
  0x2c   :  { %256 = vmatprep.subr.bf16.mxu0 %v594_v25 }
  0x2f   :  { %257 = vmatpush1.bf16.msra.mxu0 %v596_v26 }
  0x30   :  { %258 = vmatprep.subr.bf16.mxu0 %v597_v27 }
  0x33   :  { %259 = vmatpush1.bf16.msra.mxu0 %v599_v28 }
  0x34   :  { %260 = vmatprep.subr.bf16.mxu0 %v600_v29 }
  0x37   :  { %261 = vmatpush1.bf16.msra.mxu0 %v602_v30 }
  0x38   :  { %262 = vmatprep.subr.bf16.mxu0 %v603_v31 }
  0x3b   :  { %263 = vmatpush1.bf16.msra.mxu0 %v605_v32 }
  0x3c   :  { %264 = vmatprep.subr.bf16.mxu0 %v606_v33 }
  0x3f   :  { %265 = vmatpush1.bf16.msra.mxu0 %v608_v34 }
  0x42   :  { %267 = vmatmul.mubr.bf16.vlgmr.msra.gmra.mrb[0].mxu0 %v26_v38 }
  0x43   :  { %276 = vmatprep.mubr.bf16.mxu0 %v29_v39 }
  0x4a   :  { %277 = vmatmul.mubr.bf16.gmra.mrb[4].mxu0 %v28_v41 }
 0x115   :  { %v268_v49 = vpop.f32.mrb[0].mxu0 }
 0x116   :  { %v269_v50 = vadd.f32 %v268_v49, %v67_v47  ;;  %v270_v51 = vpop.f32.mrb[1].mxu0 }
 0x117   :  { %v271_v52 = vadd.f32 %v270_v51, %v71_v48  ;;  %v272_v53 = vpop.f32.mrb[2].mxu0 }
 0x118   :  { %609 = vtanh.f32 %v269_v50  ;;  %v273_v54 = vadd.f32 %v272_v53, %v67_v47  ;;  %v274_v55 = vpop.f32.mrb[3].mxu0 }
 0x119   :  { %611 = vtanh.f32 %v271_v52  ;;  %v275_v56 = vadd.f32 %v274_v55, %v71_v48 }
 0x11a   :  { %613 = vtanh.f32 %v273_v54 }
 0x11b   :  { %615 = vtanh.f32 %v275_v56 }
 0x11d   :  { %v278_v58 = vpop.f32.mrb[4].mxu0 }
 0x11e   :  { %v279_v59 = vadd.f32 %v278_v58, %v67_v47  ;;  %v280_v60 = vpop.f32.mrb[5].mxu0 }
 0x11f   :  { %v281_v61 = vadd.f32 %v280_v60, %v71_v48  ;;  %v282_v62 = vpop.f32.mrb[6].mxu0 }
 0x120   :  { %617 = vtanh.f32 %v279_v59  ;;  %v283_v0 = vpop.f32.mrb[7].mxu0 }
 0x121   :  { %619 = vtanh.f32 %v281_v61 }
 0x122   :  { %v610_v2 = vpop.eup %609 }
 0x123   :  { %v612_v3 = vpop.eup %611  ;;  %v303_v4 = vmul.f32 %v610_v2, %v296_v63 }
 0x124   :  { %v614_v5 = vpop.eup %613  ;;  %v304_v6 = vmul.f32 %v612_v3, %v300_v1 }
 0x125   :  { %v616_v7 = vpop.eup %615  ;;  %v305_v8 = vmul.f32 %v614_v5, %v296_v63 }
 0x126   :  { %v309_v9 = vadd.f32 %v304_v6, %v303_v4  ;;  %v306_v10 = vmul.f32 %v616_v7, %v300_v1 }
 0x128   :  { %310 = vadd.xlane.f32.xlu0 %v309_v9  ;;  %v312_v11 = vadd.f32 %v306_v10, %v305_v8 }
 0x12a   :  { %v618_v12 = vpop.eup %617 }
 0x12b   :  { %v620_v15 = vpop.eup %619  ;;  %v307_v16 = vmul.f32 %v618_v12, %v296_v63 }
 0x12c   :  { %313 = vadd.xlane.f32.xlu0 %v312_v11  ;;  %v308_v17 = vmul.f32 %v620_v15, %v300_v1 }
 0x12e   :  { %v315_v18 = vadd.f32 %v308_v17, %v307_v16 }
 0x130   :  { %316 = vadd.xlane.f32.xlu1 %v315_v18 }
 0x1b5   :  { %v311_v20 = vpop.xlane.xlu0 %310 }
 0x1b9   :  { %v314_v21 = vpop.xlane.xlu0 %313 }
 0x1ba   :  { %v318_v22 = vmax.f32 %v311_v20, %v314_v21 }
 0x1bd   :  { %v317_v23 = vpop.xlane.xlu1 %316 }
 0x1be   :  { %v319_v24 = vmax.f32 %v318_v22, %v317_v23 }
 0x1c0   :  { %v320_v25 = vrot.slane %v319_v24, 4 }
 0x1c2   :  { %v321_v26 = vmax.f32 %v319_v24, %v320_v25 }
 0x1c4   :  { %v322_v27 = vrot.slane %v321_v26, 2 }
 0x1c6   :  { %v323_v28 = vmax.f32 %v321_v26, %v322_v27 }
 0x1c8   :  { %v324_v29 = vrot.slane %v323_v28, 1 }
 0x1ca   :  { %v325_v30 = vmax.f32 %v323_v28, %v324_v29 }
 0x1cc   :  { %v326_v31 = vsub.f32 %v311_v20, %v325_v30  ;;  %v327_v32 = vsub.f32 %v314_v21, %v325_v30  ;;  %v328_v33 = vsub.f32 %v317_v23, %v325_v30 }
 0x1ce   :  { %v329_v34 = vmul.f32 1.442695, %v326_v31  ;;  %v331_v38 = vmul.f32 1.442695, %v327_v32  ;;  %v333_v39 = vmul.f32 1.442695, %v328_v33 }
 0x1d0   :  { %621 = vpow2.f32 %v329_v34 }
 0x1d1   :  { %623 = vpow2.f32 %v331_v38 }
 0x1d2   :  { %625 = vpow2.f32 %v333_v39 }
 0x1da   :  { %v622_v41 = vpop.eup %621 }
 0x1db   :  { %v624_v42 = vpop.eup %623  ;;  %v337_v43 = vmul.f32 %v622_v41, %v705_v13  ;;  %v336_v44 = vmul.f32 %v622_v41, %v774_v35  ;;  %v335_v13 = vld [vmem:[%s822_s1] sm:$0x3f] }
 0x1dc   :  { %v339_v45 = vmul.f32 %v624_v42, %v710_v14  ;;  %v338_v46 = vmul.f32 %v624_v42, %v779_v36  ;;  %v626_v47 = vpop.eup %625  ;;  %v553_v35 = vpack.c.bf16 %v624_v42, %v622_v41  ;;  %v630_v14 = vmov 0.0|0.0  }
 0x1dd   :  { %v341_v50 = vmul.f32 %v626_v47, %v784_v37  ;;  %v340_v51 = vmul.f32 %v626_v47, %v793_v40  ;;  %v632_v36 = vmov 0  }
 0x1de   :  { %v548_v48 = vpack.c.bf16 %v339_v45, %v337_v43  ;;  %v550_v49 = vpack.c.bf16 %v338_v46, %v336_v44  ;;  %559 = vset.pattern.permute.xlu1 %v632_v36  ;;  %560 = vset.pattern.permute.xlu0 %v632_v36 }
 0x1e0   :  { %549 = vmatprep.subr.bf16.mxu1 %v548_v48 }
 0x1e1   :  { %551 = vmatpush1.bf16.msra.mxu1 %v550_v49 }
 0x1e2   :  { %350 = vmatprep.subr.mxu1 %v341_v50 }
 0x1e5   :  { %351 = vmatpush1.msra.mxu1 %v340_v51 }
 0x1e6   :  { %533 = vmatmul.mubr.msk.f32.vlgmr.msra.gmra.mrb[0].mxu1 %vm342_vm0, %v335_v13  ;;  %552 = vmatprep.subr.bf16.mxu1 %v630_v14 }
 0x1e7   :  { %554 = vmatpush3.bf16.msra.mxu1 %v553_v35  ;;  %545 = vmatprep.mubr.msk.f32.mxu1 %vm631_vm1, %v629_v19 }
 0x1e8   :  { %543 = vmatprep.subr.mxu1 %v629_v19 }
 0x1eb   :  { %544 = vmatpush3.msra.mxu1 %v626_v47 }
 0x1ec   :  { %546 = vmatmul.mubr.msk.f32.vlgmr.msra.gmra.mrb[2].mxu1 %vm342_vm0, %v335_v13 }
 0x2b9   :  { %v412_v37 = vpop.f32.mrb[0].mxu1 }
 0x2ba   :  { %v414_v40 = vpop.f32.mrb[1].mxu1 }
 0x2bf   :  { %v483_v52 = vpop.f32.mrb[2].mxu1 }
 0x2c0   :  { %489 = vperm.xlu1 %559, %v483_v52   ;;  %v547_v53 = vpop.f32.mrb[3].mxu1 }
 0x33f   :  { %v490_v54 = vpop.permute.xlu1 %489 }
 0x340   :  { %627 = vrcp.f32 %v490_v54 }
 0x34a   :  { %v628_v55 = vpop.eup %627 }
 0x34b   :  { %v493_v56 = vmul.f32 %v628_v55, %v412_v37  ;;  %v494_v57 = vmul.f32 %v628_v55, %v414_v40 }
 0x34d   :  { %495 = vst [vmem:[%s823_s5] sm:$0x3f] %v493_v56  ;;  %496 = vst [vmem:[%s823_s5 + $0x8] sm:$0x3f] %v494_v57 }

// kernel: siamese_forward.44
= control target key start
LH: loop header
LB: loop body
LE: loop exit
PB: predicated region body
PF: predicated region fallthrough
CT: control target
= control target key end

     0   :  { %10 = vsyncpa [#allocation3], 0  ;;  %s878_s0 = inlined_call_operand.vmem [shape: f32[24,256], index: 0, kind: input, shape index: {}]   ;;  %s879_s1 = inlined_call_operand.vmem [shape: f32[6,24], index: 1, kind: input, shape index: {}]   ;;  %s880_s2 = inlined_call_operand.hbm [shape: bf16[256,256], index: 2, kind: input, shape index: {}]   ;;  %s881_s3 = inlined_call_operand.hbm [shape: f32[1,256], index: 3, kind: input, shape index: {}]   ;;  %s882_s4 = inlined_call_operand.hbm [shape: f32[1,256], index: 4, kind: input, shape index: {}]   ;;  %s883_s5 = inlined_call_operand.vmem [shape: f32[6,256], index: 5, kind: output, shape index: {}]  }
   0x1   :  { %11 = vsyncpa [#allocation5], 0  ;;  %s743_s18 = smov [#allocation4]   ;;  %s744_s20 = smov [#allocation2]  }
   0x2   :  { %s34_s19 = sshll.u32 %s743_s18, 4  ;;  %s21_s21 = sshll.u32 %s744_s20, 4  ;;  %s35_s19 = int_to_ptr.vmem [resolvable:$true] %s34_s19  ;;  %s782_s21 = int_to_ptr.vmem [resolvable:$true] %s21_s21 }
   0x3   :  { %s673_s24 = scalar_lea.hbm %s881_s3, 32 }
   0x4   :  { %p674_p0 = scmp.ne.s32.totalorder %s881_s3, %s673_s24  ;;  %p677_p1 = scmp.lt.u32.totalorder %s673_s24, %s881_s3 }
   0x6   :  { %p679_p2 = pnand %p677_p1, %p674_p0 }
   0x8   :  { %682 = shalt.err (!%p679_p2)
}
   0x9   :  { %s683_s29 = scalar_lea.vmem %s35_s19, 32  ;;  %p688_p4 = scmp.lt.s32.totalorder %s35_s19, %s35_s19 }
   0xa   :  { %p684_p3 = scmp.ne.s32.totalorder %s35_s19, %s683_s29  ;;  %p689_p5 = scmp.lt.s32.totalorder %s683_s29, %s683_s29 }
   0xc   :  { %p690_p6 = por %p689_p5, %p688_p4 }
   0xe   :  { %p691_p7 = pnand %p690_p6, %p684_p3 }
  0x10   :  { %694 = shalt.err (!%p691_p7)
}
  0x11   :  { %37 = dma.hbm_to_vmem [thread:$0]  %s881_s3, 32, %s35_s19, [#allocation5]  }
  0x12   :  { %s695_s9 = scalar_lea.hbm %s880_s2, 4096 }
  0x13   :  { %p696_p8 = scmp.ne.s32.totalorder %s880_s2, %s695_s9  ;;  %p699_p9 = scmp.lt.u32.totalorder %s695_s9, %s880_s2 }
  0x15   :  { %p701_p10 = pnand %p699_p9, %p696_p8 }
  0x17   :  { %704 = shalt.err (!%p701_p10)
}
  0x18   :  { %s705_s14 = scalar_lea.vmem %s782_s21, 4096  ;;  %p710_p12 = scmp.lt.s32.totalorder %s782_s21, %s782_s21 }
  0x19   :  { %p706_p11 = scmp.ne.s32.totalorder %s782_s21, %s705_s14  ;;  %p711_p13 = scmp.lt.s32.totalorder %s705_s14, %s705_s14 }
  0x1b   :  { %p712_p0 = por %p711_p13, %p710_p12 }
  0x1d   :  { %p713_p1 = pnand %p712_p0, %p706_p11 }
  0x1f   :  { %716 = shalt.err (!%p713_p1)
}
  0x20   :  { %s745_s3 = smov 128   ;;  %s746_s15 = smov 8  }
  0x21   :  { %27 = dma.hbm_to_vmem [thread:$0]  %s880_s2, 4096, %s782_s21, [#allocation3], %s745_s3, %s745_s3, %s746_s15  }
  0x22   :  { %s747_s18 = smov [#allocation6]   ;;  %s717_s23 = scalar_lea.hbm %s882_s4, 32 }
  0x23   :  { %s44_s19 = sshll.u32 %s747_s18, 4  ;;  %p718_p2 = scmp.ne.s32.totalorder %s882_s4, %s717_s23  ;;  %s45_s19 = int_to_ptr.vmem [resolvable:$true] %s44_s19 }
  0x24   :  { %p721_p3 = scmp.lt.u32.totalorder %s717_s23, %s882_s4 }
  0x26   :  { %p723_p4 = pnand %p721_p3, %p718_p2 }
  0x28   :  { %726 = shalt.err (!%p723_p4)
}
  0x29   :  { %s727_s28 = scalar_lea.vmem %s45_s19, 32  ;;  %p732_p6 = scmp.lt.s32.totalorder %s45_s19, %s45_s19 }
  0x2a   :  { %p728_p5 = scmp.ne.s32.totalorder %s45_s19, %s727_s28  ;;  %p733_p7 = scmp.lt.s32.totalorder %s727_s28, %s727_s28 }
  0x2c   :  { %p734_p8 = por %p733_p7, %p732_p6 }
  0x2e   :  { %p735_p9 = pnand %p734_p8, %p728_p5 }
  0x30   :  { %738 = shalt.err (!%p735_p9)
}
  0x31   :  { %47 = dma.hbm_to_vmem [thread:$0]  %s882_s4, 32, %s45_s19, [#allocation5]  }
  0x32   :  { %739 = dma.done.wait [#allocation3], 4096  }
  0x33   :  { %740 = vsyncadd [#allocation3], 4294963200 }
  0x34   :  { %741 = dma.done.wait [#allocation5], 64  }
  0x35   :  { %742 = vsyncadd [#allocation5], 4294967232  ;;  %v605_v0 = vld [vmem:[#allocation2 + $0x4] ss:$8 sps:$4 sm:$0xff]   ;;  %v607_v1 = vld [vmem:[#allocation2] ss:$8 sps:$4 sm:$0xff]   ;;  %v101_v42 = vlaneseq }
  0x36   :  { %271 = vmatprep.subr.bf16.mxu0 %v605_v0  ;;  %v608_v2 = vld [vmem:[#allocation2 + $0x14] ss:$8 sps:$4 sm:$0xff]   ;;  %v610_v3 = vld [vmem:[#allocation2 + $0x10] ss:$8 sps:$4 sm:$0xff]   ;;  %v611_v4 = vld [vmem:[#allocation2 + $0x24] ss:$8 sps:$4 sm:$0xff]  }
  0x37   :  { %272 = vmatpush1.bf16.msra.mxu0 %v607_v1  ;;  %v613_v5 = vld [vmem:[#allocation2 + $0x20] ss:$8 sps:$4 sm:$0xff]   ;;  %v614_v6 = vld [vmem:[#allocation2 + $0x34] ss:$8 sps:$4 sm:$0xff]   ;;  %v616_v7 = vld [vmem:[#allocation2 + $0x30] ss:$8 sps:$4 sm:$0xff]  }
  0x38   :  { %273 = vmatprep.subr.bf16.mxu0 %v608_v2  ;;  %v617_v8 = vld [vmem:[#allocation2 + $0x44] ss:$8 sps:$4 sm:$0xff]   ;;  %v619_v9 = vld [vmem:[#allocation2 + $0x40] ss:$8 sps:$4 sm:$0xff]   ;;  %v620_v10 = vld [vmem:[#allocation2 + $0x54] ss:$8 sps:$4 sm:$0xff]  }
  0x39   :  { %v622_v11 = vld [vmem:[#allocation2 + $0x50] ss:$8 sps:$4 sm:$0xff]   ;;  %v623_v12 = vld [vmem:[#allocation2 + $0x64] ss:$8 sps:$4 sm:$0xff]   ;;  %v625_v16 = vld [vmem:[#allocation2 + $0x60] ss:$8 sps:$4 sm:$0xff]  }
  0x3a   :  { %v828_v13 = vld [vmem:[%s878_s0 + $0x8] sm:$0xff]  ;;  %v833_v14 = vld [vmem:[%s878_s0 + $0x18] sm:$0xff]  ;;  %v840_v35 = vld [vmem:[%s878_s0] sm:$0xff]  ;;  %v102_v43 = vshrl.u32 %v101_v42, 7  ;;  %vm379_vm0 = vcmask 195584   ;;  %vm750_vm1 = vmmov 0  }
  0x3b   :  { %274 = vmatpush1.bf16.msra.mxu0 %v610_v3  ;;  %v64_v15 = vpack.c.bf16 %v833_v14, %v828_v13  ;;  %v626_v17 = vld [vmem:[#allocation2 + $0x74] ss:$8 sps:$4 sm:$0xff]   ;;  %v628_v18 = vld [vmem:[#allocation2 + $0x70] ss:$8 sps:$4 sm:$0xff]   ;;  %v629_v19 = vld [vmem:[#allocation2 + $0x84] ss:$8 sps:$4 sm:$0xff]  }
  0x3c   :  { %275 = vmatprep.subr.bf16.mxu0 %v611_v4  ;;  %v631_v20 = vld [vmem:[#allocation2 + $0x80] ss:$8 sps:$4 sm:$0xff]   ;;  %v632_v21 = vld [vmem:[#allocation2 + $0x94] ss:$8 sps:$4 sm:$0xff]   ;;  %v634_v22 = vld [vmem:[#allocation2 + $0x90] ss:$8 sps:$4 sm:$0xff]  }
  0x3d   :  { %303 = vmatprep.mubr.bf16.mxu0 %v64_v15  ;;  %v635_v23 = vld [vmem:[#allocation2 + $0xa4] ss:$8 sps:$4 sm:$0xff]   ;;  %v637_v24 = vld [vmem:[#allocation2 + $0xa0] ss:$8 sps:$4 sm:$0xff]   ;;  %v638_v25 = vld [vmem:[#allocation2 + $0xb4] ss:$8 sps:$4 sm:$0xff]  }
  0x3e   :  { %v640_v26 = vld [vmem:[#allocation2 + $0xb0] ss:$8 sps:$4 sm:$0xff]   ;;  %v641_v27 = vld [vmem:[#allocation2 + $0xc4] ss:$8 sps:$4 sm:$0xff]   ;;  %v643_v28 = vld [vmem:[#allocation2 + $0xc0] ss:$8 sps:$4 sm:$0xff]  }
  0x3f   :  { %276 = vmatpush1.bf16.msra.mxu0 %v613_v5  ;;  %v644_v29 = vld [vmem:[#allocation2 + $0xd4] ss:$8 sps:$4 sm:$0xff]   ;;  %v646_v30 = vld [vmem:[#allocation2 + $0xd0] ss:$8 sps:$4 sm:$0xff]   ;;  %v647_v31 = vld [vmem:[#allocation2 + $0xe4] ss:$8 sps:$4 sm:$0xff]  }
  0x40   :  { %277 = vmatprep.subr.bf16.mxu0 %v614_v6  ;;  %v649_v32 = vld [vmem:[#allocation2 + $0xe0] ss:$8 sps:$4 sm:$0xff]   ;;  %v650_v33 = vld [vmem:[#allocation2 + $0xf4] ss:$8 sps:$4 sm:$0xff]   ;;  %v652_v34 = vld [vmem:[#allocation2 + $0xf0] ss:$8 sps:$4 sm:$0xff]  }
  0x41   :  { %v845_v36 = vld [vmem:[%s878_s0 + $0x10] sm:$0xff]  ;;  %v850_v37 = vld [vmem:[%s878_s0 + $0x28] sm:$0xff]  ;;  %v859_v40 = vld [vmem:[%s878_s0 + $0x20] sm:$0xff]  ;;  %v103_v44 = vsub.s32 0, %v102_v43  ;;  %v107_v46 = vsub.s32 1, %v102_v43 }
  0x42   :  { %v63_v38 = vpack.c.bf16 %v845_v36, %v840_v35  ;;  %v66_v39 = vpack.c.bf16 %v850_v37, %v850_v37  ;;  %v65_v41 = vpack.c.bf16 %v859_v40, %v859_v40  ;;  %v99_v45 = vld [vmem:[#allocation4] sm:$0x3]  ;;  %v328_v57 = vld [vmem:[#allocation6] sm:$0x3] }
  0x43   :  { %278 = vmatpush1.bf16.msra.mxu0 %v616_v7  ;;  %v104_v47 = vrot.slane %v99_v45, %v103_v44  ;;  %v108_v48 = vrot.slane %v99_v45, %v107_v46  ;;  %v333_v63 = vrot.slane %v328_v57, %v103_v44  ;;  %v337_v1 = vrot.slane %v328_v57, %v107_v46 }
  0x44   :  { %279 = vmatprep.subr.bf16.mxu0 %v617_v8 }
  0x47   :  { %280 = vmatpush1.bf16.msra.mxu0 %v619_v9 }
  0x48   :  { %281 = vmatprep.subr.bf16.mxu0 %v620_v10 }
  0x4b   :  { %282 = vmatpush1.bf16.msra.mxu0 %v622_v11 }
  0x4c   :  { %283 = vmatprep.subr.bf16.mxu0 %v623_v12 }
  0x4f   :  { %284 = vmatpush1.bf16.msra.mxu0 %v625_v16 }
  0x50   :  { %285 = vmatprep.subr.bf16.mxu0 %v626_v17 }
  0x53   :  { %286 = vmatpush1.bf16.msra.mxu0 %v628_v18 }
  0x54   :  { %287 = vmatprep.subr.bf16.mxu0 %v629_v19  ;;  %v748_v19 = vmov 0.0  }
  0x55   :  { %447 = vmatprep.mubr.f32.mxu1 %v748_v19 }
  0x57   :  { %288 = vmatpush1.bf16.msra.mxu0 %v631_v20 }
  0x58   :  { %289 = vmatprep.subr.bf16.mxu0 %v632_v21 }
  0x5b   :  { %290 = vmatpush1.bf16.msra.mxu0 %v634_v22 }
  0x5c   :  { %291 = vmatprep.subr.bf16.mxu0 %v635_v23 }
  0x5f   :  { %292 = vmatpush1.bf16.msra.mxu0 %v637_v24 }
  0x60   :  { %293 = vmatprep.subr.bf16.mxu0 %v638_v25 }
  0x63   :  { %294 = vmatpush1.bf16.msra.mxu0 %v640_v26 }
  0x64   :  { %295 = vmatprep.subr.bf16.mxu0 %v641_v27 }
  0x67   :  { %296 = vmatpush1.bf16.msra.mxu0 %v643_v28 }
  0x68   :  { %297 = vmatprep.subr.bf16.mxu0 %v644_v29 }
  0x6b   :  { %298 = vmatpush1.bf16.msra.mxu0 %v646_v30 }
  0x6c   :  { %299 = vmatprep.subr.bf16.mxu0 %v647_v31 }
  0x6f   :  { %300 = vmatpush1.bf16.msra.mxu0 %v649_v32 }
  0x70   :  { %301 = vmatprep.subr.bf16.mxu0 %v650_v33 }
  0x73   :  { %302 = vmatpush1.bf16.msra.mxu0 %v652_v34 }
  0x76   :  { %304 = vmatmul.mubr.bf16.vlgmr.msra.gmra.mrb[0].mxu0 %v63_v38 }
  0x77   :  { %313 = vmatprep.mubr.bf16.mxu0 %v66_v39 }
  0x7e   :  { %314 = vmatmul.mubr.bf16.gmra.mrb[4].mxu0 %v65_v41 }
 0x149   :  { %v305_v49 = vpop.f32.mrb[0].mxu0 }
 0x14a   :  { %v306_v50 = vadd.f32 %v305_v49, %v104_v47  ;;  %v307_v51 = vpop.f32.mrb[1].mxu0 }
 0x14b   :  { %v308_v52 = vadd.f32 %v307_v51, %v108_v48  ;;  %v309_v53 = vpop.f32.mrb[2].mxu0 }
 0x14c   :  { %653 = vtanh.f32 %v306_v50  ;;  %v310_v54 = vadd.f32 %v309_v53, %v104_v47  ;;  %v311_v55 = vpop.f32.mrb[3].mxu0 }
 0x14d   :  { %655 = vtanh.f32 %v308_v52  ;;  %v312_v56 = vadd.f32 %v311_v55, %v108_v48 }
 0x14e   :  { %657 = vtanh.f32 %v310_v54 }
 0x14f   :  { %659 = vtanh.f32 %v312_v56 }
 0x151   :  { %v315_v58 = vpop.f32.mrb[4].mxu0 }
 0x152   :  { %v316_v59 = vadd.f32 %v315_v58, %v104_v47  ;;  %v317_v60 = vpop.f32.mrb[5].mxu0 }
 0x153   :  { %v318_v61 = vadd.f32 %v317_v60, %v108_v48  ;;  %v319_v62 = vpop.f32.mrb[6].mxu0 }
 0x154   :  { %661 = vtanh.f32 %v316_v59  ;;  %v320_v0 = vpop.f32.mrb[7].mxu0 }
 0x155   :  { %663 = vtanh.f32 %v318_v61 }
 0x156   :  { %v654_v2 = vpop.eup %653 }
 0x157   :  { %v656_v3 = vpop.eup %655  ;;  %v340_v4 = vmul.f32 %v654_v2, %v333_v63 }
 0x158   :  { %v658_v5 = vpop.eup %657  ;;  %v341_v6 = vmul.f32 %v656_v3, %v337_v1 }
 0x159   :  { %v660_v7 = vpop.eup %659  ;;  %v342_v8 = vmul.f32 %v658_v5, %v333_v63 }
 0x15a   :  { %v346_v9 = vadd.f32 %v341_v6, %v340_v4  ;;  %v343_v10 = vmul.f32 %v660_v7, %v337_v1 }
 0x15c   :  { %347 = vadd.xlane.f32.xlu0 %v346_v9  ;;  %v349_v11 = vadd.f32 %v343_v10, %v342_v8 }
 0x15e   :  { %v662_v12 = vpop.eup %661 }
 0x15f   :  { %v664_v15 = vpop.eup %663  ;;  %v344_v16 = vmul.f32 %v662_v12, %v333_v63 }
 0x160   :  { %350 = vadd.xlane.f32.xlu0 %v349_v11  ;;  %v345_v17 = vmul.f32 %v664_v15, %v337_v1 }
 0x162   :  { %v352_v18 = vadd.f32 %v345_v17, %v344_v16 }
 0x164   :  { %353 = vadd.xlane.f32.xlu1 %v352_v18 }
 0x1e9   :  { %v348_v20 = vpop.xlane.xlu0 %347 }
 0x1ed   :  { %v351_v21 = vpop.xlane.xlu0 %350 }
 0x1ee   :  { %v355_v22 = vmax.f32 %v348_v20, %v351_v21 }
 0x1f1   :  { %v354_v23 = vpop.xlane.xlu1 %353 }
 0x1f2   :  { %v356_v24 = vmax.f32 %v355_v22, %v354_v23 }
 0x1f4   :  { %v357_v25 = vrot.slane %v356_v24, 4 }
 0x1f6   :  { %v358_v26 = vmax.f32 %v356_v24, %v357_v25 }
 0x1f8   :  { %v359_v27 = vrot.slane %v358_v26, 2 }
 0x1fa   :  { %v360_v28 = vmax.f32 %v358_v26, %v359_v27 }
 0x1fc   :  { %v361_v29 = vrot.slane %v360_v28, 1 }
 0x1fe   :  { %v362_v30 = vmax.f32 %v360_v28, %v361_v29 }
 0x200   :  { %v363_v31 = vsub.f32 %v348_v20, %v362_v30  ;;  %v364_v32 = vsub.f32 %v351_v21, %v362_v30  ;;  %v365_v33 = vsub.f32 %v354_v23, %v362_v30 }
 0x202   :  { %v366_v34 = vmul.f32 1.442695, %v363_v31  ;;  %v368_v38 = vmul.f32 1.442695, %v364_v32  ;;  %v370_v39 = vmul.f32 1.442695, %v365_v33 }
 0x204   :  { %665 = vpow2.f32 %v366_v34 }
 0x205   :  { %667 = vpow2.f32 %v368_v38 }
 0x206   :  { %669 = vpow2.f32 %v370_v39 }
 0x20e   :  { %v666_v41 = vpop.eup %665 }
 0x20f   :  { %v668_v42 = vpop.eup %667  ;;  %v374_v43 = vmul.f32 %v666_v41, %v828_v13  ;;  %v373_v44 = vmul.f32 %v666_v41, %v840_v35  ;;  %v372_v13 = vld [vmem:[%s879_s1] sm:$0x3f] }
 0x210   :  { %v376_v45 = vmul.f32 %v668_v42, %v833_v14  ;;  %v375_v46 = vmul.f32 %v668_v42, %v845_v36  ;;  %v670_v47 = vpop.eup %669  ;;  %v592_v35 = vpack.c.bf16 %v668_v42, %v666_v41  ;;  %v749_v14 = vmov 0.0|0.0  }
 0x211   :  { %v378_v50 = vmul.f32 %v670_v47, %v850_v37  ;;  %v377_v51 = vmul.f32 %v670_v47, %v859_v40  ;;  %v751_v36 = vmov 0  }
 0x212   :  { %v587_v48 = vpack.c.bf16 %v376_v45, %v374_v43  ;;  %v589_v49 = vpack.c.bf16 %v375_v46, %v373_v44  ;;  %603 = vset.pattern.permute.xlu1 %v751_v36  ;;  %604 = vset.pattern.permute.xlu0 %v751_v36 }
 0x214   :  { %588 = vmatprep.subr.bf16.mxu1 %v587_v48 }
 0x215   :  { %590 = vmatpush1.bf16.msra.mxu1 %v589_v49 }
 0x216   :  { %387 = vmatprep.subr.mxu1 %v378_v50 }
 0x219   :  { %388 = vmatpush1.msra.mxu1 %v377_v51 }
 0x21a   :  { %572 = vmatmul.mubr.msk.f32.vlgmr.msra.gmra.mrb[0].mxu1 %vm379_vm0, %v372_v13  ;;  %591 = vmatprep.subr.bf16.mxu1 %v749_v14 }
 0x21b   :  { %593 = vmatpush3.bf16.msra.mxu1 %v592_v35  ;;  %584 = vmatprep.mubr.msk.f32.mxu1 %vm750_vm1, %v748_v19 }
 0x21c   :  { %582 = vmatprep.subr.mxu1 %v748_v19 }
 0x21f   :  { %583 = vmatpush3.msra.mxu1 %v670_v47 }
 0x220   :  { %585 = vmatmul.mubr.msk.f32.vlgmr.msra.gmra.mrb[2].mxu1 %vm379_vm0, %v372_v13 }
 0x2ed   :  { %v449_v37 = vpop.f32.mrb[0].mxu1 }
 0x2ee   :  { %v451_v40 = vpop.f32.mrb[1].mxu1 }
 0x2f3   :  { %v520_v52 = vpop.f32.mrb[2].mxu1 }
 0x2f4   :  { %526 = vperm.xlu1 %603, %v520_v52   ;;  %v586_v53 = vpop.f32.mrb[3].mxu1 }
 0x373   :  { %v527_v54 = vpop.permute.xlu1 %526 }
 0x374   :  { %671 = vrcp.f32 %v527_v54 }
 0x37e   :  { %v672_v55 = vpop.eup %671 }
 0x37f   :  { %v530_v56 = vmul.f32 %v672_v55, %v449_v37  ;;  %v531_v57 = vmul.f32 %v672_v55, %v451_v40 }
 0x381   :  { %532 = vst [vmem:[%s883_s5] sm:$0x3f] %v530_v56  ;;  %533 = vst [vmem:[%s883_s5 + $0x8] sm:$0x3f] %v531_v57 }
 0x382   :  { %538 = vsyncpa [#allocation3], 1 }
 0x383   :  { %539 = vsyncpa [#allocation5], 1 }

// kernel: siamese_forward.37
= control target key start
LH: loop header
LB: loop body
LE: loop exit
PB: predicated region body
PF: predicated region fallthrough
CT: control target
= control target key end

     0   :  { %v64_v42 = vlaneseq  ;;  %vm342_vm0 = vcmask 195584   ;;  %vm653_vm1 = vmmov 0   ;;  %s845_s2 = inlined_call_operand.vmem [shape: bf16[256,256], index: 2, kind: input, shape index: {}]   ;;  %s846_s0 = inlined_call_operand.vmem [shape: f32[24,256], index: 0, kind: input, shape index: {}]   ;;  %s847_s3 = inlined_call_operand.vmem [shape: f32[1,256], index: 3, kind: input, shape index: {}]   ;;  %s848_s4 = inlined_call_operand.vmem [shape: f32[1,256], index: 4, kind: input, shape index: {}]   ;;  %s849_s1 = inlined_call_operand.vmem [shape: f32[1,24], index: 1, kind: input, shape index: {}]   ;;  %s850_s5 = inlined_call_operand.vmem [shape: f32[1,256], index: 5, kind: output, shape index: {}]  }
   0x1   :  { %v583_v0 = vld [vmem:[%s845_s2 + $0x4] ss:$8 sps:$4 sm:$0xff]   ;;  %v585_v1 = vld [vmem:[%s845_s2] ss:$8 sps:$4 sm:$0xff]   ;;  %v586_v2 = vld [vmem:[%s845_s2 + $0x14] ss:$8 sps:$4 sm:$0xff]  }
   0x2   :  { %234 = vmatprep.subr.bf16.mxu0 %v583_v0  ;;  %v588_v3 = vld [vmem:[%s845_s2 + $0x10] ss:$8 sps:$4 sm:$0xff]   ;;  %v589_v4 = vld [vmem:[%s845_s2 + $0x24] ss:$8 sps:$4 sm:$0xff]   ;;  %v591_v5 = vld [vmem:[%s845_s2 + $0x20] ss:$8 sps:$4 sm:$0xff]  }
   0x3   :  { %235 = vmatpush1.bf16.msra.mxu0 %v585_v1  ;;  %v592_v6 = vld [vmem:[%s845_s2 + $0x34] ss:$8 sps:$4 sm:$0xff]   ;;  %v594_v7 = vld [vmem:[%s845_s2 + $0x30] ss:$8 sps:$4 sm:$0xff]   ;;  %v595_v8 = vld [vmem:[%s845_s2 + $0x44] ss:$8 sps:$4 sm:$0xff]  }
   0x4   :  { %236 = vmatprep.subr.bf16.mxu0 %v586_v2  ;;  %v597_v9 = vld [vmem:[%s845_s2 + $0x40] ss:$8 sps:$4 sm:$0xff]   ;;  %v598_v10 = vld [vmem:[%s845_s2 + $0x54] ss:$8 sps:$4 sm:$0xff]   ;;  %v600_v11 = vld [vmem:[%s845_s2 + $0x50] ss:$8 sps:$4 sm:$0xff]  }
   0x5   :  { %v601_v12 = vld [vmem:[%s845_s2 + $0x64] ss:$8 sps:$4 sm:$0xff]   ;;  %v733_v14 = vld [vmem:[%s846_s0 + $0x18] sm:$0xff]  ;;  %v603_v16 = vld [vmem:[%s845_s2 + $0x60] ss:$8 sps:$4 sm:$0xff]   ;;  %v821_v43 = vshrl.u32 %v64_v42, 7 }
   0x6   :  { %v728_v13 = vld [vmem:[%s846_s0 + $0x8] sm:$0xff]  ;;  %v604_v17 = vld [vmem:[%s845_s2 + $0x74] ss:$8 sps:$4 sm:$0xff]   ;;  %v606_v18 = vld [vmem:[%s845_s2 + $0x70] ss:$8 sps:$4 sm:$0xff]   ;;  %vm515_vm2 = vcmp.lt.s32.totalorder %v64_v42, 256 }
   0x7   :  { %237 = vmatpush1.bf16.msra.mxu0 %v588_v3  ;;  %v27_v15 = vpack.c.bf16 %v733_v14, %v728_v13  ;;  %v607_v19 = vld [vmem:[%s845_s2 + $0x84] ss:$8 sps:$4 sm:$0xff]   ;;  %v609_v20 = vld [vmem:[%s845_s2 + $0x80] ss:$8 sps:$4 sm:$0xff]   ;;  %v610_v21 = vld [vmem:[%s845_s2 + $0x94] ss:$8 sps:$4 sm:$0xff]  }
   0x8   :  { %238 = vmatprep.subr.bf16.mxu0 %v589_v4  ;;  %v612_v22 = vld [vmem:[%s845_s2 + $0x90] ss:$8 sps:$4 sm:$0xff]   ;;  %v613_v23 = vld [vmem:[%s845_s2 + $0xa4] ss:$8 sps:$4 sm:$0xff]   ;;  %v615_v24 = vld [vmem:[%s845_s2 + $0xa0] ss:$8 sps:$4 sm:$0xff]  }
   0x9   :  { %266 = vmatprep.mubr.bf16.mxu0 %v27_v15  ;;  %v616_v25 = vld [vmem:[%s845_s2 + $0xb4] ss:$8 sps:$4 sm:$0xff]   ;;  %v618_v26 = vld [vmem:[%s845_s2 + $0xb0] ss:$8 sps:$4 sm:$0xff]   ;;  %v619_v27 = vld [vmem:[%s845_s2 + $0xc4] ss:$8 sps:$4 sm:$0xff]  }
   0xa   :  { %v621_v28 = vld [vmem:[%s845_s2 + $0xc0] ss:$8 sps:$4 sm:$0xff]   ;;  %v622_v29 = vld [vmem:[%s845_s2 + $0xd4] ss:$8 sps:$4 sm:$0xff]   ;;  %v624_v30 = vld [vmem:[%s845_s2 + $0xd0] ss:$8 sps:$4 sm:$0xff]  }
   0xb   :  { %239 = vmatpush1.bf16.msra.mxu0 %v591_v5  ;;  %v625_v31 = vld [vmem:[%s845_s2 + $0xe4] ss:$8 sps:$4 sm:$0xff]   ;;  %v627_v32 = vld [vmem:[%s845_s2 + $0xe0] ss:$8 sps:$4 sm:$0xff]   ;;  %v628_v33 = vld [vmem:[%s845_s2 + $0xf4] ss:$8 sps:$4 sm:$0xff]  }
   0xc   :  { %240 = vmatprep.subr.bf16.mxu0 %v592_v6  ;;  %v630_v34 = vld [vmem:[%s845_s2 + $0xf0] ss:$8 sps:$4 sm:$0xff]   ;;  %v797_v35 = vld [vmem:[%s846_s0] sm:$0xff]  ;;  %v807_v37 = vld [vmem:[%s846_s0 + $0x28] sm:$0xff]  ;;  %v66_v44 = vsub.s32 0, %v821_v43  ;;  %v70_v46 = vsub.s32 1, %v821_v43 }
   0xd   :  { %v802_v36 = vld [vmem:[%s846_s0 + $0x10] sm:$0xff]  ;;  %v29_v39 = vpack.c.bf16 %v807_v37, %v807_v37  ;;  %v816_v40 = vld [vmem:[%s846_s0 + $0x20] sm:$0xff] }
   0xe   :  { %v26_v38 = vpack.c.bf16 %v802_v36, %v797_v35  ;;  %v28_v41 = vpack.c.bf16 %v816_v40, %v816_v40  ;;  %v62_v45 = vld [vmem:[%s847_s3] sm:$0x3] }
   0xf   :  { %241 = vmatpush1.bf16.msra.mxu0 %v594_v7  ;;  %v67_v47 = vrot.slane %v62_v45, %v66_v44  ;;  %v71_v48 = vrot.slane %v62_v45, %v70_v46  ;;  %v291_v57 = vld [vmem:[%s848_s4] sm:$0x3] }
  0x10   :  { %242 = vmatprep.subr.bf16.mxu0 %v595_v8  ;;  %v296_v63 = vrot.slane %v291_v57, %v66_v44  ;;  %v300_v1 = vrot.slane %v291_v57, %v70_v46  ;;  %v655_v57 = vmov 1966171168  }
  0x13   :  { %243 = vmatpush1.bf16.msra.mxu0 %v597_v9 }
  0x14   :  { %244 = vmatprep.subr.bf16.mxu0 %v598_v10 }
  0x17   :  { %245 = vmatpush1.bf16.msra.mxu0 %v600_v11 }
  0x18   :  { %246 = vmatprep.subr.bf16.mxu0 %v601_v12 }
  0x1b   :  { %247 = vmatpush1.bf16.msra.mxu0 %v603_v16 }
  0x1c   :  { %248 = vmatprep.subr.bf16.mxu0 %v604_v17 }
  0x1f   :  { %249 = vmatpush1.bf16.msra.mxu0 %v606_v18 }
  0x20   :  { %250 = vmatprep.subr.bf16.mxu0 %v607_v19  ;;  %v651_v19 = vmov 0.0  }
  0x21   :  { %410 = vmatprep.mubr.f32.mxu1 %v651_v19 }
  0x23   :  { %251 = vmatpush1.bf16.msra.mxu0 %v609_v20 }
  0x24   :  { %252 = vmatprep.subr.bf16.mxu0 %v610_v21 }
  0x27   :  { %253 = vmatpush1.bf16.msra.mxu0 %v612_v22 }
  0x28   :  { %254 = vmatprep.subr.bf16.mxu0 %v613_v23 }
  0x2b   :  { %255 = vmatpush1.bf16.msra.mxu0 %v615_v24 }
  0x2c   :  { %256 = vmatprep.subr.bf16.mxu0 %v616_v25 }
  0x2f   :  { %257 = vmatpush1.bf16.msra.mxu0 %v618_v26 }
  0x30   :  { %258 = vmatprep.subr.bf16.mxu0 %v619_v27 }
  0x33   :  { %259 = vmatpush1.bf16.msra.mxu0 %v621_v28 }
  0x34   :  { %260 = vmatprep.subr.bf16.mxu0 %v622_v29 }
  0x37   :  { %261 = vmatpush1.bf16.msra.mxu0 %v624_v30 }
  0x38   :  { %262 = vmatprep.subr.bf16.mxu0 %v625_v31 }
  0x3b   :  { %263 = vmatpush1.bf16.msra.mxu0 %v627_v32 }
  0x3c   :  { %264 = vmatprep.subr.bf16.mxu0 %v628_v33 }
  0x3f   :  { %265 = vmatpush1.bf16.msra.mxu0 %v630_v34 }
  0x42   :  { %267 = vmatmul.mubr.bf16.vlgmr.msra.gmra.mrb[0].mxu0 %v26_v38 }
  0x43   :  { %276 = vmatprep.mubr.bf16.mxu0 %v29_v39 }
  0x4a   :  { %277 = vmatmul.mubr.bf16.gmra.mrb[4].mxu0 %v28_v41 }
 0x115   :  { %v268_v49 = vpop.f32.mrb[0].mxu0 }
 0x116   :  { %v269_v50 = vadd.f32 %v268_v49, %v67_v47  ;;  %v270_v51 = vpop.f32.mrb[1].mxu0 }
 0x117   :  { %v271_v52 = vadd.f32 %v270_v51, %v71_v48  ;;  %v272_v53 = vpop.f32.mrb[2].mxu0 }
 0x118   :  { %631 = vtanh.f32 %v269_v50  ;;  %v273_v54 = vadd.f32 %v272_v53, %v67_v47  ;;  %v274_v55 = vpop.f32.mrb[3].mxu0 }
 0x119   :  { %633 = vtanh.f32 %v271_v52  ;;  %v275_v56 = vadd.f32 %v274_v55, %v71_v48 }
 0x11a   :  { %635 = vtanh.f32 %v273_v54 }
 0x11b   :  { %637 = vtanh.f32 %v275_v56 }
 0x11d   :  { %v278_v58 = vpop.f32.mrb[4].mxu0 }
 0x11e   :  { %v279_v59 = vadd.f32 %v278_v58, %v67_v47  ;;  %v280_v60 = vpop.f32.mrb[5].mxu0  ;;  %v499_v58 = vunpack.c.l.s4 %v655_v57 }
 0x11f   :  { %v281_v61 = vadd.f32 %v280_v60, %v71_v48  ;;  %v282_v62 = vpop.f32.mrb[6].mxu0 }
 0x120   :  { %639 = vtanh.f32 %v279_v59  ;;  %v283_v0 = vpop.f32.mrb[7].mxu0  ;;  %v500_v59 = vunpack.c.0.s8 %v499_v58 }
 0x121   :  { %641 = vtanh.f32 %v281_v61 }
 0x122   :  { %v632_v2 = vpop.eup %631  ;;  %v503_v61 = vsub.s32 %v500_v59, %v821_v43 }
 0x123   :  { %v634_v3 = vpop.eup %633  ;;  %v303_v4 = vmul.f32 %v632_v2, %v296_v63 }
 0x124   :  { %v636_v5 = vpop.eup %635  ;;  %v304_v6 = vmul.f32 %v634_v3, %v300_v1 }
 0x125   :  { %v638_v7 = vpop.eup %637  ;;  %v305_v8 = vmul.f32 %v636_v5, %v296_v63 }
 0x126   :  { %v309_v9 = vadd.f32 %v304_v6, %v303_v4  ;;  %v306_v10 = vmul.f32 %v638_v7, %v300_v1 }
 0x128   :  { %310 = vadd.xlane.f32.xlu0 %v309_v9  ;;  %v312_v11 = vadd.f32 %v306_v10, %v305_v8 }
 0x12a   :  { %v640_v12 = vpop.eup %639 }
 0x12b   :  { %v642_v15 = vpop.eup %641  ;;  %v307_v16 = vmul.f32 %v640_v12, %v296_v63 }
 0x12c   :  { %313 = vadd.xlane.f32.xlu0 %v312_v11  ;;  %v308_v17 = vmul.f32 %v642_v15, %v300_v1 }
 0x12e   :  { %v315_v18 = vadd.f32 %v308_v17, %v307_v16 }
 0x130   :  { %316 = vadd.xlane.f32.xlu1 %v315_v18 }
 0x1b5   :  { %v311_v20 = vpop.xlane.xlu0 %310 }
 0x1b9   :  { %v314_v21 = vpop.xlane.xlu0 %313 }
 0x1ba   :  { %v318_v22 = vmax.f32 %v311_v20, %v314_v21 }
 0x1bd   :  { %v317_v23 = vpop.xlane.xlu1 %316 }
 0x1be   :  { %v319_v24 = vmax.f32 %v318_v22, %v317_v23 }
 0x1c0   :  { %v320_v25 = vrot.slane %v319_v24, 4 }
 0x1c2   :  { %v321_v26 = vmax.f32 %v319_v24, %v320_v25 }
 0x1c4   :  { %v322_v27 = vrot.slane %v321_v26, 2 }
 0x1c6   :  { %v323_v28 = vmax.f32 %v321_v26, %v322_v27 }
 0x1c8   :  { %v324_v29 = vrot.slane %v323_v28, 1 }
 0x1ca   :  { %v325_v30 = vmax.f32 %v323_v28, %v324_v29 }
 0x1cc   :  { %v326_v31 = vsub.f32 %v311_v20, %v325_v30  ;;  %v327_v32 = vsub.f32 %v314_v21, %v325_v30  ;;  %v328_v33 = vsub.f32 %v317_v23, %v325_v30 }
 0x1ce   :  { %v329_v34 = vmul.f32 1.442695, %v326_v31  ;;  %v331_v38 = vmul.f32 1.442695, %v327_v32  ;;  %v333_v39 = vmul.f32 1.442695, %v328_v33 }
 0x1d0   :  { %643 = vpow2.f32 %v329_v34 }
 0x1d1   :  { %645 = vpow2.f32 %v331_v38 }
 0x1d2   :  { %647 = vpow2.f32 %v333_v39 }
 0x1da   :  { %v644_v41 = vpop.eup %643 }
 0x1db   :  { %v646_v44 = vpop.eup %645  ;;  %v337_v45 = vmul.f32 %v644_v41, %v728_v13  ;;  %v336_v46 = vmul.f32 %v644_v41, %v797_v35  ;;  %v335_v13 = vld [vmem:[%s849_s1] sm:$0x1] }
 0x1dc   :  { %v339_v47 = vmul.f32 %v646_v44, %v733_v14  ;;  %v338_v48 = vmul.f32 %v646_v44, %v802_v36  ;;  %v648_v49 = vpop.eup %647  ;;  %v574_v35 = vpack.c.bf16 %v646_v44, %v644_v41  ;;  %v652_v14 = vmov 0.0|0.0  }
 0x1dd   :  { %v341_v52 = vmul.f32 %v648_v49, %v807_v37  ;;  %v340_v53 = vmul.f32 %v648_v49, %v816_v40  ;;  %v654_v36 = vmov 0  }
 0x1de   :  { %v569_v50 = vpack.c.bf16 %v339_v47, %v337_v45  ;;  %v571_v51 = vpack.c.bf16 %v338_v48, %v336_v46  ;;  %581 = vset.pattern.permute.xlu1 %v654_v36  ;;  %582 = vset.pattern.permute.xlu0 %v654_v36 }
 0x1e0   :  { %570 = vmatprep.subr.bf16.mxu1 %v569_v50 }
 0x1e1   :  { %572 = vmatpush1.bf16.msra.mxu1 %v571_v51 }
 0x1e2   :  { %350 = vmatprep.subr.mxu1 %v341_v52 }
 0x1e5   :  { %351 = vmatpush1.msra.mxu1 %v340_v53 }
 0x1e6   :  { %554 = vmatmul.mubr.msk.f32.vlgmr.msra.gmra.mrb[0].mxu1 %vm342_vm0, %v335_v13  ;;  %573 = vmatprep.subr.bf16.mxu1 %v652_v14 }
 0x1e7   :  { %575 = vmatpush3.bf16.msra.mxu1 %v574_v35  ;;  %566 = vmatprep.mubr.msk.f32.mxu1 %vm653_vm1, %v651_v19 }
 0x1e8   :  { %564 = vmatprep.subr.mxu1 %v651_v19 }
 0x1eb   :  { %565 = vmatpush3.msra.mxu1 %v648_v49 }
 0x1ec   :  { %567 = vmatmul.mubr.msk.f32.vlgmr.msra.gmra.mrb[2].mxu1 %vm342_vm0, %v335_v13 }
 0x2b9   :  { %v412_v37 = vpop.f32.mrb[0].mxu1 }
 0x2ba   :  { %v414_v40 = vpop.f32.mrb[1].mxu1 }
 0x2bf   :  { %v483_v54 = vpop.f32.mrb[2].mxu1 }
 0x2c0   :  { %489 = vperm.xlu1 %581, %v483_v54   ;;  %v568_v55 = vpop.f32.mrb[3].mxu1 }
 0x33f   :  { %v490_v56 = vpop.permute.xlu1 %489 }
 0x340   :  { %649 = vrcp.f32 %v490_v56 }
 0x34a   :  { %v650_v60 = vpop.eup %649 }
 0x34b   :  { %v493_v62 = vmul.f32 %v650_v60, %v412_v37  ;;  %v494_v63 = vmul.f32 %v650_v60, %v414_v40 }
 0x34d   :  { %v497_v0 = vcombine.low %v493_v62, %v494_v63 }
 0x34f   :  { %v504_v1 = vrot.slane %v497_v0, %v503_v61 }
 0x351   :  { %v511_v2 = vrot.slane %v504_v1, %v503_v61 }
 0x353   :  { %517 = vst.msk [vmem:[%s850_s5] sm:$0x3] %vm515_vm2, %v511_v2 }

// kernel: siamese_forward.45
= control target key start
LH: loop header
LB: loop body
LE: loop exit
PB: predicated region body
PF: predicated region fallthrough
CT: control target
= control target key end

     0   :  { %s1344_s1 = inlined_call_operand.vmem [shape: bf16[256,768], index: 1, kind: input, shape index: {}]   ;;  %s1345_s0 = inlined_call_operand.vmem [shape: f32[6,256], index: 0, kind: input, shape index: {}]   ;;  %s1346_s2 = inlined_call_operand.vmem [shape: f32[1,768], index: 2, kind: input, shape index: {}]   ;;  %s1347_s3 = inlined_call_operand.vmem [shape: f32[6,768], index: 3, kind: output, shape index: {}]  }
   0x1   :  { %v855_v0 = vld [vmem:[%s1344_s1 + $0x4] ss:$24 sps:$4 sm:$0xff]   ;;  %v857_v1 = vld [vmem:[%s1344_s1] ss:$24 sps:$4 sm:$0xff]   ;;  %v858_v2 = vld [vmem:[%s1344_s1 + $0x34] ss:$24 sps:$4 sm:$0xff]  }
   0x2   :  { %626 = vmatprep.subr.bf16.mxu0 %v855_v0  ;;  %v860_v3 = vld [vmem:[%s1344_s1 + $0x30] ss:$24 sps:$4 sm:$0xff]   ;;  %v861_v4 = vld [vmem:[%s1344_s1 + $0x64] ss:$24 sps:$4 sm:$0xff]   ;;  %v863_v5 = vld [vmem:[%s1344_s1 + $0x60] ss:$24 sps:$4 sm:$0xff]  }
   0x3   :  { %627 = vmatpush1.bf16.msra.mxu0 %v857_v1  ;;  %v864_v6 = vld [vmem:[%s1344_s1 + $0x94] ss:$24 sps:$4 sm:$0xff]   ;;  %v866_v7 = vld [vmem:[%s1344_s1 + $0x90] ss:$24 sps:$4 sm:$0xff]   ;;  %v867_v8 = vld [vmem:[%s1344_s1 + $0xc4] ss:$24 sps:$4 sm:$0xff]  }
   0x4   :  { %628 = vmatprep.subr.bf16.mxu0 %v858_v2  ;;  %v869_v9 = vld [vmem:[%s1344_s1 + $0xc0] ss:$24 sps:$4 sm:$0xff]   ;;  %v870_v10 = vld [vmem:[%s1344_s1 + $0xf4] ss:$24 sps:$4 sm:$0xff]   ;;  %v872_v11 = vld [vmem:[%s1344_s1 + $0xf0] ss:$24 sps:$4 sm:$0xff]  }
   0x5   :  { %v873_v12 = vld [vmem:[%s1344_s1 + $0x124] ss:$24 sps:$4 sm:$0xff]   ;;  %v905_v14 = vld [vmem:[%s1344_s1 + $0x8] ss:$24 sps:$4 sm:$0xff]   ;;  %v876_v18 = vld [vmem:[%s1344_s1 + $0x154] ss:$24 sps:$4 sm:$0xff]  }
   0x6   :  { %v903_v13 = vld [vmem:[%s1344_s1 + $0xc] ss:$24 sps:$4 sm:$0xff]   ;;  %v875_v16 = vld [vmem:[%s1344_s1 + $0x120] ss:$24 sps:$4 sm:$0xff]   ;;  %v909_v19 = vld [vmem:[%s1344_s1 + $0x3c] ss:$24 sps:$4 sm:$0xff]  }
   0x7   :  { %629 = vmatpush1.bf16.msra.mxu0 %v860_v3  ;;  %v15_v15 = vld [vmem:[%s1345_s0 + $0x8] sm:$0x3f]  ;;  %667 = vmatprep.subr.bf16.mxu1 %v903_v13  ;;  %v911_v20 = vld [vmem:[%s1344_s1 + $0x38] ss:$24 sps:$4 sm:$0xff]   ;;  %v879_v22 = vld [vmem:[%s1344_s1 + $0x184] ss:$24 sps:$4 sm:$0xff]  }
   0x8   :  { %630 = vmatprep.subr.bf16.mxu0 %v861_v4  ;;  %v1070_v17 = vpack.c.bf16 %v15_v15, %v15_v15  ;;  %668 = vmatpush1.bf16.msra.mxu1 %v905_v14  ;;  %v878_v21 = vld [vmem:[%s1344_s1 + $0x150] ss:$24 sps:$4 sm:$0xff]   ;;  %v915_v23 = vld [vmem:[%s1344_s1 + $0x6c] ss:$24 sps:$4 sm:$0xff]   ;;  %v921_v25 = vld [vmem:[%s1344_s1 + $0x9c] ss:$24 sps:$4 sm:$0xff]  }
   0x9   :  { %669 = vmatprep.subr.bf16.mxu1 %v909_v19  ;;  %v917_v24 = vld [vmem:[%s1344_s1 + $0x68] ss:$24 sps:$4 sm:$0xff]   ;;  %v882_v27 = vld [vmem:[%s1344_s1 + $0x1b4] ss:$24 sps:$4 sm:$0xff]   ;;  %v923_v28 = vld [vmem:[%s1344_s1 + $0x98] ss:$24 sps:$4 sm:$0xff]  }
   0xa   :  { %658 = vmatprep.mubr.bf16.mxu0 %v1070_v17  ;;  %699 = vmatprep.mubr.bf16.mxu1 %v1070_v17  ;;  %v881_v26 = vld [vmem:[%s1344_s1 + $0x180] ss:$24 sps:$4 sm:$0xff]   ;;  %v927_v29 = vld [vmem:[%s1344_s1 + $0xcc] ss:$24 sps:$4 sm:$0xff]   ;;  %v884_v30 = vld [vmem:[%s1344_s1 + $0x1b0] ss:$24 sps:$4 sm:$0xff]  }
   0xb   :  { %631 = vmatpush1.bf16.msra.mxu0 %v863_v5  ;;  %v885_v31 = vld [vmem:[%s1344_s1 + $0x1e4] ss:$24 sps:$4 sm:$0xff]   ;;  %v929_v32 = vld [vmem:[%s1344_s1 + $0xc8] ss:$24 sps:$4 sm:$0xff]   ;;  %v888_v35 = vld [vmem:[%s1344_s1 + $0x214] ss:$24 sps:$4 sm:$0xff]  }
   0xc   :  { %632 = vmatprep.subr.bf16.mxu0 %v864_v6  ;;  %670 = vmatpush1.bf16.msra.mxu1 %v911_v20  ;;  %v933_v33 = vld [vmem:[%s1344_s1 + $0xfc] ss:$24 sps:$4 sm:$0xff]   ;;  %v887_v34 = vld [vmem:[%s1344_s1 + $0x1e0] ss:$24 sps:$4 sm:$0xff]   ;;  %v939_v37 = vld [vmem:[%s1344_s1 + $0x12c] ss:$24 sps:$4 sm:$0xff]  }
   0xd   :  { %671 = vmatprep.subr.bf16.mxu1 %v915_v23  ;;  %v935_v36 = vld [vmem:[%s1344_s1 + $0xf8] ss:$24 sps:$4 sm:$0xff]   ;;  %v891_v39 = vld [vmem:[%s1344_s1 + $0x244] ss:$24 sps:$4 sm:$0xff]   ;;  %v941_v40 = vld [vmem:[%s1344_s1 + $0x128] ss:$24 sps:$4 sm:$0xff]  }
   0xe   :  { %v890_v38 = vld [vmem:[%s1344_s1 + $0x210] ss:$24 sps:$4 sm:$0xff]   ;;  %v945_v41 = vld [vmem:[%s1344_s1 + $0x15c] ss:$24 sps:$4 sm:$0xff]   ;;  %v893_v42 = vld [vmem:[%s1344_s1 + $0x240] ss:$24 sps:$4 sm:$0xff]  }
   0xf   :  { %633 = vmatpush1.bf16.msra.mxu0 %v866_v7  ;;  %v894_v43 = vld [vmem:[%s1344_s1 + $0x274] ss:$24 sps:$4 sm:$0xff]   ;;  %v947_v44 = vld [vmem:[%s1344_s1 + $0x158] ss:$24 sps:$4 sm:$0xff]   ;;  %v897_v47 = vld [vmem:[%s1344_s1 + $0x2a4] ss:$24 sps:$4 sm:$0xff]  }
  0x10   :  { %634 = vmatprep.subr.bf16.mxu0 %v867_v8  ;;  %672 = vmatpush1.bf16.msra.mxu1 %v917_v24  ;;  %v951_v45 = vld [vmem:[%s1344_s1 + $0x18c] ss:$24 sps:$4 sm:$0xff]   ;;  %v896_v46 = vld [vmem:[%s1344_s1 + $0x270] ss:$24 sps:$4 sm:$0xff]   ;;  %v957_v49 = vld [vmem:[%s1344_s1 + $0x1bc] ss:$24 sps:$4 sm:$0xff]  }
  0x11   :  { %673 = vmatprep.subr.bf16.mxu1 %v921_v25  ;;  %v953_v48 = vld [vmem:[%s1344_s1 + $0x188] ss:$24 sps:$4 sm:$0xff]   ;;  %v900_v51 = vld [vmem:[%s1344_s1 + $0x2d4] ss:$24 sps:$4 sm:$0xff]   ;;  %v959_v53 = vld [vmem:[%s1344_s1 + $0x1b8] ss:$24 sps:$4 sm:$0xff]  }
  0x12   :  { %v899_v50 = vld [vmem:[%s1344_s1 + $0x2a0] ss:$24 sps:$4 sm:$0xff]   ;;  %v902_v52 = vld [vmem:[%s1344_s1 + $0x2d0] ss:$24 sps:$4 sm:$0xff]   ;;  %v963_v54 = vld [vmem:[%s1344_s1 + $0x1ec] ss:$24 sps:$4 sm:$0xff]  }
  0x13   :  { %635 = vmatpush1.bf16.msra.mxu0 %v869_v9  ;;  %v14_v55 = vld [vmem:[%s1345_s0] sm:$0x3f]  ;;  %v908_v56 = vld [vmem:[%s1344_s1 + $0x14] ss:$24 sps:$4 sm:$0xff]   ;;  %v906_v60 = vld [vmem:[%s1344_s1 + $0x10] ss:$24 sps:$4 sm:$0xff]  }
  0x14   :  { %636 = vmatprep.subr.bf16.mxu0 %v870_v10  ;;  %674 = vmatpush1.bf16.msra.mxu1 %v923_v28  ;;  %v965_v57 = vld [vmem:[%s1344_s1 + $0x1e8] ss:$24 sps:$4 sm:$0xff]   ;;  %v1194_v58 = vpack.c.bf16 %v14_v55, %v14_v55  ;;  %v969_v59 = vld [vmem:[%s1344_s1 + $0x21c] ss:$24 sps:$4 sm:$0xff]   ;;  %v971_v62 = vld [vmem:[%s1344_s1 + $0x218] ss:$24 sps:$4 sm:$0xff]  }
  0x15   :  { %675 = vmatprep.subr.bf16.mxu1 %v927_v29  ;;  %v914_v61 = vld [vmem:[%s1344_s1 + $0x44] ss:$24 sps:$4 sm:$0xff]   ;;  %v912_v0 = vld [vmem:[%s1344_s1 + $0x40] ss:$24 sps:$4 sm:$0xff]   ;;  %v920_v1 = vld [vmem:[%s1344_s1 + $0x74] ss:$24 sps:$4 sm:$0xff]  }
  0x16   :  { %v975_v63 = vld [vmem:[%s1344_s1 + $0x24c] ss:$24 sps:$4 sm:$0xff]   ;;  %v977_v2 = vld [vmem:[%s1344_s1 + $0x248] ss:$24 sps:$4 sm:$0xff]   ;;  %v981_v3 = vld [vmem:[%s1344_s1 + $0x27c] ss:$24 sps:$4 sm:$0xff]  }
  0x17   :  { %637 = vmatpush1.bf16.msra.mxu0 %v872_v11  ;;  %v918_v4 = vld [vmem:[%s1344_s1 + $0x70] ss:$24 sps:$4 sm:$0xff]   ;;  %v926_v5 = vld [vmem:[%s1344_s1 + $0xa4] ss:$24 sps:$4 sm:$0xff]   ;;  %v924_v8 = vld [vmem:[%s1344_s1 + $0xa0] ss:$24 sps:$4 sm:$0xff]  }
  0x18   :  { %638 = vmatprep.subr.bf16.mxu0 %v873_v12  ;;  %676 = vmatpush1.bf16.msra.mxu1 %v929_v32  ;;  %v983_v6 = vld [vmem:[%s1344_s1 + $0x278] ss:$24 sps:$4 sm:$0xff]   ;;  %v987_v7 = vld [vmem:[%s1344_s1 + $0x2ac] ss:$24 sps:$4 sm:$0xff]   ;;  %v989_v10 = vld [vmem:[%s1344_s1 + $0x2a8] ss:$24 sps:$4 sm:$0xff]  }
  0x19   :  { %677 = vmatprep.subr.bf16.mxu1 %v933_v33  ;;  %v932_v9 = vld [vmem:[%s1344_s1 + $0xd4] ss:$24 sps:$4 sm:$0xff]   ;;  %v930_v12 = vld [vmem:[%s1344_s1 + $0xd0] ss:$24 sps:$4 sm:$0xff]   ;;  %v938_v13 = vld [vmem:[%s1344_s1 + $0x104] ss:$24 sps:$4 sm:$0xff]  }
  0x1a   :  { %v993_v11 = vld [vmem:[%s1344_s1 + $0x2dc] ss:$24 sps:$4 sm:$0xff]   ;;  %v995_v14 = vld [vmem:[%s1344_s1 + $0x2d8] ss:$24 sps:$4 sm:$0xff]  }
  0x1b   :  { %639 = vmatpush1.bf16.msra.mxu0 %v875_v16  ;;  %v936_v15 = vld [vmem:[%s1344_s1 + $0x100] ss:$24 sps:$4 sm:$0xff]   ;;  %v944_v16 = vld [vmem:[%s1344_s1 + $0x134] ss:$24 sps:$4 sm:$0xff]   ;;  %v966_v25 = vld [vmem:[%s1344_s1 + $0x1f0] ss:$24 sps:$4 sm:$0xff]  }
  0x1c   :  { %640 = vmatprep.subr.bf16.mxu0 %v876_v18  ;;  %678 = vmatpush1.bf16.msra.mxu1 %v935_v36  ;;  %v950_v18 = vld [vmem:[%s1344_s1 + $0x164] ss:$24 sps:$4 sm:$0xff]   ;;  %v948_v19 = vld [vmem:[%s1344_s1 + $0x160] ss:$24 sps:$4 sm:$0xff]   ;;  %v956_v20 = vld [vmem:[%s1344_s1 + $0x194] ss:$24 sps:$4 sm:$0xff]   ;;  %v116_v36 = vlaneseq }
  0x1d   :  { %679 = vmatprep.subr.bf16.mxu1 %v939_v37  ;;  %v960_v23 = vld [vmem:[%s1344_s1 + $0x1c0] ss:$24 sps:$4 sm:$0xff]   ;;  %v968_v24 = vld [vmem:[%s1344_s1 + $0x1f4] ss:$24 sps:$4 sm:$0xff]   ;;  %v978_v29 = vld [vmem:[%s1344_s1 + $0x250] ss:$24 sps:$4 sm:$0xff]  }
  0x1e   :  { %v980_v28 = vld [vmem:[%s1344_s1 + $0x254] ss:$24 sps:$4 sm:$0xff]   ;;  %v990_v33 = vld [vmem:[%s1344_s1 + $0x2b0] ss:$24 sps:$4 sm:$0xff]   ;;  %v117_v37 = vshrl.u32 %v116_v36, 7 }
  0x1f   :  { %641 = vmatpush1.bf16.msra.mxu0 %v878_v21  ;;  %v954_v21 = vld [vmem:[%s1344_s1 + $0x190] ss:$24 sps:$4 sm:$0xff]   ;;  %v992_v32 = vld [vmem:[%s1344_s1 + $0x2b4] ss:$24 sps:$4 sm:$0xff]  }
  0x20   :  { %642 = vmatprep.subr.bf16.mxu0 %v879_v22  ;;  %680 = vmatpush1.bf16.msra.mxu1 %v941_v40  ;;  %v962_v22 = vld [vmem:[%s1344_s1 + $0x1c4] ss:$24 sps:$4 sm:$0xff]   ;;  %v122_v40 = vsub.s32 1, %v117_v37 }
  0x21   :  { %681 = vmatprep.subr.bf16.mxu1 %v945_v41 }
  0x23   :  { %643 = vmatpush1.bf16.msra.mxu0 %v881_v26  ;;  %v974_v26 = vld [vmem:[%s1344_s1 + $0x224] ss:$24 sps:$4 sm:$0xff]  }
  0x24   :  { %644 = vmatprep.subr.bf16.mxu0 %v882_v27  ;;  %682 = vmatpush1.bf16.msra.mxu1 %v947_v44  ;;  %v972_v27 = vld [vmem:[%s1344_s1 + $0x220] ss:$24 sps:$4 sm:$0xff]  }
  0x25   :  { %683 = vmatprep.subr.bf16.mxu1 %v951_v45 }
  0x27   :  { %645 = vmatpush1.bf16.msra.mxu0 %v884_v30  ;;  %v986_v30 = vld [vmem:[%s1344_s1 + $0x284] ss:$24 sps:$4 sm:$0xff]  }
  0x28   :  { %646 = vmatprep.subr.bf16.mxu0 %v885_v31  ;;  %684 = vmatpush1.bf16.msra.mxu1 %v953_v48  ;;  %v984_v31 = vld [vmem:[%s1344_s1 + $0x280] ss:$24 sps:$4 sm:$0xff]  }
  0x29   :  { %685 = vmatprep.subr.bf16.mxu1 %v957_v49  ;;  %v126_v49 = vsub.s32 2, %v117_v37 }
  0x2b   :  { %647 = vmatpush1.bf16.msra.mxu0 %v887_v34  ;;  %v998_v34 = vld [vmem:[%s1344_s1 + $0x2e4] ss:$24 sps:$4 sm:$0xff]  }
  0x2c   :  { %648 = vmatprep.subr.bf16.mxu0 %v888_v35  ;;  %686 = vmatpush1.bf16.msra.mxu1 %v959_v53  ;;  %v996_v35 = vld [vmem:[%s1344_s1 + $0x2e0] ss:$24 sps:$4 sm:$0xff]  }
  0x2d   :  { %687 = vmatprep.subr.bf16.mxu1 %v963_v54 }
  0x2f   :  { %649 = vmatpush1.bf16.msra.mxu0 %v890_v38  ;;  %v118_v38 = vsub.s32 0, %v117_v37 }
  0x30   :  { %650 = vmatprep.subr.bf16.mxu0 %v891_v39  ;;  %688 = vmatpush1.bf16.msra.mxu1 %v965_v57  ;;  %v114_v39 = vld [vmem:[%s1346_s2] sm:$0x3f] }
  0x31   :  { %689 = vmatprep.subr.bf16.mxu1 %v969_v59  ;;  %v119_v41 = vrot.slane %v114_v39, %v118_v38  ;;  %v134_v59 = vsub.s32 4, %v117_v37 }
  0x33   :  { %651 = vmatpush1.bf16.msra.mxu0 %v893_v42  ;;  %v123_v42 = vrot.slane %v114_v39, %v122_v40 }
  0x34   :  { %652 = vmatprep.subr.bf16.mxu0 %v894_v43  ;;  %690 = vmatpush1.bf16.msra.mxu1 %v971_v62 }
  0x35   :  { %691 = vmatprep.subr.bf16.mxu1 %v975_v63 }
  0x37   :  { %653 = vmatpush1.bf16.msra.mxu0 %v896_v46 }
  0x38   :  { %654 = vmatprep.subr.bf16.mxu0 %v897_v47  ;;  %692 = vmatpush1.bf16.msra.mxu1 %v977_v2 }
  0x39   :  { %693 = vmatprep.subr.bf16.mxu1 %v981_v3 }
  0x3b   :  { %655 = vmatpush1.bf16.msra.mxu0 %v899_v50  ;;  %v130_v50 = vsub.s32 3, %v117_v37 }
  0x3c   :  { %656 = vmatprep.subr.bf16.mxu0 %v900_v51  ;;  %694 = vmatpush1.bf16.msra.mxu1 %v983_v6  ;;  %v127_v51 = vrot.slane %v114_v39, %v126_v49 }
  0x3d   :  { %695 = vmatprep.subr.bf16.mxu1 %v987_v7 }
  0x3f   :  { %657 = vmatpush1.bf16.msra.mxu0 %v902_v52  ;;  %v131_v52 = vrot.slane %v114_v39, %v130_v50 }
  0x40   :  { %708 = vmatprep.subr.bf16.mxu0 %v908_v56  ;;  %696 = vmatpush1.bf16.msra.mxu1 %v989_v10 }
  0x41   :  { %697 = vmatprep.subr.bf16.mxu1 %v993_v11 }
  0x42   :  { %659 = vmatmul.mubr.bf16.vlgmr.msra.gmra.mrb[0].mxu0 %v1194_v58 }
  0x43   :  { %709 = vmatpush1.bf16.msra.mxu0 %v906_v60  ;;  %740 = vmatprep.mubr.bf16.mxu0 %v1070_v17  ;;  %v942_v17 = vld [vmem:[%s1344_s1 + $0x130] ss:$24 sps:$4 sm:$0xff]   ;;  %v138_v60 = vsub.s32 5, %v117_v37 }
  0x44   :  { %710 = vmatprep.subr.bf16.mxu0 %v914_v61  ;;  %698 = vmatpush1.bf16.msra.mxu1 %v995_v14  ;;  %v135_v61 = vrot.slane %v114_v39, %v134_v59 }
  0x45   :  { %v139_v62 = vrot.slane %v114_v39, %v138_v60 }
  0x47   :  { %711 = vmatpush1.bf16.msra.mxu0 %v912_v0  ;;  %700 = vmatmul.mubr.bf16.vlgmr.msra.gmra.mrb[0].mxu1 %v1194_v58 }
  0x48   :  { %712 = vmatprep.subr.bf16.mxu0 %v920_v1 }
  0x4b   :  { %713 = vmatpush1.bf16.msra.mxu0 %v918_v4 }
  0x4c   :  { %714 = vmatprep.subr.bf16.mxu0 %v926_v5 }
  0x4f   :  { %715 = vmatpush1.bf16.msra.mxu0 %v924_v8 }
  0x50   :  { %716 = vmatprep.subr.bf16.mxu0 %v932_v9 }
  0x53   :  { %717 = vmatpush1.bf16.msra.mxu0 %v930_v12 }
  0x54   :  { %718 = vmatprep.subr.bf16.mxu0 %v938_v13 }
  0x57   :  { %719 = vmatpush1.bf16.msra.mxu0 %v936_v15 }
  0x58   :  { %720 = vmatprep.subr.bf16.mxu0 %v944_v16 }
  0x5b   :  { %721 = vmatpush1.bf16.msra.mxu0 %v942_v17 }
  0x5c   :  { %722 = vmatprep.subr.bf16.mxu0 %v950_v18 }
  0x5f   :  { %723 = vmatpush1.bf16.msra.mxu0 %v948_v19 }
  0x60   :  { %724 = vmatprep.subr.bf16.mxu0 %v956_v20 }
  0x63   :  { %725 = vmatpush1.bf16.msra.mxu0 %v954_v21 }
  0x64   :  { %726 = vmatprep.subr.bf16.mxu0 %v962_v22 }
  0x67   :  { %727 = vmatpush1.bf16.msra.mxu0 %v960_v23 }
  0x68   :  { %728 = vmatprep.subr.bf16.mxu0 %v968_v24 }
  0x6b   :  { %729 = vmatpush1.bf16.msra.mxu0 %v966_v25 }
  0x6c   :  { %730 = vmatprep.subr.bf16.mxu0 %v974_v26 }
  0x6f   :  { %731 = vmatpush1.bf16.msra.mxu0 %v972_v27 }
  0x70   :  { %732 = vmatprep.subr.bf16.mxu0 %v980_v28 }
  0x73   :  { %733 = vmatpush1.bf16.msra.mxu0 %v978_v29 }
  0x74   :  { %734 = vmatprep.subr.bf16.mxu0 %v986_v30 }
  0x77   :  { %735 = vmatpush1.bf16.msra.mxu0 %v984_v31 }
  0x78   :  { %736 = vmatprep.subr.bf16.mxu0 %v992_v32 }
  0x7b   :  { %737 = vmatpush1.bf16.msra.mxu0 %v990_v33 }
  0x7c   :  { %738 = vmatprep.subr.bf16.mxu0 %v998_v34 }
  0x7f   :  { %739 = vmatpush1.bf16.msra.mxu0 %v996_v35 }
  0x82   :  { %741 = vmatmul.mubr.bf16.vlgmr.msra.gmra.mrb[4].mxu0 %v1194_v58 }
 0x115   :  { %v660_v43 = vpop.f32.mrb[0].mxu0 }
 0x116   :  { %v661_v44 = vadd.f32 %v660_v43, %v119_v41  ;;  %v662_v45 = vpop.f32.mrb[1].mxu0 }
 0x117   :  { %v663_v46 = vadd.f32 %v662_v45, %v123_v42  ;;  %v664_v47 = vpop.f32.mrb[2].mxu0 }
 0x118   :  { %749 = vst [vmem:[%s1347_s3] sm:$0x3f] %v661_v44  ;;  %v665_v48 = vpop.f32.mrb[3].mxu0 }
 0x119   :  { %750 = vst [vmem:[%s1347_s3 + $0x8] sm:$0x3f] %v663_v46 }
 0x11a   :  { %v701_v53 = vpop.f32.mrb[0].mxu1 }
 0x11b   :  { %v702_v54 = vadd.f32 %v701_v53, %v127_v51  ;;  %v703_v55 = vpop.f32.mrb[1].mxu1 }
 0x11c   :  { %v704_v56 = vadd.f32 %v703_v55, %v131_v52  ;;  %v705_v57 = vpop.f32.mrb[2].mxu1 }
 0x11d   :  { %751 = vst [vmem:[%s1347_s3 + $0x10] sm:$0x3f] %v702_v54  ;;  %v706_v58 = vpop.f32.mrb[3].mxu1 }
 0x11e   :  { %752 = vst [vmem:[%s1347_s3 + $0x18] sm:$0x3f] %v704_v56 }
 0x155   :  { %v742_v63 = vpop.f32.mrb[4].mxu0 }
 0x156   :  { %v743_v0 = vadd.f32 %v742_v63, %v135_v61  ;;  %v744_v1 = vpop.f32.mrb[5].mxu0 }
 0x157   :  { %v745_v2 = vadd.f32 %v744_v1, %v139_v62  ;;  %v746_v3 = vpop.f32.mrb[6].mxu0 }
 0x158   :  { %753 = vst [vmem:[%s1347_s3 + $0x20] sm:$0x3f] %v743_v0  ;;  %v747_v4 = vpop.f32.mrb[7].mxu0 }
 0x159   :  { %754 = vst [vmem:[%s1347_s3 + $0x28] sm:$0x3f] %v745_v2 }

// kernel: siamese_forward.46
= control target key start
LH: loop header
LB: loop body
LE: loop exit
PB: predicated region body
PF: predicated region fallthrough
CT: control target
= control target key end

     0   :  { %s936_s12 = smov 0   ;;  %s938_s13 = smov 0   ;;  %s1033_s0 = inlined_call_operand.vmem [shape: f32[3,2,768], index: 0, kind: input, shape index: {}]   ;;  %s1034_s1 = inlined_call_operand.vmem [shape: bf16[2,128,384], index: 1, kind: input, shape index: {}]   ;;  %s1035_s2 = inlined_call_operand.vmem [shape: f32[2,1,384], index: 2, kind: input, shape index: {}]   ;;  %s1036_s3 = inlined_call_operand.vmem [shape: f32[3,2,256], index: 3, kind: output, shape index: {}]  }
   0x1   :  { %s940_s14 = smov 0   ;;  %s942_s15 = smov 0  }
   0x2   :  { %s944_s16 = smov 0  }
   0x3 LB: > { %s22_s17 = sadd.s32 1, %s902_s14  ;;  %s25_s18 = sadd.s32 1, %s906_s15  ;;  %s910_s16 = sphi %s944_s16, %s13_s16   ;;  %s906_s15 = sphi %s942_s15, %s1040_s15   ;;  %s902_s14 = sphi %s940_s14, %s1039_s14   ;;  %s898_s13 = sphi %s938_s13, %s1038_s13   ;;  %s894_s12 = sphi %s936_s12, %s1037_s12  }
   0x4   : > { %p23_p0 = scmp.ge.s32.totalorder %s22_s17, 3  ;;  %p718_p1 = scmp.ge.s32.totalorder %s910_s16, 1 }
   0x5   : > { %p201_p2 = scmp.lt.s32.totalorder %s910_s16, 7 }
   0x6   : > { %s1042_s17 = smov (%p23_p0, %s22_s17), 0  ;;  %s1044_s18 = smov (!%p23_p0, %s25_s18), %s906_s15 }
   0x7   : > { %p202_p3 = pnand %p718_p1, %p201_p2  ;;  %p27_p4 = scmp.ge.s32.totalorder %s1044_s18, 2 }
   0x8   : > { %s719_s19 = sshll.u32 (!%p202_p3), %s894_s12, 1  ;;  %s253_s20 = smul.u32 (!%p202_p3), 3, %s898_s13 }
   0x9   : > { %s1046_s18 = smov (%p27_p4, %s1044_s18), 0  ;;  %205 = sbr.rel (%p202_p3) target bundleno = 326 (0x146), region = 32 }
   0xa   : > { %s250_s21 = ssub.s32 (!%p202_p3), 2, %s719_s19  ;;  %p267_p5 = scmp.lt.s32.totalorder (!%p202_p3), %s898_s13, 1 }
   0xb   : > { %s251_s22 = smul.u32 (!%p202_p3), %s898_s13, %s250_s21  ;;  %p256_p6 = scmp.lt.s32.totalorder (!%p202_p3), %s253_s20, 5 }
   0xc   : > { %p725_p8 = scmp.ne.s32.totalorder (!%p202_p3), %s894_s12, 0 }
   0xd   : > { %s252_s23 = sadd.s32 (!%p202_p3), %s894_s12, %s251_s22 }
   0xe   : > { %p254_p7 = scmp.lt.s32.totalorder (!%p202_p3), %s252_s23, 2 }
  0x10   : > { %s1048_s13 = smov (!%p267_p5, %s898_s13), 1  ;;  %s1050_s20 = smov (!%p256_p6, %s253_s20), 5 }
  0x11   : > { %s784_s24 = smul.u32 192, %s1048_s13  ;;  %s1052_s23 = smov (!%p254_p7, %s252_s23), 2  ;;  %v912_v0 = vmov (!%p725_p8), 0.0  }
  0x12   : > { %s785_s28 = smul.u32 3, %s1048_s13  ;;  %s723_s30 = sshll.u32 %s1052_s23, 1  ;;  %297 = vst [vmem:[#allocation2] sm:$0x3] (!%p725_p8), %v912_v0 }
  0x13   : > { %s973_s27 = scalar_lea.vmem %s1034_s1, %s784_s24  ;;  %s783_s29 = smul.u32 6, %s1052_s23 }
  0x14   : > { %s978_s6 = scalar_lea.vmem %s1035_s2, %s785_s28  ;;  %s285_s7 = sadd.s32 %s723_s30, %s1048_s13 }
  0x15   : > { %s259_s8 = sadd.s32 %s783_s29, %s1050_s20  ;;  %s724_s9 = sshll.u32 %s285_s7, 1 }
  0x16   : > { %s720_s10 = sshll.u32 %s259_s8, 1  ;;  %s983_s21 = scalar_lea.vmem %s1036_s3, %s724_s9 }
  0x17   : > { %s988_s25 = scalar_lea.vmem %s1033_s0, %s720_s10  ;;  %296 = sbr.rel (%p725_p8) target bundleno = 30 (0x1e), region = 36 }
  0x1e PF: > { %v830_v1 = vld [vmem:[%s973_s27 + $0x4] ss:$12 sps:$4 sm:$0xff]   ;;  %v832_v2 = vld [vmem:[%s973_s27] ss:$12 sps:$4 sm:$0xff]   ;;  %v913_v3 = vmov 0.0   ;;  %v914_v4 = vmov 0   ;;  %v335_v29 = vlaneseq }
  0x1f   : > { %763 = vmatprep.subr.bf16.mxu1 %v913_v3  ;;  %510 = vmatprep.mubr.bf16.mxu0 %v914_v4  ;;  %v833_v5 = vld [vmem:[%s973_s27 + $0x1c] ss:$12 sps:$4 sm:$0xff]   ;;  %vm915_vm0 = vmmov 0   ;;  %v835_v6 = vld [vmem:[%s973_s27 + $0x18] ss:$12 sps:$4 sm:$0xff]  }
  0x20   : > { %478 = vmatprep.subr.bf16.mxu0 %v830_v1  ;;  %779 = vmatprep.mubr.msk.bf16.mxu1 %vm915_vm0, %v913_v3  ;;  %v836_v7 = vld [vmem:[%s973_s27 + $0x34] ss:$12 sps:$4 sm:$0xff]   ;;  %v838_v8 = vld [vmem:[%s973_s27 + $0x30] ss:$12 sps:$4 sm:$0xff]   ;;  %v839_v9 = vld [vmem:[%s973_s27 + $0x4c] ss:$12 sps:$4 sm:$0xff]  }
  0x21   : > { %479 = vmatpush1.bf16.msra.mxu0 %v832_v2  ;;  %v851_v10 = vld [vmem:[%s973_s27 + $0x8] ss:$12 sps:$4 sm:$0xff]   ;;  %v842_v12 = vld [vmem:[%s973_s27 + $0x64] ss:$12 sps:$4 sm:$0xff]   ;;  %v855_v13 = vld [vmem:[%s973_s27 + $0x20] ss:$12 sps:$4 sm:$0xff]  }
  0x22   : > { %480 = vmatprep.subr.bf16.mxu0 %v833_v5  ;;  %v841_v11 = vld [vmem:[%s973_s27 + $0x48] ss:$12 sps:$4 sm:$0xff]   ;;  %764 = vmatpush3.bf16.msra.mxu1 %v851_v10  ;;  %v844_v14 = vld [vmem:[%s973_s27 + $0x60] ss:$12 sps:$4 sm:$0xff]   ;;  %v856_v16 = vld [vmem:[%s973_s27 + $0x38] ss:$12 sps:$4 sm:$0xff]  }
  0x23   : > { %765 = vmatprep.subr.bf16.mxu1 %v913_v3  ;;  %v845_v15 = vld [vmem:[%s973_s27 + $0x7c] ss:$12 sps:$4 sm:$0xff]   ;;  %v847_v17 = vld [vmem:[%s973_s27 + $0x78] ss:$12 sps:$4 sm:$0xff]   ;;  %v848_v18 = vld [vmem:[%s973_s27 + $0x94] ss:$12 sps:$4 sm:$0xff]  }
  0x24   : > { %v857_v19 = vld [vmem:[%s973_s27 + $0x50] ss:$12 sps:$4 sm:$0xff]   ;;  %v852_v21 = vld [vmem:[%s973_s27 + $0xac] ss:$12 sps:$4 sm:$0xff]   ;;  %v858_v22 = vld [vmem:[%s973_s27 + $0x68] ss:$12 sps:$4 sm:$0xff]  }
  0x25   : > { %481 = vmatpush1.bf16.msra.mxu0 %v835_v6  ;;  %v850_v20 = vld [vmem:[%s973_s27 + $0x90] ss:$12 sps:$4 sm:$0xff]   ;;  %v854_v23 = vld [vmem:[%s973_s27 + $0xa8] ss:$12 sps:$4 sm:$0xff]   ;;  %v299_v24 = vld [vmem:[#allocation2] sm:$0x3] }
  0x26   : > { %482 = vmatprep.subr.bf16.mxu0 %v836_v7  ;;  %766 = vmatpush3.bf16.msra.mxu1 %v855_v13  ;;  %v859_v25 = vld [vmem:[%s973_s27 + $0x80] ss:$12 sps:$4 sm:$0xff]   ;;  %v300_v26 = vpack.c.bf16 %v299_v24, %v299_v24  ;;  %v860_v27 = vld [vmem:[%s973_s27 + $0x98] ss:$12 sps:$4 sm:$0xff]   ;;  %v861_v28 = vld [vmem:[%s973_s27 + $0xb0] ss:$12 sps:$4 sm:$0xff]  }
  0x27   : > { %767 = vmatprep.subr.bf16.mxu1 %v913_v3  ;;  %v336_v30 = vshrl.u32 %v335_v29, 7  ;;  %v333_v32 = vld [vmem:[%s978_s6] sm:$0x7] }
  0x28   : > { %v298_v36 = vld [vmem:[%s988_s25] sm:$0x3f] }
  0x29   : > { %483 = vmatpush1.bf16.msra.mxu0 %v838_v8  ;;  %v337_v31 = vsub.s32 0, %v336_v30  ;;  %v341_v33 = vsub.s32 1, %v336_v30  ;;  %v567_v41 = vrot.slane %v298_v36, 2  ;;  %v345_v54 = vsub.s32 2, %v336_v30 }
  0x2a   : > { %484 = vmatprep.subr.bf16.mxu0 %v839_v9  ;;  %768 = vmatpush3.bf16.msra.mxu1 %v856_v16  ;;  %v577_v59 = vrot.slane %v298_v36, 4 }
  0x2b   : > { %769 = vmatprep.subr.bf16.mxu1 %v913_v3  ;;  %v338_v34 = vrot.slane %v333_v32, %v337_v31  ;;  %v342_v35 = vrot.slane %v333_v32, %v341_v33  ;;  %v346_v55 = vrot.slane %v333_v32, %v345_v54 }
  0x2d   : > { %485 = vmatpush1.bf16.msra.mxu0 %v841_v11 }
  0x2e   : > { %486 = vmatprep.subr.bf16.mxu0 %v842_v12  ;;  %770 = vmatpush3.bf16.msra.mxu1 %v857_v19 }
  0x2f   : > { %771 = vmatprep.subr.bf16.mxu1 %v913_v3 }
  0x31   : > { %487 = vmatpush1.bf16.msra.mxu0 %v844_v14 }
  0x32   : > { %488 = vmatprep.subr.bf16.mxu0 %v845_v15  ;;  %772 = vmatpush3.bf16.msra.mxu1 %v858_v22 }
  0x33   : > { %773 = vmatprep.subr.bf16.mxu1 %v913_v3 }
  0x35   : > { %489 = vmatpush1.bf16.msra.mxu0 %v847_v17 }
  0x36   : > { %490 = vmatprep.subr.bf16.mxu0 %v848_v18  ;;  %774 = vmatpush3.bf16.msra.mxu1 %v859_v25 }
  0x37   : > { %775 = vmatprep.subr.bf16.mxu1 %v913_v3 }
  0x39   : > { %491 = vmatpush1.bf16.msra.mxu0 %v850_v20 }
  0x3a   : > { %492 = vmatprep.subr.bf16.mxu0 %v852_v21  ;;  %776 = vmatpush3.bf16.msra.mxu1 %v860_v27 }
  0x3b   : > { %777 = vmatprep.subr.bf16.mxu1 %v913_v3 }
  0x3d   : > { %493 = vmatpush1.bf16.msra.mxu0 %v854_v23 }
  0x3e   : > { %778 = vmatpush3.bf16.msra.mxu1 %v861_v28 }
  0x40   : > { %511 = vmatmul.mubr.bf16.vlgmr.msra.gmra.mrb[0].mxu0 %v300_v26 }
  0x41   : > { %780 = vmatmul.mubr.bf16.vlgmr.msra.gmra.mrb[0].mxu1 %v300_v26 }
 0x113   : > { %v512_v37 = vpop.f32.mrb[0].mxu0 }
 0x114   : > { %v513_v38 = vadd.f32 %v512_v37, %v338_v34  ;;  %v514_v39 = vpop.f32.mrb[1].mxu0  ;;  %v553_v47 = vpop.f32.mrb[0].mxu1 }
 0x115   : > { %v515_v40 = vadd.f32 %v514_v39, %v342_v35  ;;  %v516_v42 = vpop.f32.mrb[2].mxu0  ;;  %v781_v49 = vpop.f32.mrb[1].mxu1  ;;  %v554_v58 = vadd.f32 %v553_v47, %v346_v55 }
 0x116   : > { %v559_v43 = vadd.f32 %v513_v38, %v298_v36  ;;  %v517_v44 = vpop.f32.mrb[3].mxu0  ;;  %v556_v50 = vpop.f32.mrb[2].mxu1 }
 0x117   : > { %v569_v46 = vadd.f32 %v567_v41, %v515_v40  ;;  %v782_v51 = vpop.f32.mrb[3].mxu1 }
 0x118   : > { %v750_v45 = vmul.f32 -1.442695, %v559_v43 }
 0x119   : > { %v751_v48 = vmul.f32 -1.442695, %v569_v46 }
 0x11a   : > { %862 = vpow2.f32 %v750_v45 }
 0x11b   : > { %864 = vpow2.f32 %v751_v48 }
 0x124   : > { %v863_v52 = vpop.eup %862 }
 0x125   : > { %v563_v53 = vadd.f32 1.0, %v863_v52  ;;  %v865_v56 = vpop.eup %864 }
 0x126   : > { %v573_v57 = vadd.f32 1.0, %v865_v56 }
 0x127   : > { %866 = vrcp.f32 %v563_v53 }
 0x128   : > { %868 = vrcp.f32 %v573_v57 }
 0x131   : > { %v867_v60 = vpop.eup %866 }
 0x132   : > { %v576_v61 = vmul.f32 %v867_v60, %v554_v58  ;;  %v869_v63 = vpop.eup %868 }
 0x133   : > { %v581_v0 = vsub.f32 1.0, %v869_v63  ;;  %v583_v2 = vmul.f32 %v869_v63, %v299_v24 }
 0x134   : > { %v579_v62 = vadd.f32 %v577_v59, %v576_v61 }
 0x136   : > { %870 = vtanh.f32 %v579_v62 }
 0x140   : > { %v871_v1 = vpop.eup %870 }
 0x141   : > { %v582_v3 = vmul.f32 %v871_v1, %v581_v0 }
 0x143   : > { %v584_v4 = vadd.f32 %v583_v2, %v582_v3 }
 0x145   : > { %585 = vst [vmem:[#allocation2] sm:$0x3] %v584_v4  ;;  %586 = vst [vmem:[%s983_s21] sm:$0x3] %v584_v4 }
 0x146 PF: > { %s13_s16 = sadd.s32 1, %s910_s16   ;;  %s1037_s12 = smov %s902_s14 }
 0x147   : > { %p10_p9 = scmp.ge.s32.totalorder %s13_s16, 8   ;;  %s1038_s13 = smov %s906_s15 }
 0x148   : > { %s1039_s14 = smov %s1042_s17  ;;  %s1040_s15 = smov %s1046_s18 }
 0x149   :  { %12 = sbr.rel (!%p10_p9) target bundleno = 3 (0x3), region = 72 }

// kernel: siamese_forward.49
= control target key start
LH: loop header
LB: loop body
LE: loop exit
PB: predicated region body
PF: predicated region fallthrough
CT: control target
= control target key end

     0   :  { %v58_v36 = vlaneseq  ;;  %vm285_vm0 = vcmask 1045504   ;;  %v587_v59 = vmov 0.0   ;;  %vm304_vm1 = vcmask 48128   ;;  %s745_s2 = inlined_call_operand.vmem [shape: bf16[256,256], index: 2, kind: input, shape index: {}]   ;;  %s746_s0 = inlined_call_operand.vmem [shape: f32[6,256], index: 0, kind: input, shape index: {}]   ;;  %s747_s3 = inlined_call_operand.vmem [shape: f32[1,256], index: 3, kind: input, shape index: {}]   ;;  %s748_s4 = inlined_call_operand.vmem [shape: f32[1,256], index: 4, kind: input, shape index: {}]   ;;  %s749_s1 = inlined_call_operand.vmem [shape: f32[2,6], index: 1, kind: input, shape index: {}]   ;;  %s750_s5 = inlined_call_operand.vmem [shape: f32[2,256], index: 5, kind: output, shape index: {}]  }
   0x1   :  { %v531_v0 = vld [vmem:[%s745_s2 + $0x4] ss:$8 sps:$4 sm:$0xff]   ;;  %v533_v1 = vld [vmem:[%s745_s2] ss:$8 sps:$4 sm:$0xff]   ;;  %v534_v2 = vld [vmem:[%s745_s2 + $0x14] ss:$8 sps:$4 sm:$0xff]   ;;  %378 = vmatprep.mubr.f32.mxu1 %v587_v59 }
   0x2   :  { %228 = vmatprep.subr.bf16.mxu0 %v531_v0  ;;  %v536_v3 = vld [vmem:[%s745_s2 + $0x10] ss:$8 sps:$4 sm:$0xff]   ;;  %v537_v4 = vld [vmem:[%s745_s2 + $0x24] ss:$8 sps:$4 sm:$0xff]   ;;  %v539_v5 = vld [vmem:[%s745_s2 + $0x20] ss:$8 sps:$4 sm:$0xff]  }
   0x3   :  { %229 = vmatpush1.bf16.msra.mxu0 %v533_v1  ;;  %v540_v6 = vld [vmem:[%s745_s2 + $0x34] ss:$8 sps:$4 sm:$0xff]   ;;  %v542_v7 = vld [vmem:[%s745_s2 + $0x30] ss:$8 sps:$4 sm:$0xff]   ;;  %v543_v8 = vld [vmem:[%s745_s2 + $0x44] ss:$8 sps:$4 sm:$0xff]  }
   0x4   :  { %230 = vmatprep.subr.bf16.mxu0 %v534_v2  ;;  %v545_v9 = vld [vmem:[%s745_s2 + $0x40] ss:$8 sps:$4 sm:$0xff]   ;;  %v546_v10 = vld [vmem:[%s745_s2 + $0x54] ss:$8 sps:$4 sm:$0xff]   ;;  %v548_v11 = vld [vmem:[%s745_s2 + $0x50] ss:$8 sps:$4 sm:$0xff]  }
   0x5   :  { %v549_v12 = vld [vmem:[%s745_s2 + $0x64] ss:$8 sps:$4 sm:$0xff]   ;;  %v551_v15 = vld [vmem:[%s745_s2 + $0x60] ss:$8 sps:$4 sm:$0xff]   ;;  %v552_v16 = vld [vmem:[%s745_s2 + $0x74] ss:$8 sps:$4 sm:$0xff]  }
   0x6   :  { %v662_v13 = vld [vmem:[%s746_s0 + $0x8] sm:$0x3f]  ;;  %v554_v17 = vld [vmem:[%s745_s2 + $0x70] ss:$8 sps:$4 sm:$0xff]   ;;  %v558_v20 = vld [vmem:[%s745_s2 + $0x94] ss:$8 sps:$4 sm:$0xff]  }
   0x7   :  { %231 = vmatpush1.bf16.msra.mxu0 %v536_v3  ;;  %v23_v14 = vpack.c.bf16 %v662_v13, %v662_v13  ;;  %v555_v18 = vld [vmem:[%s745_s2 + $0x84] ss:$8 sps:$4 sm:$0xff]   ;;  %v557_v19 = vld [vmem:[%s745_s2 + $0x80] ss:$8 sps:$4 sm:$0xff]   ;;  %v560_v21 = vld [vmem:[%s745_s2 + $0x90] ss:$8 sps:$4 sm:$0xff]  }
   0x8   :  { %232 = vmatprep.subr.bf16.mxu0 %v537_v4  ;;  %v561_v22 = vld [vmem:[%s745_s2 + $0xa4] ss:$8 sps:$4 sm:$0xff]   ;;  %v563_v23 = vld [vmem:[%s745_s2 + $0xa0] ss:$8 sps:$4 sm:$0xff]   ;;  %v564_v24 = vld [vmem:[%s745_s2 + $0xb4] ss:$8 sps:$4 sm:$0xff]  }
   0x9   :  { %260 = vmatprep.mubr.bf16.mxu0 %v23_v14  ;;  %v566_v25 = vld [vmem:[%s745_s2 + $0xb0] ss:$8 sps:$4 sm:$0xff]   ;;  %v567_v26 = vld [vmem:[%s745_s2 + $0xc4] ss:$8 sps:$4 sm:$0xff]   ;;  %v569_v27 = vld [vmem:[%s745_s2 + $0xc0] ss:$8 sps:$4 sm:$0xff]  }
   0xa   :  { %v570_v28 = vld [vmem:[%s745_s2 + $0xd4] ss:$8 sps:$4 sm:$0xff]   ;;  %v572_v29 = vld [vmem:[%s745_s2 + $0xd0] ss:$8 sps:$4 sm:$0xff]   ;;  %v573_v30 = vld [vmem:[%s745_s2 + $0xe4] ss:$8 sps:$4 sm:$0xff]  }
   0xb   :  { %233 = vmatpush1.bf16.msra.mxu0 %v539_v5  ;;  %v575_v31 = vld [vmem:[%s745_s2 + $0xe0] ss:$8 sps:$4 sm:$0xff]   ;;  %v576_v32 = vld [vmem:[%s745_s2 + $0xf4] ss:$8 sps:$4 sm:$0xff]   ;;  %v578_v33 = vld [vmem:[%s745_s2 + $0xf0] ss:$8 sps:$4 sm:$0xff]  }
   0xc   :  { %234 = vmatprep.subr.bf16.mxu0 %v540_v6  ;;  %v20_v34 = vld [vmem:[%s746_s0] sm:$0x3f]  ;;  %v59_v37 = vshrl.u32 %v58_v36, 7  ;;  %vm588_vm2 = vmmov 0  }
   0xd   :  { %v22_v35 = vpack.c.bf16 %v20_v34, %v20_v34  ;;  %v56_v39 = vld [vmem:[%s747_s3] sm:$0x3] }
   0xe   :  { %v60_v38 = vsub.s32 0, %v59_v37  ;;  %v64_v40 = vsub.s32 1, %v59_v37  ;;  %v271_v49 = vld [vmem:[%s748_s4] sm:$0x3] }
   0xf   :  { %235 = vmatpush1.bf16.msra.mxu0 %v542_v7 }
  0x10   :  { %236 = vmatprep.subr.bf16.mxu0 %v543_v8  ;;  %v61_v41 = vrot.slane %v56_v39, %v60_v38  ;;  %v65_v42 = vrot.slane %v56_v39, %v64_v40  ;;  %v276_v50 = vrot.slane %v271_v49, %v60_v38  ;;  %v280_v51 = vrot.slane %v271_v49, %v64_v40 }
  0x13   :  { %237 = vmatpush1.bf16.msra.mxu0 %v545_v9  ;;  %v301_v9 = vld [vmem:[%s749_s1] sm:$0x3] }
  0x14   :  { %238 = vmatprep.subr.bf16.mxu0 %v546_v10  ;;  %v589_v10 = vmov 0  }
  0x15   :  { %530 = vset.pattern.permute.xlu0 %v589_v10 }
  0x17   :  { %239 = vmatpush1.bf16.msra.mxu0 %v548_v11 }
  0x18   :  { %240 = vmatprep.subr.bf16.mxu0 %v549_v12 }
  0x1b   :  { %241 = vmatpush1.bf16.msra.mxu0 %v551_v15 }
  0x1c   :  { %242 = vmatprep.subr.bf16.mxu0 %v552_v16 }
  0x1f   :  { %243 = vmatpush1.bf16.msra.mxu0 %v554_v17 }
  0x20   :  { %244 = vmatprep.subr.bf16.mxu0 %v555_v18 }
  0x23   :  { %245 = vmatpush1.bf16.msra.mxu0 %v557_v19 }
  0x24   :  { %246 = vmatprep.subr.bf16.mxu0 %v558_v20 }
  0x27   :  { %247 = vmatpush1.bf16.msra.mxu0 %v560_v21 }
  0x28   :  { %248 = vmatprep.subr.bf16.mxu0 %v561_v22 }
  0x2b   :  { %249 = vmatpush1.bf16.msra.mxu0 %v563_v23 }
  0x2c   :  { %250 = vmatprep.subr.bf16.mxu0 %v564_v24 }
  0x2f   :  { %251 = vmatpush1.bf16.msra.mxu0 %v566_v25 }
  0x30   :  { %252 = vmatprep.subr.bf16.mxu0 %v567_v26 }
  0x33   :  { %253 = vmatpush1.bf16.msra.mxu0 %v569_v27 }
  0x34   :  { %254 = vmatprep.subr.bf16.mxu0 %v570_v28 }
  0x37   :  { %255 = vmatpush1.bf16.msra.mxu0 %v572_v29 }
  0x38   :  { %256 = vmatprep.subr.bf16.mxu0 %v573_v30 }
  0x3b   :  { %257 = vmatpush1.bf16.msra.mxu0 %v575_v31 }
  0x3c   :  { %258 = vmatprep.subr.bf16.mxu0 %v576_v32 }
  0x3f   :  { %259 = vmatpush1.bf16.msra.mxu0 %v578_v33 }
  0x42   :  { %261 = vmatmul.mubr.bf16.vlgmr.msra.gmra.mrb[0].mxu0 %v22_v35 }
 0x115   :  { %v262_v43 = vpop.f32.mrb[0].mxu0 }
 0x116   :  { %v263_v44 = vadd.f32 %v262_v43, %v61_v41  ;;  %v264_v45 = vpop.f32.mrb[1].mxu0 }
 0x117   :  { %v265_v46 = vadd.f32 %v264_v45, %v65_v42  ;;  %v266_v47 = vpop.f32.mrb[2].mxu0 }
 0x118   :  { %579 = vtanh.f32 %v263_v44  ;;  %v267_v48 = vpop.f32.mrb[3].mxu0 }
 0x119   :  { %581 = vtanh.f32 %v265_v46 }
 0x122   :  { %v580_v52 = vpop.eup %579 }
 0x123   :  { %v582_v53 = vpop.eup %581  ;;  %v283_v54 = vmul.f32 %v580_v52, %v276_v50 }
 0x124   :  { %v284_v55 = vmul.f32 %v582_v53, %v280_v51 }
 0x125   :  { %v286_v56 = vsel %vm285_vm0, %v283_v54, 0.0 }
 0x126   :  { %v287_v57 = vsel %vm285_vm0, %v284_v55, 0.0 }
 0x127   :  { %v288_v58 = vadd.f32 %v287_v57, %v286_v56 }
 0x129   :  { %289 = vadd.xlane.f32.xlu0 %v288_v58 }
 0x1b6   :  { %v290_v60 = vpop.xlane.xlu0 %289 }
 0x1b7   :  { %v291_v61 = vsel %vm285_vm0, %v290_v60, -inf }
 0x1b8   :  { %v292_v62 = vrot.slane %v291_v61, 4 }
 0x1ba   :  { %v293_v63 = vmax.f32 %v291_v61, %v292_v62 }
 0x1bc   :  { %v294_v0 = vrot.slane %v293_v63, 2 }
 0x1be   :  { %v295_v1 = vmax.f32 %v293_v63, %v294_v0 }
 0x1c0   :  { %v296_v2 = vrot.slane %v295_v1, 1 }
 0x1c2   :  { %v297_v3 = vmax.f32 %v295_v1, %v296_v2 }
 0x1c4   :  { %v298_v4 = vsub.f32 %v290_v60, %v297_v3 }
 0x1c6   :  { %v299_v5 = vmul.f32 1.442695, %v298_v4 }
 0x1c8   :  { %583 = vpow2.f32 %v299_v5 }
 0x1d2   :  { %v584_v6 = vpop.eup %583 }
 0x1d3   :  { %v303_v7 = vmul.f32 %v584_v6, %v662_v13  ;;  %v302_v8 = vmul.f32 %v584_v6, %v20_v34 }
 0x1d5   :  { %514 = vmatprep.subr.msk.mxu1 %vm285_vm0, %v303_v7 }
 0x1d6   :  { %515 = vmatpush1.msk.msra.mxu1 %vm285_vm0, %v302_v8 }
 0x1d7   :  { %516 = vmatmul.mubr.msk.f32.vlgmr.msra.gmra.mrb[0].mxu1 %vm304_vm1, %v301_v9  ;;  %522 = vmatprep.subr.mxu1 %v587_v59 }
 0x1d8   :  { %523 = vmatpush3.msk.msra.mxu1 %vm285_vm0, %v584_v6  ;;  %524 = vmatprep.mubr.msk.f32.mxu1 %vm588_vm2, %v587_v59 }
 0x1db   :  { %525 = vmatmul.mubr.msk.f32.vlgmr.msra.gmra.mrb[2].mxu1 %vm304_vm1, %v301_v9 }
 0x2aa   :  { %v380_v11 = vpop.f32.mrb[0].mxu1 }
 0x2ab   :  { %v382_v12 = vpop.f32.mrb[1].mxu1 }
 0x2ae   :  { %v454_v13 = vpop.f32.mrb[2].mxu1 }
 0x2af   :  { %460 = vperm.xlu0 %530, %v454_v13   ;;  %v526_v14 = vpop.f32.mrb[3].mxu1 }
 0x32e   :  { %v461_v15 = vpop.permute.xlu0 %460 }
 0x32f   :  { %585 = vrcp.f32 %v461_v15 }
 0x339   :  { %v586_v16 = vpop.eup %585 }
 0x33a   :  { %v464_v17 = vmul.f32 %v586_v16, %v380_v11  ;;  %v465_v18 = vmul.f32 %v586_v16, %v382_v12 }
 0x33c   :  { %v468_v19 = vcombine.low %v464_v17, %v465_v18 }
 0x33e   :  { %519 = vst.sshfl [vmem:[%s750_s5] sm:$0x33 pattern:$0x76325410] %v468_v19 }

// kernel: siamese_forward.50
= control target key start
LH: loop header
LB: loop body
LE: loop exit
PB: predicated region body
PF: predicated region fallthrough
CT: control target
= control target key end

     0   :  { %s1367_s1 = inlined_call_operand.vmem [shape: bf16[256,768], index: 1, kind: input, shape index: {}]   ;;  %s1368_s0 = inlined_call_operand.vmem [shape: f32[2,256], index: 0, kind: input, shape index: {}]   ;;  %s1369_s2 = inlined_call_operand.vmem [shape: f32[1,768], index: 2, kind: input, shape index: {}]   ;;  %s1370_s3 = inlined_call_operand.vmem [shape: f32[2,768], index: 3, kind: output, shape index: {}]  }
   0x1   :  { %v897_v0 = vld [vmem:[%s1367_s1 + $0x4] ss:$24 sps:$4 sm:$0xff]   ;;  %v901_v2 = vld [vmem:[%s1367_s1] ss:$24 sps:$4 sm:$0xff]   ;;  %v903_v4 = vld [vmem:[%s1367_s1 + $0x34] ss:$24 sps:$4 sm:$0xff]  }
   0x2   :  { %v899_v1 = vld [vmem:[%s1367_s1 + $0xc] ss:$24 sps:$4 sm:$0xff]   ;;  %636 = vmatprep.subr.bf16.mxu0 %v897_v0  ;;  %v902_v3 = vld [vmem:[%s1367_s1 + $0x8] ss:$24 sps:$4 sm:$0xff]   ;;  %v905_v5 = vld [vmem:[%s1367_s1 + $0x3c] ss:$24 sps:$4 sm:$0xff]  }
   0x3   :  { %677 = vmatprep.subr.bf16.mxu1 %v899_v1  ;;  %637 = vmatpush1.bf16.msra.mxu0 %v901_v2  ;;  %v907_v6 = vld [vmem:[%s1367_s1 + $0x30] ss:$24 sps:$4 sm:$0xff]   ;;  %v909_v8 = vld [vmem:[%s1367_s1 + $0x64] ss:$24 sps:$4 sm:$0xff]   ;;  %v913_v10 = vld [vmem:[%s1367_s1 + $0x60] ss:$24 sps:$4 sm:$0xff]  }
   0x4   :  { %678 = vmatpush1.bf16.msra.mxu1 %v902_v3  ;;  %638 = vmatprep.subr.bf16.mxu0 %v903_v4  ;;  %v908_v7 = vld [vmem:[%s1367_s1 + $0x38] ss:$24 sps:$4 sm:$0xff]   ;;  %v911_v9 = vld [vmem:[%s1367_s1 + $0x6c] ss:$24 sps:$4 sm:$0xff]   ;;  %v914_v11 = vld [vmem:[%s1367_s1 + $0x68] ss:$24 sps:$4 sm:$0xff]  }
   0x5   :  { %679 = vmatprep.subr.bf16.mxu1 %v905_v5  ;;  %v915_v12 = vld [vmem:[%s1367_s1 + $0x94] ss:$24 sps:$4 sm:$0xff]   ;;  %v919_v14 = vld [vmem:[%s1367_s1 + $0x90] ss:$24 sps:$4 sm:$0xff]   ;;  %v921_v16 = vld [vmem:[%s1367_s1 + $0xc4] ss:$24 sps:$4 sm:$0xff]  }
   0x6   :  { %v917_v13 = vld [vmem:[%s1367_s1 + $0x9c] ss:$24 sps:$4 sm:$0xff]   ;;  %v920_v15 = vld [vmem:[%s1367_s1 + $0x98] ss:$24 sps:$4 sm:$0xff]   ;;  %v923_v17 = vld [vmem:[%s1367_s1 + $0xcc] ss:$24 sps:$4 sm:$0xff]  }
   0x7   :  { %639 = vmatpush1.bf16.msra.mxu0 %v907_v6  ;;  %v925_v18 = vld [vmem:[%s1367_s1 + $0xc0] ss:$24 sps:$4 sm:$0xff]   ;;  %v927_v20 = vld [vmem:[%s1367_s1 + $0xf4] ss:$24 sps:$4 sm:$0xff]   ;;  %v931_v22 = vld [vmem:[%s1367_s1 + $0xf0] ss:$24 sps:$4 sm:$0xff]  }
   0x8   :  { %680 = vmatpush1.bf16.msra.mxu1 %v908_v7  ;;  %640 = vmatprep.subr.bf16.mxu0 %v909_v8  ;;  %v926_v19 = vld [vmem:[%s1367_s1 + $0xc8] ss:$24 sps:$4 sm:$0xff]   ;;  %v929_v21 = vld [vmem:[%s1367_s1 + $0xfc] ss:$24 sps:$4 sm:$0xff]   ;;  %v932_v23 = vld [vmem:[%s1367_s1 + $0xf8] ss:$24 sps:$4 sm:$0xff]  }
   0x9   :  { %681 = vmatprep.subr.bf16.mxu1 %v911_v9  ;;  %v933_v24 = vld [vmem:[%s1367_s1 + $0x124] ss:$24 sps:$4 sm:$0xff]   ;;  %v937_v26 = vld [vmem:[%s1367_s1 + $0x120] ss:$24 sps:$4 sm:$0xff]   ;;  %v939_v28 = vld [vmem:[%s1367_s1 + $0x154] ss:$24 sps:$4 sm:$0xff]  }
   0xa   :  { %v935_v25 = vld [vmem:[%s1367_s1 + $0x12c] ss:$24 sps:$4 sm:$0xff]   ;;  %v938_v27 = vld [vmem:[%s1367_s1 + $0x128] ss:$24 sps:$4 sm:$0xff]   ;;  %v941_v29 = vld [vmem:[%s1367_s1 + $0x15c] ss:$24 sps:$4 sm:$0xff]  }
   0xb   :  { %641 = vmatpush1.bf16.msra.mxu0 %v913_v10  ;;  %v943_v30 = vld [vmem:[%s1367_s1 + $0x150] ss:$24 sps:$4 sm:$0xff]   ;;  %v945_v32 = vld [vmem:[%s1367_s1 + $0x184] ss:$24 sps:$4 sm:$0xff]   ;;  %v949_v34 = vld [vmem:[%s1367_s1 + $0x180] ss:$24 sps:$4 sm:$0xff]  }
   0xc   :  { %682 = vmatpush1.bf16.msra.mxu1 %v914_v11  ;;  %642 = vmatprep.subr.bf16.mxu0 %v915_v12  ;;  %v944_v31 = vld [vmem:[%s1367_s1 + $0x158] ss:$24 sps:$4 sm:$0xff]   ;;  %v947_v33 = vld [vmem:[%s1367_s1 + $0x18c] ss:$24 sps:$4 sm:$0xff]   ;;  %v950_v35 = vld [vmem:[%s1367_s1 + $0x188] ss:$24 sps:$4 sm:$0xff]  }
   0xd   :  { %683 = vmatprep.subr.bf16.mxu1 %v917_v13  ;;  %v951_v36 = vld [vmem:[%s1367_s1 + $0x1b4] ss:$24 sps:$4 sm:$0xff]   ;;  %v955_v38 = vld [vmem:[%s1367_s1 + $0x1b0] ss:$24 sps:$4 sm:$0xff]   ;;  %v957_v40 = vld [vmem:[%s1367_s1 + $0x1e4] ss:$24 sps:$4 sm:$0xff]  }
   0xe   :  { %v953_v37 = vld [vmem:[%s1367_s1 + $0x1bc] ss:$24 sps:$4 sm:$0xff]   ;;  %v956_v39 = vld [vmem:[%s1367_s1 + $0x1b8] ss:$24 sps:$4 sm:$0xff]   ;;  %v959_v41 = vld [vmem:[%s1367_s1 + $0x1ec] ss:$24 sps:$4 sm:$0xff]  }
   0xf   :  { %643 = vmatpush1.bf16.msra.mxu0 %v919_v14  ;;  %v961_v42 = vld [vmem:[%s1367_s1 + $0x1e0] ss:$24 sps:$4 sm:$0xff]   ;;  %v963_v44 = vld [vmem:[%s1367_s1 + $0x214] ss:$24 sps:$4 sm:$0xff]   ;;  %v967_v47 = vld [vmem:[%s1367_s1 + $0x210] ss:$24 sps:$4 sm:$0xff]  }
  0x10   :  { %684 = vmatpush1.bf16.msra.mxu1 %v920_v15  ;;  %644 = vmatprep.subr.bf16.mxu0 %v921_v16  ;;  %v962_v43 = vld [vmem:[%s1367_s1 + $0x1e8] ss:$24 sps:$4 sm:$0xff]   ;;  %v965_v45 = vld [vmem:[%s1367_s1 + $0x21c] ss:$24 sps:$4 sm:$0xff]   ;;  %v968_v48 = vld [vmem:[%s1367_s1 + $0x218] ss:$24 sps:$4 sm:$0xff]  }
  0x11   :  { %685 = vmatprep.subr.bf16.mxu1 %v923_v17  ;;  %v798_v46 = vld.sshfl [vmem:[%s1368_s0] sm:$0x33 pattern:$0x76325410]  ;;  %v969_v50 = vld [vmem:[%s1367_s1 + $0x244] ss:$24 sps:$4 sm:$0xff]  }
  0x12   :  { %v23_v49 = vcombine.high %v798_v46, %v798_v46  ;;  %v971_v51 = vld [vmem:[%s1367_s1 + $0x24c] ss:$24 sps:$4 sm:$0xff]   ;;  %v973_v53 = vld [vmem:[%s1367_s1 + $0x240] ss:$24 sps:$4 sm:$0xff]   ;;  %v977_v56 = vld [vmem:[%s1367_s1 + $0x27c] ss:$24 sps:$4 sm:$0xff]   ;;  %v1260_v4 = vpack.c.bf16 %v798_v46, %v798_v46 }
  0x13   :  { %645 = vmatpush1.bf16.msra.mxu0 %v925_v18  ;;  %v974_v54 = vld [vmem:[%s1367_s1 + $0x248] ss:$24 sps:$4 sm:$0xff]   ;;  %v975_v55 = vld [vmem:[%s1367_s1 + $0x274] ss:$24 sps:$4 sm:$0xff]   ;;  %v980_v58 = vld [vmem:[%s1367_s1 + $0x278] ss:$24 sps:$4 sm:$0xff]  }
  0x14   :  { %686 = vmatpush1.bf16.msra.mxu1 %v926_v19  ;;  %646 = vmatprep.subr.bf16.mxu0 %v927_v20  ;;  %v27_v52 = vpack.c.bf16 %v23_v49, %v23_v49  ;;  %v979_v57 = vld [vmem:[%s1367_s1 + $0x270] ss:$24 sps:$4 sm:$0xff]   ;;  %v981_v59 = vld [vmem:[%s1367_s1 + $0x2a4] ss:$24 sps:$4 sm:$0xff]   ;;  %v985_v61 = vld [vmem:[%s1367_s1 + $0x2a0] ss:$24 sps:$4 sm:$0xff]  }
  0x15   :  { %687 = vmatprep.subr.bf16.mxu1 %v929_v21  ;;  %v983_v60 = vld [vmem:[%s1367_s1 + $0x2ac] ss:$24 sps:$4 sm:$0xff]   ;;  %v986_v62 = vld [vmem:[%s1367_s1 + $0x2a8] ss:$24 sps:$4 sm:$0xff]   ;;  %v989_v0 = vld [vmem:[%s1367_s1 + $0x2dc] ss:$24 sps:$4 sm:$0xff]  }
  0x16   :  { %668 = vmatprep.mubr.bf16.mxu0 %v27_v52  ;;  %709 = vmatprep.mubr.bf16.mxu1 %v27_v52  ;;  %v987_v63 = vld [vmem:[%s1367_s1 + $0x2d4] ss:$24 sps:$4 sm:$0xff]   ;;  %v991_v1 = vld [vmem:[%s1367_s1 + $0x2d0] ss:$24 sps:$4 sm:$0xff]   ;;  %v998_v6 = vld [vmem:[%s1367_s1 + $0x44] ss:$24 sps:$4 sm:$0xff]  }
  0x17   :  { %647 = vmatpush1.bf16.msra.mxu0 %v931_v22  ;;  %v992_v2 = vld [vmem:[%s1367_s1 + $0x2d8] ss:$24 sps:$4 sm:$0xff]   ;;  %v995_v3 = vld [vmem:[%s1367_s1 + $0x14] ss:$24 sps:$4 sm:$0xff]   ;;  %v1004_v10 = vld [vmem:[%s1367_s1 + $0xa4] ss:$24 sps:$4 sm:$0xff]  }
  0x18   :  { %688 = vmatpush1.bf16.msra.mxu1 %v932_v23  ;;  %648 = vmatprep.subr.bf16.mxu0 %v933_v24  ;;  %v993_v5 = vld [vmem:[%s1367_s1 + $0x10] ss:$24 sps:$4 sm:$0xff]   ;;  %v996_v7 = vld [vmem:[%s1367_s1 + $0x40] ss:$24 sps:$4 sm:$0xff]   ;;  %v1001_v8 = vld [vmem:[%s1367_s1 + $0x74] ss:$24 sps:$4 sm:$0xff]  }
  0x19   :  { %689 = vmatprep.subr.bf16.mxu1 %v935_v25  ;;  %v999_v9 = vld [vmem:[%s1367_s1 + $0x70] ss:$24 sps:$4 sm:$0xff]   ;;  %v1002_v11 = vld [vmem:[%s1367_s1 + $0xa0] ss:$24 sps:$4 sm:$0xff]   ;;  %v1007_v12 = vld [vmem:[%s1367_s1 + $0xd4] ss:$24 sps:$4 sm:$0xff]  }
  0x1a   :  { %v1005_v13 = vld [vmem:[%s1367_s1 + $0xd0] ss:$24 sps:$4 sm:$0xff]   ;;  %v1010_v14 = vld [vmem:[%s1367_s1 + $0x104] ss:$24 sps:$4 sm:$0xff]   ;;  %v1008_v15 = vld [vmem:[%s1367_s1 + $0x100] ss:$24 sps:$4 sm:$0xff]  }
  0x1b   :  { %649 = vmatpush1.bf16.msra.mxu0 %v937_v26  ;;  %v1013_v16 = vld [vmem:[%s1367_s1 + $0x134] ss:$24 sps:$4 sm:$0xff]   ;;  %v1011_v17 = vld [vmem:[%s1367_s1 + $0x130] ss:$24 sps:$4 sm:$0xff]   ;;  %v1016_v18 = vld [vmem:[%s1367_s1 + $0x164] ss:$24 sps:$4 sm:$0xff]  }
  0x1c   :  { %690 = vmatpush1.bf16.msra.mxu1 %v938_v27  ;;  %650 = vmatprep.subr.bf16.mxu0 %v939_v28  ;;  %v1014_v19 = vld [vmem:[%s1367_s1 + $0x160] ss:$24 sps:$4 sm:$0xff]   ;;  %v1019_v20 = vld [vmem:[%s1367_s1 + $0x194] ss:$24 sps:$4 sm:$0xff]   ;;  %v1017_v21 = vld [vmem:[%s1367_s1 + $0x190] ss:$24 sps:$4 sm:$0xff]  }
  0x1d   :  { %691 = vmatprep.subr.bf16.mxu1 %v941_v29  ;;  %v1022_v22 = vld [vmem:[%s1367_s1 + $0x1c4] ss:$24 sps:$4 sm:$0xff]   ;;  %v1020_v23 = vld [vmem:[%s1367_s1 + $0x1c0] ss:$24 sps:$4 sm:$0xff]   ;;  %v1025_v24 = vld [vmem:[%s1367_s1 + $0x1f4] ss:$24 sps:$4 sm:$0xff]  }
  0x1e   :  { %v1023_v25 = vld [vmem:[%s1367_s1 + $0x1f0] ss:$24 sps:$4 sm:$0xff]   ;;  %v1028_v26 = vld [vmem:[%s1367_s1 + $0x224] ss:$24 sps:$4 sm:$0xff]   ;;  %v1026_v27 = vld [vmem:[%s1367_s1 + $0x220] ss:$24 sps:$4 sm:$0xff]  }
  0x1f   :  { %651 = vmatpush1.bf16.msra.mxu0 %v943_v30  ;;  %v1031_v28 = vld [vmem:[%s1367_s1 + $0x254] ss:$24 sps:$4 sm:$0xff]   ;;  %v1029_v29 = vld [vmem:[%s1367_s1 + $0x250] ss:$24 sps:$4 sm:$0xff]   ;;  %v1034_v30 = vld [vmem:[%s1367_s1 + $0x284] ss:$24 sps:$4 sm:$0xff]  }
  0x20   :  { %692 = vmatpush1.bf16.msra.mxu1 %v944_v31  ;;  %652 = vmatprep.subr.bf16.mxu0 %v945_v32  ;;  %v1032_v31 = vld [vmem:[%s1367_s1 + $0x280] ss:$24 sps:$4 sm:$0xff]   ;;  %v1037_v32 = vld [vmem:[%s1367_s1 + $0x2b4] ss:$24 sps:$4 sm:$0xff]   ;;  %v1041_v46 = vmov 1983009808  }
  0x21   :  { %693 = vmatprep.subr.bf16.mxu1 %v947_v33  ;;  %v1035_v33 = vld [vmem:[%s1367_s1 + $0x2b0] ss:$24 sps:$4 sm:$0xff]  }
  0x23   :  { %653 = vmatpush1.bf16.msra.mxu0 %v949_v34  ;;  %v1040_v34 = vld [vmem:[%s1367_s1 + $0x2e4] ss:$24 sps:$4 sm:$0xff]  }
  0x24   :  { %694 = vmatpush1.bf16.msra.mxu1 %v950_v35  ;;  %654 = vmatprep.subr.bf16.mxu0 %v951_v36  ;;  %v1038_v35 = vld [vmem:[%s1367_s1 + $0x2e0] ss:$24 sps:$4 sm:$0xff]   ;;  %v126_v36 = vlaneseq }
  0x25   :  { %695 = vmatprep.subr.bf16.mxu1 %v953_v37 }
  0x26   :  { %v127_v37 = vshrl.u32 %v126_v36, 7 }
  0x27   :  { %655 = vmatpush1.bf16.msra.mxu0 %v955_v38 }
  0x28   :  { %696 = vmatpush1.bf16.msra.mxu1 %v956_v39  ;;  %656 = vmatprep.subr.bf16.mxu0 %v957_v40  ;;  %v144_v38 = vsub.s32 4, %v127_v37  ;;  %v124_v39 = vld [vmem:[%s1369_s2] sm:$0x3f] }
  0x29   :  { %697 = vmatprep.subr.bf16.mxu1 %v959_v41  ;;  %v148_v41 = vsub.s32 5, %v127_v37 }
  0x2a   :  { %v145_v40 = vrot.slane %v124_v39, %v144_v38 }
  0x2b   :  { %657 = vmatpush1.bf16.msra.mxu0 %v961_v42  ;;  %v149_v42 = vrot.slane %v124_v39, %v148_v41 }
  0x2c   :  { %698 = vmatpush1.bf16.msra.mxu1 %v962_v43  ;;  %658 = vmatprep.subr.bf16.mxu0 %v963_v44  ;;  %v128_v43 = vsub.s32 0, %v127_v37  ;;  %v136_v44 = vsub.s32 2, %v127_v37 }
  0x2d   :  { %699 = vmatprep.subr.bf16.mxu1 %v965_v45  ;;  %v132_v45 = vsub.s32 1, %v127_v37 }
  0x2e   :  { %v129_v49 = vrot.slane %v124_v39, %v128_v43 }
  0x2f   :  { %659 = vmatpush1.bf16.msra.mxu0 %v967_v47  ;;  %v768_v47 = vunpack.c.l.s4 %v1041_v46 }
  0x30   :  { %700 = vmatpush1.bf16.msra.mxu1 %v968_v48  ;;  %660 = vmatprep.subr.bf16.mxu0 %v969_v50  ;;  %v140_v48 = vsub.s32 3, %v127_v37  ;;  %v137_v50 = vrot.slane %v124_v39, %v136_v44 }
  0x31   :  { %701 = vmatprep.subr.bf16.mxu1 %v971_v51  ;;  %v133_v51 = vrot.slane %v124_v39, %v132_v45 }
  0x33   :  { %661 = vmatpush1.bf16.msra.mxu0 %v973_v53  ;;  %v141_v53 = vrot.slane %v124_v39, %v140_v48 }
  0x34   :  { %702 = vmatpush1.bf16.msra.mxu1 %v974_v54  ;;  %662 = vmatprep.subr.bf16.mxu0 %v975_v55 }
  0x35   :  { %703 = vmatprep.subr.bf16.mxu1 %v977_v56 }
  0x37   :  { %663 = vmatpush1.bf16.msra.mxu0 %v979_v57 }
  0x38   :  { %704 = vmatpush1.bf16.msra.mxu1 %v980_v58  ;;  %664 = vmatprep.subr.bf16.mxu0 %v981_v59 }
  0x39   :  { %705 = vmatprep.subr.bf16.mxu1 %v983_v60 }
  0x3b   :  { %665 = vmatpush1.bf16.msra.mxu0 %v985_v61 }
  0x3c   :  { %706 = vmatpush1.bf16.msra.mxu1 %v986_v62  ;;  %666 = vmatprep.subr.bf16.mxu0 %v987_v63 }
  0x3d   :  { %707 = vmatprep.subr.bf16.mxu1 %v989_v0 }
  0x3f   :  { %667 = vmatpush1.bf16.msra.mxu0 %v991_v1 }
  0x40   :  { %708 = vmatpush1.bf16.msra.mxu1 %v992_v2  ;;  %718 = vmatprep.subr.bf16.mxu0 %v995_v3 }
  0x42   :  { %669 = vmatmul.mubr.bf16.vlgmr.msra.gmra.mrb[0].mxu0 %v1260_v4 }
  0x43   :  { %710 = vmatmul.mubr.bf16.vlgmr.msra.gmra.mrb[0].mxu1 %v1260_v4  ;;  %719 = vmatpush1.bf16.msra.mxu0 %v993_v5 }
  0x44   :  { %750 = vmatprep.mubr.bf16.mxu0 %v27_v52  ;;  %720 = vmatprep.subr.bf16.mxu0 %v998_v6  ;;  %v769_v52 = vunpack.c.0.s8 %v768_v47 }
  0x46   :  { %v772_v61 = vsub.s32 %v769_v52, %v127_v37 }
  0x47   :  { %721 = vmatpush1.bf16.msra.mxu0 %v996_v7 }
  0x48   :  { %722 = vmatprep.subr.bf16.mxu0 %v1001_v8 }
  0x4b   :  { %723 = vmatpush1.bf16.msra.mxu0 %v999_v9 }
  0x4c   :  { %724 = vmatprep.subr.bf16.mxu0 %v1004_v10 }
  0x4f   :  { %725 = vmatpush1.bf16.msra.mxu0 %v1002_v11 }
  0x50   :  { %726 = vmatprep.subr.bf16.mxu0 %v1007_v12 }
  0x53   :  { %727 = vmatpush1.bf16.msra.mxu0 %v1005_v13 }
  0x54   :  { %728 = vmatprep.subr.bf16.mxu0 %v1010_v14 }
  0x57   :  { %729 = vmatpush1.bf16.msra.mxu0 %v1008_v15 }
  0x58   :  { %730 = vmatprep.subr.bf16.mxu0 %v1013_v16 }
  0x5b   :  { %731 = vmatpush1.bf16.msra.mxu0 %v1011_v17 }
  0x5c   :  { %732 = vmatprep.subr.bf16.mxu0 %v1016_v18 }
  0x5f   :  { %733 = vmatpush1.bf16.msra.mxu0 %v1014_v19 }
  0x60   :  { %734 = vmatprep.subr.bf16.mxu0 %v1019_v20 }
  0x63   :  { %735 = vmatpush1.bf16.msra.mxu0 %v1017_v21 }
  0x64   :  { %736 = vmatprep.subr.bf16.mxu0 %v1022_v22 }
  0x67   :  { %737 = vmatpush1.bf16.msra.mxu0 %v1020_v23 }
  0x68   :  { %738 = vmatprep.subr.bf16.mxu0 %v1025_v24 }
  0x6b   :  { %739 = vmatpush1.bf16.msra.mxu0 %v1023_v25 }
  0x6c   :  { %740 = vmatprep.subr.bf16.mxu0 %v1028_v26 }
  0x6f   :  { %741 = vmatpush1.bf16.msra.mxu0 %v1026_v27 }
  0x70   :  { %742 = vmatprep.subr.bf16.mxu0 %v1031_v28 }
  0x73   :  { %743 = vmatpush1.bf16.msra.mxu0 %v1029_v29 }
  0x74   :  { %744 = vmatprep.subr.bf16.mxu0 %v1034_v30 }
  0x77   :  { %745 = vmatpush1.bf16.msra.mxu0 %v1032_v31 }
  0x78   :  { %746 = vmatprep.subr.bf16.mxu0 %v1037_v32 }
  0x7b   :  { %747 = vmatpush1.bf16.msra.mxu0 %v1035_v33 }
  0x7c   :  { %748 = vmatprep.subr.bf16.mxu0 %v1040_v34 }
  0x7f   :  { %749 = vmatpush1.bf16.msra.mxu0 %v1038_v35 }
  0x82   :  { %751 = vmatmul.mubr.bf16.vlgmr.msra.gmra.mrb[4].mxu0 %v1260_v4 }
 0x115   :  { %v670_v54 = vpop.f32.mrb[0].mxu0 }
 0x116   :  { %v711_v55 = vpop.f32.mrb[0].mxu1  ;;  %v671_v56 = vadd.f32 %v670_v54, %v129_v49  ;;  %v672_v58 = vpop.f32.mrb[1].mxu0 }
 0x117   :  { %v712_v57 = vadd.f32 %v711_v55, %v137_v50  ;;  %v713_v59 = vpop.f32.mrb[1].mxu1  ;;  %v673_v60 = vadd.f32 %v672_v58, %v133_v51  ;;  %v674_v63 = vpop.f32.mrb[2].mxu0 }
 0x118   :  { %v714_v62 = vadd.f32 %v713_v59, %v141_v53  ;;  %v715_v0 = vpop.f32.mrb[2].mxu1  ;;  %v675_v1 = vpop.f32.mrb[3].mxu0 }
 0x119   :  { %v716_v2 = vpop.f32.mrb[3].mxu1  ;;  %v765_v3 = vcombine.low %v671_v56, %v673_v60 }
 0x11a   :  { %v766_v4 = vcombine.low %v712_v57, %v714_v62 }
 0x11b   :  { %v773_v5 = vrot.slane %v765_v3, %v772_v61 }
 0x11c   :  { %v780_v6 = vrot.slane %v766_v4, %v772_v61 }
 0x11e   :  { %v781_v7 = vcombine.low %v773_v5, %v780_v6 }
 0x120   :  { %792 = vst [vmem:[%s1370_s3] sm:$0xff] %v781_v7 }
 0x155   :  { %v752_v8 = vpop.f32.mrb[4].mxu0 }
 0x156   :  { %v753_v9 = vadd.f32 %v752_v8, %v145_v40  ;;  %v754_v10 = vpop.f32.mrb[5].mxu0 }
 0x157   :  { %v755_v11 = vadd.f32 %v754_v10, %v149_v42  ;;  %v756_v12 = vpop.f32.mrb[6].mxu0 }
 0x158   :  { %v757_v13 = vpop.f32.mrb[7].mxu0 }
 0x159   :  { %v782_v14 = vcombine.low %v753_v9, %v755_v11 }
 0x15b   :  { %895 = vst.sshfl [vmem:[%s1370_s3 + $0x8] sm:$0x33 pattern:$0x76325410] %v782_v14 }

// kernel: siamese_forward.51
= control target key start
LH: loop header
LB: loop body
LE: loop exit
PB: predicated region body
PF: predicated region fallthrough
CT: control target
= control target key end

     0   :  { %s920_s12 = smov 0   ;;  %s922_s13 = smov 0   ;;  %s1027_s0 = inlined_call_operand.vmem [shape: f32[2,1,768], index: 0, kind: input, shape index: {}]   ;;  %s1028_s1 = inlined_call_operand.vmem [shape: bf16[2,128,384], index: 1, kind: input, shape index: {}]   ;;  %s1029_s2 = inlined_call_operand.vmem [shape: f32[2,1,384], index: 2, kind: input, shape index: {}]   ;;  %s1030_s3 = inlined_call_operand.vmem [shape: f32[2,1,256], index: 3, kind: output, shape index: {}]  }
   0x1   :  { %s924_s14 = smov 0   ;;  %s926_s15 = smov 0  }
   0x2   :  { %s928_s16 = smov 0  }
   0x3 LB: > { %s22_s17 = sadd.s32 1, %s886_s14  ;;  %s25_s18 = sadd.s32 1, %s890_s15  ;;  %s894_s16 = sphi %s928_s16, %s13_s16   ;;  %s890_s15 = sphi %s926_s15, %s1034_s15   ;;  %s886_s14 = sphi %s924_s14, %s1033_s14   ;;  %s882_s13 = sphi %s922_s13, %s1032_s13   ;;  %s878_s12 = sphi %s920_s12, %s1031_s12  }
   0x4   : > { %p23_p0 = scmp.ge.s32.totalorder %s22_s17, 2  ;;  %p704_p1 = scmp.ge.s32.totalorder %s894_s16, 1 }
   0x5   : > { %p200_p2 = scmp.lt.s32.totalorder %s894_s16, 5 }
   0x6   : > { %s1036_s17 = smov (%p23_p0, %s22_s17), 0  ;;  %s1038_s18 = smov (!%p23_p0, %s25_s18), %s890_s15 }
   0x7   : > { %p201_p3 = pnand %p704_p1, %p200_p2  ;;  %p27_p4 = scmp.ge.s32.totalorder %s1038_s18, 2 }
   0x8   : > { %s705_s19 = sshll.u32 (!%p201_p3), %s878_s12, 1  ;;  %s250_s20 = smul.u32 (!%p201_p3), 3, %s882_s13 }
   0x9   : > { %s1040_s18 = smov (%p27_p4, %s1038_s18), 0  ;;  %204 = sbr.rel (%p201_p3) target bundleno = 325 (0x145), region = 32 }
   0xa   : > { %s247_s21 = ssub.s32 (!%p201_p3), 1, %s705_s19  ;;  %p263_p5 = scmp.lt.s32.totalorder (!%p201_p3), %s882_s13, 1 }
   0xb   : > { %s248_s22 = smul.u32 (!%p201_p3), %s882_s13, %s247_s21  ;;  %p253_p6 = scmp.lt.s32.totalorder (!%p201_p3), %s250_s20, 5 }
   0xc   : > { %p709_p8 = scmp.ne.s32.totalorder (!%p201_p3), %s878_s12, 0 }
   0xd   : > { %s249_s23 = sadd.s32 (!%p201_p3), %s878_s12, %s248_s22 }
   0xe   : > { %p251_p7 = scmp.lt.s32.totalorder (!%p201_p3), %s249_s23, 1 }
  0x10   : > { %s1042_s13 = smov (!%p263_p5, %s882_s13), 1  ;;  %s1044_s20 = smov (!%p253_p6, %s250_s20), 5 }
  0x11   : > { %s768_s24 = smul.u32 192, %s1042_s13  ;;  %s1046_s23 = smov (!%p251_p7, %s249_s23), 1  ;;  %v896_v0 = vmov (!%p709_p8), 0.0  }
  0x12   : > { %s769_s28 = smul.u32 3, %s1042_s13  ;;  %s708_s30 = sshll.u32 %s1046_s23, 1  ;;  %292 = vst [vmem:[#allocation2] sm:$0x1] (!%p709_p8), %v896_v0 }
  0x13   : > { %s957_s27 = scalar_lea.vmem %s1028_s1, %s768_s24  ;;  %s767_s29 = smul.u32 6, %s1046_s23 }
  0x14   : > { %s962_s6 = scalar_lea.vmem %s1029_s2, %s769_s28  ;;  %s964_s7 = sadd.s32 %s708_s30, %s1042_s13 }
  0x15   : > { %s966_s8 = sadd.s32 %s767_s29, %s1044_s20  ;;  %s282_s11 = scalar_lea.vmem %s1030_s3, %s964_s7 }
  0x16   : > { %s257_s22 = scalar_lea.vmem %s1027_s0, %s966_s8  ;;  %291 = sbr.rel (%p709_p8) target bundleno = 29 (0x1d), region = 36 }
  0x1d PF: > { %v814_v1 = vld [vmem:[%s957_s27 + $0x4] ss:$12 sps:$4 sm:$0xff]   ;;  %v816_v2 = vld [vmem:[%s957_s27] ss:$12 sps:$4 sm:$0xff]   ;;  %v897_v3 = vmov 0.0   ;;  %v898_v4 = vmov 0   ;;  %v458_v29 = vlaneseq }
  0x1e   : > { %747 = vmatprep.subr.bf16.mxu1 %v897_v3  ;;  %505 = vmatprep.mubr.bf16.mxu0 %v898_v4  ;;  %v817_v5 = vld [vmem:[%s957_s27 + $0x1c] ss:$12 sps:$4 sm:$0xff]   ;;  %vm899_vm0 = vmmov 0   ;;  %v819_v6 = vld [vmem:[%s957_s27 + $0x18] ss:$12 sps:$4 sm:$0xff]  }
  0x1f   : > { %473 = vmatprep.subr.bf16.mxu0 %v814_v1  ;;  %763 = vmatprep.mubr.msk.bf16.mxu1 %vm899_vm0, %v897_v3  ;;  %v820_v7 = vld [vmem:[%s957_s27 + $0x34] ss:$12 sps:$4 sm:$0xff]   ;;  %v822_v8 = vld [vmem:[%s957_s27 + $0x30] ss:$12 sps:$4 sm:$0xff]   ;;  %v823_v9 = vld [vmem:[%s957_s27 + $0x4c] ss:$12 sps:$4 sm:$0xff]  }
  0x20   : > { %474 = vmatpush1.bf16.msra.mxu0 %v816_v2  ;;  %v835_v10 = vld [vmem:[%s957_s27 + $0x8] ss:$12 sps:$4 sm:$0xff]   ;;  %v826_v12 = vld [vmem:[%s957_s27 + $0x64] ss:$12 sps:$4 sm:$0xff]   ;;  %v839_v13 = vld [vmem:[%s957_s27 + $0x20] ss:$12 sps:$4 sm:$0xff]  }
  0x21   : > { %475 = vmatprep.subr.bf16.mxu0 %v817_v5  ;;  %v825_v11 = vld [vmem:[%s957_s27 + $0x48] ss:$12 sps:$4 sm:$0xff]   ;;  %748 = vmatpush3.bf16.msra.mxu1 %v835_v10  ;;  %v828_v14 = vld [vmem:[%s957_s27 + $0x60] ss:$12 sps:$4 sm:$0xff]   ;;  %v840_v16 = vld [vmem:[%s957_s27 + $0x38] ss:$12 sps:$4 sm:$0xff]  }
  0x22   : > { %749 = vmatprep.subr.bf16.mxu1 %v897_v3  ;;  %v829_v15 = vld [vmem:[%s957_s27 + $0x7c] ss:$12 sps:$4 sm:$0xff]   ;;  %v831_v17 = vld [vmem:[%s957_s27 + $0x78] ss:$12 sps:$4 sm:$0xff]   ;;  %v832_v18 = vld [vmem:[%s957_s27 + $0x94] ss:$12 sps:$4 sm:$0xff]  }
  0x23   : > { %v841_v19 = vld [vmem:[%s957_s27 + $0x50] ss:$12 sps:$4 sm:$0xff]   ;;  %v836_v21 = vld [vmem:[%s957_s27 + $0xac] ss:$12 sps:$4 sm:$0xff]   ;;  %v842_v22 = vld [vmem:[%s957_s27 + $0x68] ss:$12 sps:$4 sm:$0xff]  }
  0x24   : > { %476 = vmatpush1.bf16.msra.mxu0 %v819_v6  ;;  %v834_v20 = vld [vmem:[%s957_s27 + $0x90] ss:$12 sps:$4 sm:$0xff]   ;;  %v838_v23 = vld [vmem:[%s957_s27 + $0xa8] ss:$12 sps:$4 sm:$0xff]   ;;  %v294_v24 = vld [vmem:[#allocation2] sm:$0x1] }
  0x25   : > { %477 = vmatprep.subr.bf16.mxu0 %v820_v7  ;;  %750 = vmatpush3.bf16.msra.mxu1 %v839_v13  ;;  %v843_v25 = vld [vmem:[%s957_s27 + $0x80] ss:$12 sps:$4 sm:$0xff]   ;;  %v295_v26 = vpack.c.bf16 %v294_v24, %v294_v24  ;;  %v844_v27 = vld [vmem:[%s957_s27 + $0x98] ss:$12 sps:$4 sm:$0xff]   ;;  %v845_v28 = vld [vmem:[%s957_s27 + $0xb0] ss:$12 sps:$4 sm:$0xff]  }
  0x26   : > { %751 = vmatprep.subr.bf16.mxu1 %v897_v3  ;;  %v459_v30 = vshrl.u32 %v458_v29, 7  ;;  %v328_v32 = vld [vmem:[%s962_s6] sm:$0x7] }
  0x27   : > { %v293_v36 = vld [vmem:[%s257_s22] sm:$0x7] }
  0x28   : > { %478 = vmatpush1.bf16.msra.mxu0 %v822_v8  ;;  %v460_v31 = vsub.s32 0, %v459_v30  ;;  %v464_v33 = vsub.s32 1, %v459_v30  ;;  %v562_v41 = vrot.slane %v293_v36, 1  ;;  %v468_v54 = vsub.s32 2, %v459_v30 }
  0x29   : > { %479 = vmatprep.subr.bf16.mxu0 %v823_v9  ;;  %752 = vmatpush3.bf16.msra.mxu1 %v840_v16  ;;  %v572_v59 = vrot.slane %v293_v36, 2 }
  0x2a   : > { %753 = vmatprep.subr.bf16.mxu1 %v897_v3  ;;  %v461_v34 = vrot.slane %v328_v32, %v460_v31  ;;  %v465_v35 = vrot.slane %v328_v32, %v464_v33  ;;  %v469_v55 = vrot.slane %v328_v32, %v468_v54 }
  0x2c   : > { %480 = vmatpush1.bf16.msra.mxu0 %v825_v11 }
  0x2d   : > { %481 = vmatprep.subr.bf16.mxu0 %v826_v12  ;;  %754 = vmatpush3.bf16.msra.mxu1 %v841_v19 }
  0x2e   : > { %755 = vmatprep.subr.bf16.mxu1 %v897_v3 }
  0x30   : > { %482 = vmatpush1.bf16.msra.mxu0 %v828_v14 }
  0x31   : > { %483 = vmatprep.subr.bf16.mxu0 %v829_v15  ;;  %756 = vmatpush3.bf16.msra.mxu1 %v842_v22 }
  0x32   : > { %757 = vmatprep.subr.bf16.mxu1 %v897_v3 }
  0x34   : > { %484 = vmatpush1.bf16.msra.mxu0 %v831_v17 }
  0x35   : > { %485 = vmatprep.subr.bf16.mxu0 %v832_v18  ;;  %758 = vmatpush3.bf16.msra.mxu1 %v843_v25 }
  0x36   : > { %759 = vmatprep.subr.bf16.mxu1 %v897_v3 }
  0x38   : > { %486 = vmatpush1.bf16.msra.mxu0 %v834_v20 }
  0x39   : > { %487 = vmatprep.subr.bf16.mxu0 %v836_v21  ;;  %760 = vmatpush3.bf16.msra.mxu1 %v844_v27 }
  0x3a   : > { %761 = vmatprep.subr.bf16.mxu1 %v897_v3 }
  0x3c   : > { %488 = vmatpush1.bf16.msra.mxu0 %v838_v23 }
  0x3d   : > { %762 = vmatpush3.bf16.msra.mxu1 %v845_v28 }
  0x3f   : > { %506 = vmatmul.mubr.bf16.vlgmr.msra.gmra.mrb[0].mxu0 %v295_v26 }
  0x40   : > { %764 = vmatmul.mubr.bf16.vlgmr.msra.gmra.mrb[0].mxu1 %v295_v26 }
 0x112   : > { %v507_v37 = vpop.f32.mrb[0].mxu0 }
 0x113   : > { %v508_v38 = vadd.f32 %v507_v37, %v461_v34  ;;  %v509_v39 = vpop.f32.mrb[1].mxu0  ;;  %v548_v47 = vpop.f32.mrb[0].mxu1 }
 0x114   : > { %v510_v40 = vadd.f32 %v509_v39, %v465_v35  ;;  %v511_v42 = vpop.f32.mrb[2].mxu0  ;;  %v765_v49 = vpop.f32.mrb[1].mxu1  ;;  %v549_v58 = vadd.f32 %v548_v47, %v469_v55 }
 0x115   : > { %v554_v43 = vadd.f32 %v508_v38, %v293_v36  ;;  %v512_v44 = vpop.f32.mrb[3].mxu0  ;;  %v551_v50 = vpop.f32.mrb[2].mxu1 }
 0x116   : > { %v564_v46 = vadd.f32 %v562_v41, %v510_v40  ;;  %v766_v51 = vpop.f32.mrb[3].mxu1 }
 0x117   : > { %v734_v45 = vmul.f32 -1.442695, %v554_v43 }
 0x118   : > { %v735_v48 = vmul.f32 -1.442695, %v564_v46 }
 0x119   : > { %846 = vpow2.f32 %v734_v45 }
 0x11a   : > { %848 = vpow2.f32 %v735_v48 }
 0x123   : > { %v847_v52 = vpop.eup %846 }
 0x124   : > { %v558_v53 = vadd.f32 1.0, %v847_v52  ;;  %v849_v56 = vpop.eup %848 }
 0x125   : > { %v568_v57 = vadd.f32 1.0, %v849_v56 }
 0x126   : > { %850 = vrcp.f32 %v558_v53 }
 0x127   : > { %852 = vrcp.f32 %v568_v57 }
 0x130   : > { %v851_v60 = vpop.eup %850 }
 0x131   : > { %v571_v61 = vmul.f32 %v851_v60, %v549_v58  ;;  %v853_v63 = vpop.eup %852 }
 0x132   : > { %v576_v0 = vsub.f32 1.0, %v853_v63  ;;  %v578_v2 = vmul.f32 %v853_v63, %v294_v24 }
 0x133   : > { %v574_v62 = vadd.f32 %v572_v59, %v571_v61 }
 0x135   : > { %854 = vtanh.f32 %v574_v62 }
 0x13f   : > { %v855_v1 = vpop.eup %854 }
 0x140   : > { %v577_v3 = vmul.f32 %v855_v1, %v576_v0 }
 0x142   : > { %v579_v4 = vadd.f32 %v578_v2, %v577_v3 }
 0x144   : > { %580 = vst [vmem:[#allocation2] sm:$0x1] %v579_v4  ;;  %581 = vst [vmem:[%s282_s11] sm:$0x1] %v579_v4 }
 0x145 PF: > { %s13_s16 = sadd.s32 1, %s894_s16   ;;  %s1031_s12 = smov %s886_s14 }
 0x146   : > { %p10_p9 = scmp.ge.s32.totalorder %s13_s16, 6   ;;  %s1032_s13 = smov %s890_s15 }
 0x147   : > { %s1033_s14 = smov %s1036_s17  ;;  %s1034_s15 = smov %s1040_s18 }
 0x148   :  { %12 = sbr.rel (!%p10_p9) target bundleno = 3 (0x3), region = 72 }

// kernel: siamese_forward.54
= control target key start
LH: loop header
LB: loop body
LE: loop exit
PB: predicated region body
PF: predicated region fallthrough
CT: control target
= control target key end

     0   :  { %v68_v36 = vlaneseq  ;;  %vm295_vm0 = vcmask 1041408   ;;  %v609_v59 = vmov 0.0   ;;  %vm314_vm1 = vcmask 15360   ;;  %s779_s2 = inlined_call_operand.vmem [shape: bf16[256,256], index: 2, kind: input, shape index: {}]   ;;  %s780_s0 = inlined_call_operand.vmem [shape: f32[2,256], index: 0, kind: input, shape index: {}]   ;;  %s781_s3 = inlined_call_operand.vmem [shape: f32[1,256], index: 3, kind: input, shape index: {}]   ;;  %s782_s4 = inlined_call_operand.vmem [shape: f32[1,256], index: 4, kind: input, shape index: {}]   ;;  %s783_s1 = inlined_call_operand.vmem [shape: f32[1,2], index: 1, kind: input, shape index: {}]   ;;  %s784_s5 = inlined_call_operand.vmem [shape: f32[1,256], index: 5, kind: output, shape index: {}]  }
   0x1   :  { %v553_v0 = vld [vmem:[%s779_s2 + $0x4] ss:$8 sps:$4 sm:$0xff]   ;;  %v555_v1 = vld [vmem:[%s779_s2] ss:$8 sps:$4 sm:$0xff]   ;;  %v556_v2 = vld [vmem:[%s779_s2 + $0x14] ss:$8 sps:$4 sm:$0xff]   ;;  %388 = vmatprep.mubr.f32.mxu1 %v609_v59 }
   0x2   :  { %238 = vmatprep.subr.bf16.mxu0 %v553_v0  ;;  %v558_v3 = vld [vmem:[%s779_s2 + $0x10] ss:$8 sps:$4 sm:$0xff]   ;;  %v559_v4 = vld [vmem:[%s779_s2 + $0x24] ss:$8 sps:$4 sm:$0xff]   ;;  %v561_v5 = vld [vmem:[%s779_s2 + $0x20] ss:$8 sps:$4 sm:$0xff]  }
   0x3   :  { %239 = vmatpush1.bf16.msra.mxu0 %v555_v1  ;;  %v562_v6 = vld [vmem:[%s779_s2 + $0x34] ss:$8 sps:$4 sm:$0xff]   ;;  %v564_v7 = vld [vmem:[%s779_s2 + $0x30] ss:$8 sps:$4 sm:$0xff]   ;;  %v565_v8 = vld [vmem:[%s779_s2 + $0x44] ss:$8 sps:$4 sm:$0xff]  }
   0x4   :  { %240 = vmatprep.subr.bf16.mxu0 %v556_v2  ;;  %v567_v9 = vld [vmem:[%s779_s2 + $0x40] ss:$8 sps:$4 sm:$0xff]   ;;  %v568_v10 = vld [vmem:[%s779_s2 + $0x54] ss:$8 sps:$4 sm:$0xff]   ;;  %v570_v11 = vld [vmem:[%s779_s2 + $0x50] ss:$8 sps:$4 sm:$0xff]  }
   0x5   :  { %v571_v12 = vld [vmem:[%s779_s2 + $0x64] ss:$8 sps:$4 sm:$0xff]   ;;  %v685_v13 = vld.sshfl [vmem:[%s780_s0] sm:$0x33 pattern:$0x76325410] }
   0x6   :  { %v689_v14 = vcombine.high %v685_v13, %v685_v13  ;;  %v573_v15 = vld [vmem:[%s779_s2 + $0x60] ss:$8 sps:$4 sm:$0xff]   ;;  %v574_v16 = vld [vmem:[%s779_s2 + $0x74] ss:$8 sps:$4 sm:$0xff]   ;;  %v576_v18 = vld [vmem:[%s779_s2 + $0x70] ss:$8 sps:$4 sm:$0xff]   ;;  %v32_v35 = vpack.c.bf16 %v685_v13, %v685_v13 }
   0x7   :  { %241 = vmatpush1.bf16.msra.mxu0 %v558_v3  ;;  %v577_v19 = vld [vmem:[%s779_s2 + $0x84] ss:$8 sps:$4 sm:$0xff]   ;;  %v579_v20 = vld [vmem:[%s779_s2 + $0x80] ss:$8 sps:$4 sm:$0xff]   ;;  %v580_v21 = vld [vmem:[%s779_s2 + $0x94] ss:$8 sps:$4 sm:$0xff]  }
   0x8   :  { %242 = vmatprep.subr.bf16.mxu0 %v559_v4  ;;  %v33_v17 = vpack.c.bf16 %v689_v14, %v689_v14  ;;  %v582_v22 = vld [vmem:[%s779_s2 + $0x90] ss:$8 sps:$4 sm:$0xff]   ;;  %v583_v23 = vld [vmem:[%s779_s2 + $0xa4] ss:$8 sps:$4 sm:$0xff]   ;;  %v585_v24 = vld [vmem:[%s779_s2 + $0xa0] ss:$8 sps:$4 sm:$0xff]  }
   0x9   :  { %v586_v25 = vld [vmem:[%s779_s2 + $0xb4] ss:$8 sps:$4 sm:$0xff]   ;;  %v588_v26 = vld [vmem:[%s779_s2 + $0xb0] ss:$8 sps:$4 sm:$0xff]   ;;  %v589_v27 = vld [vmem:[%s779_s2 + $0xc4] ss:$8 sps:$4 sm:$0xff]  }
   0xa   :  { %270 = vmatprep.mubr.bf16.mxu0 %v33_v17  ;;  %v591_v28 = vld [vmem:[%s779_s2 + $0xc0] ss:$8 sps:$4 sm:$0xff]   ;;  %v592_v29 = vld [vmem:[%s779_s2 + $0xd4] ss:$8 sps:$4 sm:$0xff]   ;;  %v594_v30 = vld [vmem:[%s779_s2 + $0xd0] ss:$8 sps:$4 sm:$0xff]  }
   0xb   :  { %243 = vmatpush1.bf16.msra.mxu0 %v561_v5  ;;  %v595_v31 = vld [vmem:[%s779_s2 + $0xe4] ss:$8 sps:$4 sm:$0xff]   ;;  %v597_v32 = vld [vmem:[%s779_s2 + $0xe0] ss:$8 sps:$4 sm:$0xff]   ;;  %v598_v33 = vld [vmem:[%s779_s2 + $0xf4] ss:$8 sps:$4 sm:$0xff]  }
   0xc   :  { %244 = vmatprep.subr.bf16.mxu0 %v562_v6  ;;  %v600_v34 = vld [vmem:[%s779_s2 + $0xf0] ss:$8 sps:$4 sm:$0xff]   ;;  %v753_v37 = vshrl.u32 %v68_v36, 7  ;;  %v66_v39 = vld [vmem:[%s781_s3] sm:$0x3]  ;;  %vm610_vm2 = vmmov 0  }
   0xd   :  { %v281_v49 = vld [vmem:[%s782_s4] sm:$0x3]  ;;  %vm496_vm3 = vcmp.lt.s32.totalorder %v68_v36, 256 }
   0xe   :  { %v70_v38 = vsub.s32 0, %v753_v37  ;;  %v74_v40 = vsub.s32 1, %v753_v37 }
   0xf   :  { %245 = vmatpush1.bf16.msra.mxu0 %v564_v7 }
  0x10   :  { %246 = vmatprep.subr.bf16.mxu0 %v565_v8  ;;  %v71_v41 = vrot.slane %v66_v39, %v70_v38  ;;  %v75_v42 = vrot.slane %v66_v39, %v74_v40  ;;  %v286_v50 = vrot.slane %v281_v49, %v70_v38  ;;  %v290_v51 = vrot.slane %v281_v49, %v74_v40 }
  0x13   :  { %247 = vmatpush1.bf16.msra.mxu0 %v567_v9  ;;  %v311_v9 = vld [vmem:[%s783_s1] sm:$0x1] }
  0x14   :  { %248 = vmatprep.subr.bf16.mxu0 %v568_v10  ;;  %v611_v10 = vmov 0  }
  0x15   :  { %552 = vset.pattern.permute.xlu0 %v611_v10 }
  0x17   :  { %249 = vmatpush1.bf16.msra.mxu0 %v570_v11 }
  0x18   :  { %250 = vmatprep.subr.bf16.mxu0 %v571_v12 }
  0x1b   :  { %251 = vmatpush1.bf16.msra.mxu0 %v573_v15 }
  0x1c   :  { %252 = vmatprep.subr.bf16.mxu0 %v574_v16  ;;  %v612_v16 = vmov 1966171168  }
  0x1d   :  { %v480_v17 = vunpack.c.l.s4 %v612_v16 }
  0x1f   :  { %253 = vmatpush1.bf16.msra.mxu0 %v576_v18  ;;  %v481_v18 = vunpack.c.0.s8 %v480_v17 }
  0x20   :  { %254 = vmatprep.subr.bf16.mxu0 %v577_v19 }
  0x23   :  { %255 = vmatpush1.bf16.msra.mxu0 %v579_v20  ;;  %v484_v20 = vsub.s32 %v481_v18, %v753_v37 }
  0x24   :  { %256 = vmatprep.subr.bf16.mxu0 %v580_v21 }
  0x27   :  { %257 = vmatpush1.bf16.msra.mxu0 %v582_v22 }
  0x28   :  { %258 = vmatprep.subr.bf16.mxu0 %v583_v23 }
  0x2b   :  { %259 = vmatpush1.bf16.msra.mxu0 %v585_v24 }
  0x2c   :  { %260 = vmatprep.subr.bf16.mxu0 %v586_v25 }
  0x2f   :  { %261 = vmatpush1.bf16.msra.mxu0 %v588_v26 }
  0x30   :  { %262 = vmatprep.subr.bf16.mxu0 %v589_v27 }
  0x33   :  { %263 = vmatpush1.bf16.msra.mxu0 %v591_v28 }
  0x34   :  { %264 = vmatprep.subr.bf16.mxu0 %v592_v29 }
  0x37   :  { %265 = vmatpush1.bf16.msra.mxu0 %v594_v30 }
  0x38   :  { %266 = vmatprep.subr.bf16.mxu0 %v595_v31 }
  0x3b   :  { %267 = vmatpush1.bf16.msra.mxu0 %v597_v32 }
  0x3c   :  { %268 = vmatprep.subr.bf16.mxu0 %v598_v33 }
  0x3f   :  { %269 = vmatpush1.bf16.msra.mxu0 %v600_v34 }
  0x42   :  { %271 = vmatmul.mubr.bf16.vlgmr.msra.gmra.mrb[0].mxu0 %v32_v35 }
 0x115   :  { %v272_v43 = vpop.f32.mrb[0].mxu0 }
 0x116   :  { %v273_v44 = vadd.f32 %v272_v43, %v71_v41  ;;  %v274_v45 = vpop.f32.mrb[1].mxu0 }
 0x117   :  { %v275_v46 = vadd.f32 %v274_v45, %v75_v42  ;;  %v276_v47 = vpop.f32.mrb[2].mxu0 }
 0x118   :  { %601 = vtanh.f32 %v273_v44  ;;  %v277_v48 = vpop.f32.mrb[3].mxu0 }
 0x119   :  { %603 = vtanh.f32 %v275_v46 }
 0x122   :  { %v602_v52 = vpop.eup %601 }
 0x123   :  { %v604_v53 = vpop.eup %603  ;;  %v293_v54 = vmul.f32 %v602_v52, %v286_v50 }
 0x124   :  { %v294_v55 = vmul.f32 %v604_v53, %v290_v51 }
 0x125   :  { %v296_v56 = vsel %vm295_vm0, %v293_v54, 0.0 }
 0x126   :  { %v297_v57 = vsel %vm295_vm0, %v294_v55, 0.0 }
 0x127   :  { %v298_v58 = vadd.f32 %v297_v57, %v296_v56 }
 0x129   :  { %299 = vadd.xlane.f32.xlu0 %v298_v58 }
 0x1b6   :  { %v300_v60 = vpop.xlane.xlu0 %299 }
 0x1b7   :  { %v301_v61 = vsel %vm295_vm0, %v300_v60, -inf }
 0x1b8   :  { %v302_v62 = vrot.slane %v301_v61, 4 }
 0x1ba   :  { %v303_v63 = vmax.f32 %v301_v61, %v302_v62 }
 0x1bc   :  { %v304_v0 = vrot.slane %v303_v63, 2 }
 0x1be   :  { %v305_v1 = vmax.f32 %v303_v63, %v304_v0 }
 0x1c0   :  { %v306_v2 = vrot.slane %v305_v1, 1 }
 0x1c2   :  { %v307_v3 = vmax.f32 %v305_v1, %v306_v2 }
 0x1c4   :  { %v308_v4 = vsub.f32 %v300_v60, %v307_v3 }
 0x1c6   :  { %v309_v5 = vmul.f32 1.442695, %v308_v4 }
 0x1c8   :  { %605 = vpow2.f32 %v309_v5 }
 0x1d2   :  { %v606_v6 = vpop.eup %605 }
 0x1d3   :  { %v313_v7 = vmul.f32 %v606_v6, %v689_v14  ;;  %v312_v8 = vmul.f32 %v606_v6, %v685_v13 }
 0x1d5   :  { %536 = vmatprep.subr.msk.mxu1 %vm295_vm0, %v313_v7 }
 0x1d6   :  { %537 = vmatpush1.msk.msra.mxu1 %vm295_vm0, %v312_v8 }
 0x1d7   :  { %538 = vmatmul.mubr.msk.f32.vlgmr.msra.gmra.mrb[0].mxu1 %vm314_vm1, %v311_v9  ;;  %543 = vmatprep.subr.mxu1 %v609_v59 }
 0x1d8   :  { %544 = vmatpush3.msk.msra.mxu1 %vm295_vm0, %v606_v6  ;;  %545 = vmatprep.mubr.msk.f32.mxu1 %vm610_vm2, %v609_v59 }
 0x1db   :  { %546 = vmatmul.mubr.msk.f32.vlgmr.msra.gmra.mrb[2].mxu1 %vm314_vm1, %v311_v9 }
 0x2aa   :  { %v390_v11 = vpop.f32.mrb[0].mxu1 }
 0x2ab   :  { %v392_v12 = vpop.f32.mrb[1].mxu1 }
 0x2ae   :  { %v464_v13 = vpop.f32.mrb[2].mxu1 }
 0x2af   :  { %470 = vperm.xlu0 %552, %v464_v13   ;;  %v547_v14 = vpop.f32.mrb[3].mxu1 }
 0x32e   :  { %v471_v15 = vpop.permute.xlu0 %470 }
 0x32f   :  { %607 = vrcp.f32 %v471_v15 }
 0x339   :  { %v608_v19 = vpop.eup %607 }
 0x33a   :  { %v474_v21 = vmul.f32 %v608_v19, %v390_v11  ;;  %v475_v22 = vmul.f32 %v608_v19, %v392_v12 }
 0x33c   :  { %v478_v23 = vcombine.low %v474_v21, %v475_v22 }
 0x33e   :  { %v485_v24 = vrot.slane %v478_v23, %v484_v20 }
 0x340   :  { %v492_v25 = vrot.slane %v485_v24, %v484_v20 }
 0x342   :  { %498 = vst.msk [vmem:[%s784_s5] sm:$0x3] %vm496_vm3, %v492_v25 }

// kernel: siamese_forward.43
= control target key start
LH: loop header
LB: loop body
LE: loop exit
PB: predicated region body
PF: predicated region fallthrough
CT: control target
= control target key end

     0   :  { %v58_v36 = vlaneseq  ;;  %vm285_vm0 = vcmask 1045504   ;;  %v598_v59 = vmov 0.0   ;;  %vm304_vm1 = vcmask 48128   ;;  %s764_s2 = inlined_call_operand.vmem [shape: bf16[256,256], index: 2, kind: input, shape index: {}]   ;;  %s765_s0 = inlined_call_operand.vmem [shape: f32[6,256], index: 0, kind: input, shape index: {}]   ;;  %s766_s3 = inlined_call_operand.vmem [shape: f32[1,256], index: 3, kind: input, shape index: {}]   ;;  %s767_s4 = inlined_call_operand.vmem [shape: f32[1,256], index: 4, kind: input, shape index: {}]   ;;  %s768_s1 = inlined_call_operand.vmem [shape: f32[1,6], index: 1, kind: input, shape index: {}]   ;;  %s769_s5 = inlined_call_operand.vmem [shape: f32[1,256], index: 5, kind: output, shape index: {}]  }
   0x1   :  { %v542_v0 = vld [vmem:[%s764_s2 + $0x4] ss:$8 sps:$4 sm:$0xff]   ;;  %v544_v1 = vld [vmem:[%s764_s2] ss:$8 sps:$4 sm:$0xff]   ;;  %v545_v2 = vld [vmem:[%s764_s2 + $0x14] ss:$8 sps:$4 sm:$0xff]   ;;  %378 = vmatprep.mubr.f32.mxu1 %v598_v59 }
   0x2   :  { %228 = vmatprep.subr.bf16.mxu0 %v542_v0  ;;  %v547_v3 = vld [vmem:[%s764_s2 + $0x10] ss:$8 sps:$4 sm:$0xff]   ;;  %v548_v4 = vld [vmem:[%s764_s2 + $0x24] ss:$8 sps:$4 sm:$0xff]   ;;  %v550_v5 = vld [vmem:[%s764_s2 + $0x20] ss:$8 sps:$4 sm:$0xff]  }
   0x3   :  { %229 = vmatpush1.bf16.msra.mxu0 %v544_v1  ;;  %v551_v6 = vld [vmem:[%s764_s2 + $0x34] ss:$8 sps:$4 sm:$0xff]   ;;  %v553_v7 = vld [vmem:[%s764_s2 + $0x30] ss:$8 sps:$4 sm:$0xff]   ;;  %v554_v8 = vld [vmem:[%s764_s2 + $0x44] ss:$8 sps:$4 sm:$0xff]  }
   0x4   :  { %230 = vmatprep.subr.bf16.mxu0 %v545_v2  ;;  %v556_v9 = vld [vmem:[%s764_s2 + $0x40] ss:$8 sps:$4 sm:$0xff]   ;;  %v557_v10 = vld [vmem:[%s764_s2 + $0x54] ss:$8 sps:$4 sm:$0xff]   ;;  %v559_v11 = vld [vmem:[%s764_s2 + $0x50] ss:$8 sps:$4 sm:$0xff]  }
   0x5   :  { %v560_v12 = vld [vmem:[%s764_s2 + $0x64] ss:$8 sps:$4 sm:$0xff]   ;;  %v562_v15 = vld [vmem:[%s764_s2 + $0x60] ss:$8 sps:$4 sm:$0xff]   ;;  %v563_v16 = vld [vmem:[%s764_s2 + $0x74] ss:$8 sps:$4 sm:$0xff]  }
   0x6   :  { %v674_v13 = vld [vmem:[%s765_s0 + $0x8] sm:$0x3f]  ;;  %v565_v17 = vld [vmem:[%s764_s2 + $0x70] ss:$8 sps:$4 sm:$0xff]   ;;  %v569_v20 = vld [vmem:[%s764_s2 + $0x94] ss:$8 sps:$4 sm:$0xff]  }
   0x7   :  { %231 = vmatpush1.bf16.msra.mxu0 %v547_v3  ;;  %v23_v14 = vpack.c.bf16 %v674_v13, %v674_v13  ;;  %v566_v18 = vld [vmem:[%s764_s2 + $0x84] ss:$8 sps:$4 sm:$0xff]   ;;  %v568_v19 = vld [vmem:[%s764_s2 + $0x80] ss:$8 sps:$4 sm:$0xff]   ;;  %v571_v21 = vld [vmem:[%s764_s2 + $0x90] ss:$8 sps:$4 sm:$0xff]  }
   0x8   :  { %232 = vmatprep.subr.bf16.mxu0 %v548_v4  ;;  %v572_v22 = vld [vmem:[%s764_s2 + $0xa4] ss:$8 sps:$4 sm:$0xff]   ;;  %v574_v23 = vld [vmem:[%s764_s2 + $0xa0] ss:$8 sps:$4 sm:$0xff]   ;;  %v575_v24 = vld [vmem:[%s764_s2 + $0xb4] ss:$8 sps:$4 sm:$0xff]  }
   0x9   :  { %260 = vmatprep.mubr.bf16.mxu0 %v23_v14  ;;  %v577_v25 = vld [vmem:[%s764_s2 + $0xb0] ss:$8 sps:$4 sm:$0xff]   ;;  %v578_v26 = vld [vmem:[%s764_s2 + $0xc4] ss:$8 sps:$4 sm:$0xff]   ;;  %v580_v27 = vld [vmem:[%s764_s2 + $0xc0] ss:$8 sps:$4 sm:$0xff]  }
   0xa   :  { %v581_v28 = vld [vmem:[%s764_s2 + $0xd4] ss:$8 sps:$4 sm:$0xff]   ;;  %v583_v29 = vld [vmem:[%s764_s2 + $0xd0] ss:$8 sps:$4 sm:$0xff]   ;;  %v584_v30 = vld [vmem:[%s764_s2 + $0xe4] ss:$8 sps:$4 sm:$0xff]  }
   0xb   :  { %233 = vmatpush1.bf16.msra.mxu0 %v550_v5  ;;  %v586_v31 = vld [vmem:[%s764_s2 + $0xe0] ss:$8 sps:$4 sm:$0xff]   ;;  %v587_v32 = vld [vmem:[%s764_s2 + $0xf4] ss:$8 sps:$4 sm:$0xff]   ;;  %v589_v33 = vld [vmem:[%s764_s2 + $0xf0] ss:$8 sps:$4 sm:$0xff]  }
   0xc   :  { %234 = vmatprep.subr.bf16.mxu0 %v551_v6  ;;  %v20_v34 = vld [vmem:[%s765_s0] sm:$0x3f]  ;;  %v739_v37 = vshrl.u32 %v58_v36, 7  ;;  %vm599_vm2 = vmmov 0   ;;  %vm486_vm3 = vcmp.lt.s32.totalorder %v58_v36, 256 }
   0xd   :  { %v22_v35 = vpack.c.bf16 %v20_v34, %v20_v34  ;;  %v56_v39 = vld [vmem:[%s766_s3] sm:$0x3] }
   0xe   :  { %v60_v38 = vsub.s32 0, %v739_v37  ;;  %v64_v40 = vsub.s32 1, %v739_v37  ;;  %v271_v49 = vld [vmem:[%s767_s4] sm:$0x3] }
   0xf   :  { %235 = vmatpush1.bf16.msra.mxu0 %v553_v7 }
  0x10   :  { %236 = vmatprep.subr.bf16.mxu0 %v554_v8  ;;  %v61_v41 = vrot.slane %v56_v39, %v60_v38  ;;  %v65_v42 = vrot.slane %v56_v39, %v64_v40  ;;  %v276_v50 = vrot.slane %v271_v49, %v60_v38  ;;  %v280_v51 = vrot.slane %v271_v49, %v64_v40 }
  0x13   :  { %237 = vmatpush1.bf16.msra.mxu0 %v556_v9  ;;  %v301_v9 = vld [vmem:[%s768_s1] sm:$0x1] }
  0x14   :  { %238 = vmatprep.subr.bf16.mxu0 %v557_v10  ;;  %v600_v10 = vmov 0  }
  0x15   :  { %541 = vset.pattern.permute.xlu0 %v600_v10 }
  0x17   :  { %239 = vmatpush1.bf16.msra.mxu0 %v559_v11 }
  0x18   :  { %240 = vmatprep.subr.bf16.mxu0 %v560_v12 }
  0x1b   :  { %241 = vmatpush1.bf16.msra.mxu0 %v562_v15 }
  0x1c   :  { %242 = vmatprep.subr.bf16.mxu0 %v563_v16  ;;  %v601_v16 = vmov 1966171168  }
  0x1f   :  { %243 = vmatpush1.bf16.msra.mxu0 %v565_v17  ;;  %v470_v17 = vunpack.c.l.s4 %v601_v16 }
  0x20   :  { %244 = vmatprep.subr.bf16.mxu0 %v566_v18 }
  0x21   :  { %v471_v18 = vunpack.c.0.s8 %v470_v17 }
  0x23   :  { %245 = vmatpush1.bf16.msra.mxu0 %v568_v19 }
  0x24   :  { %246 = vmatprep.subr.bf16.mxu0 %v569_v20  ;;  %v474_v20 = vsub.s32 %v471_v18, %v739_v37 }
  0x27   :  { %247 = vmatpush1.bf16.msra.mxu0 %v571_v21 }
  0x28   :  { %248 = vmatprep.subr.bf16.mxu0 %v572_v22 }
  0x2b   :  { %249 = vmatpush1.bf16.msra.mxu0 %v574_v23 }
  0x2c   :  { %250 = vmatprep.subr.bf16.mxu0 %v575_v24 }
  0x2f   :  { %251 = vmatpush1.bf16.msra.mxu0 %v577_v25 }
  0x30   :  { %252 = vmatprep.subr.bf16.mxu0 %v578_v26 }
  0x33   :  { %253 = vmatpush1.bf16.msra.mxu0 %v580_v27 }
  0x34   :  { %254 = vmatprep.subr.bf16.mxu0 %v581_v28 }
  0x37   :  { %255 = vmatpush1.bf16.msra.mxu0 %v583_v29 }
  0x38   :  { %256 = vmatprep.subr.bf16.mxu0 %v584_v30 }
  0x3b   :  { %257 = vmatpush1.bf16.msra.mxu0 %v586_v31 }
  0x3c   :  { %258 = vmatprep.subr.bf16.mxu0 %v587_v32 }
  0x3f   :  { %259 = vmatpush1.bf16.msra.mxu0 %v589_v33 }
  0x42   :  { %261 = vmatmul.mubr.bf16.vlgmr.msra.gmra.mrb[0].mxu0 %v22_v35 }
 0x115   :  { %v262_v43 = vpop.f32.mrb[0].mxu0 }
 0x116   :  { %v263_v44 = vadd.f32 %v262_v43, %v61_v41  ;;  %v264_v45 = vpop.f32.mrb[1].mxu0 }
 0x117   :  { %v265_v46 = vadd.f32 %v264_v45, %v65_v42  ;;  %v266_v47 = vpop.f32.mrb[2].mxu0 }
 0x118   :  { %590 = vtanh.f32 %v263_v44  ;;  %v267_v48 = vpop.f32.mrb[3].mxu0 }
 0x119   :  { %592 = vtanh.f32 %v265_v46 }
 0x122   :  { %v591_v52 = vpop.eup %590 }
 0x123   :  { %v593_v53 = vpop.eup %592  ;;  %v283_v54 = vmul.f32 %v591_v52, %v276_v50 }
 0x124   :  { %v284_v55 = vmul.f32 %v593_v53, %v280_v51 }
 0x125   :  { %v286_v56 = vsel %vm285_vm0, %v283_v54, 0.0 }
 0x126   :  { %v287_v57 = vsel %vm285_vm0, %v284_v55, 0.0 }
 0x127   :  { %v288_v58 = vadd.f32 %v287_v57, %v286_v56 }
 0x129   :  { %289 = vadd.xlane.f32.xlu0 %v288_v58 }
 0x1b6   :  { %v290_v60 = vpop.xlane.xlu0 %289 }
 0x1b7   :  { %v291_v61 = vsel %vm285_vm0, %v290_v60, -inf }
 0x1b8   :  { %v292_v62 = vrot.slane %v291_v61, 4 }
 0x1ba   :  { %v293_v63 = vmax.f32 %v291_v61, %v292_v62 }
 0x1bc   :  { %v294_v0 = vrot.slane %v293_v63, 2 }
 0x1be   :  { %v295_v1 = vmax.f32 %v293_v63, %v294_v0 }
 0x1c0   :  { %v296_v2 = vrot.slane %v295_v1, 1 }
 0x1c2   :  { %v297_v3 = vmax.f32 %v295_v1, %v296_v2 }
 0x1c4   :  { %v298_v4 = vsub.f32 %v290_v60, %v297_v3 }
 0x1c6   :  { %v299_v5 = vmul.f32 1.442695, %v298_v4 }
 0x1c8   :  { %594 = vpow2.f32 %v299_v5 }
 0x1d2   :  { %v595_v6 = vpop.eup %594 }
 0x1d3   :  { %v303_v7 = vmul.f32 %v595_v6, %v674_v13  ;;  %v302_v8 = vmul.f32 %v595_v6, %v20_v34 }
 0x1d5   :  { %525 = vmatprep.subr.msk.mxu1 %vm285_vm0, %v303_v7 }
 0x1d6   :  { %526 = vmatpush1.msk.msra.mxu1 %vm285_vm0, %v302_v8 }
 0x1d7   :  { %527 = vmatmul.mubr.msk.f32.vlgmr.msra.gmra.mrb[0].mxu1 %vm304_vm1, %v301_v9  ;;  %532 = vmatprep.subr.mxu1 %v598_v59 }
 0x1d8   :  { %533 = vmatpush3.msk.msra.mxu1 %vm285_vm0, %v595_v6  ;;  %534 = vmatprep.mubr.msk.f32.mxu1 %vm599_vm2, %v598_v59 }
 0x1db   :  { %535 = vmatmul.mubr.msk.f32.vlgmr.msra.gmra.mrb[2].mxu1 %vm304_vm1, %v301_v9 }
 0x2aa   :  { %v380_v11 = vpop.f32.mrb[0].mxu1 }
 0x2ab   :  { %v382_v12 = vpop.f32.mrb[1].mxu1 }
 0x2ae   :  { %v454_v13 = vpop.f32.mrb[2].mxu1 }
 0x2af   :  { %460 = vperm.xlu0 %541, %v454_v13   ;;  %v536_v14 = vpop.f32.mrb[3].mxu1 }
 0x32e   :  { %v461_v15 = vpop.permute.xlu0 %460 }
 0x32f   :  { %596 = vrcp.f32 %v461_v15 }
 0x339   :  { %v597_v19 = vpop.eup %596 }
 0x33a   :  { %v464_v21 = vmul.f32 %v597_v19, %v380_v11  ;;  %v465_v22 = vmul.f32 %v597_v19, %v382_v12 }
 0x33c   :  { %v468_v23 = vcombine.low %v464_v21, %v465_v22 }
 0x33e   :  { %v475_v24 = vrot.slane %v468_v23, %v474_v20 }
 0x340   :  { %v482_v25 = vrot.slane %v475_v24, %v474_v20 }
 0x342   :  { %488 = vst.msk [vmem:[%s769_s5] sm:$0x3] %vm486_vm3, %v482_v25 }

// kernel: siamese_forward.40
= control target key start
LH: loop header
LB: loop body
LE: loop exit
PB: predicated region body
PF: predicated region fallthrough
CT: control target
= control target key end

     0   :  { %s920_s12 = smov 0   ;;  %s922_s13 = smov 0   ;;  %s1027_s0 = inlined_call_operand.vmem [shape: f32[6,1,768], index: 0, kind: input, shape index: {}]   ;;  %s1028_s1 = inlined_call_operand.vmem [shape: bf16[2,128,384], index: 1, kind: input, shape index: {}]   ;;  %s1029_s2 = inlined_call_operand.vmem [shape: f32[2,1,384], index: 2, kind: input, shape index: {}]   ;;  %s1030_s3 = inlined_call_operand.vmem [shape: f32[6,1,256], index: 3, kind: output, shape index: {}]  }
   0x1   :  { %s924_s14 = smov 0   ;;  %s926_s15 = smov 0  }
   0x2   :  { %s928_s16 = smov 0  }
   0x3 LB: > { %s22_s17 = sadd.s32 1, %s886_s14  ;;  %s25_s18 = sadd.s32 1, %s890_s15  ;;  %s894_s16 = sphi %s928_s16, %s13_s16   ;;  %s890_s15 = sphi %s926_s15, %s1034_s15   ;;  %s886_s14 = sphi %s924_s14, %s1033_s14   ;;  %s882_s13 = sphi %s922_s13, %s1032_s13   ;;  %s878_s12 = sphi %s920_s12, %s1031_s12  }
   0x4   : > { %p23_p0 = scmp.ge.s32.totalorder %s22_s17, 6  ;;  %p704_p1 = scmp.ge.s32.totalorder %s894_s16, 1 }
   0x5   : > { %p200_p2 = scmp.lt.s32.totalorder %s894_s16, 13 }
   0x6   : > { %s1036_s17 = smov (%p23_p0, %s22_s17), 0  ;;  %s1038_s18 = smov (!%p23_p0, %s25_s18), %s890_s15 }
   0x7   : > { %p201_p3 = pnand %p704_p1, %p200_p2  ;;  %p27_p4 = scmp.ge.s32.totalorder %s1038_s18, 2 }
   0x8   : > { %s705_s19 = sshll.u32 (!%p201_p3), %s878_s12, 1  ;;  %s250_s20 = smul.u32 (!%p201_p3), 3, %s882_s13 }
   0x9   : > { %s1040_s18 = smov (%p27_p4, %s1038_s18), 0  ;;  %204 = sbr.rel (%p201_p3) target bundleno = 325 (0x145), region = 32 }
   0xa   : > { %s247_s21 = ssub.s32 (!%p201_p3), 5, %s705_s19  ;;  %p263_p5 = scmp.lt.s32.totalorder (!%p201_p3), %s882_s13, 1 }
   0xb   : > { %s248_s22 = smul.u32 (!%p201_p3), %s882_s13, %s247_s21  ;;  %p253_p6 = scmp.lt.s32.totalorder (!%p201_p3), %s250_s20, 5 }
   0xc   : > { %p709_p8 = scmp.ne.s32.totalorder (!%p201_p3), %s878_s12, 0 }
   0xd   : > { %s249_s23 = sadd.s32 (!%p201_p3), %s878_s12, %s248_s22 }
   0xe   : > { %p251_p7 = scmp.lt.s32.totalorder (!%p201_p3), %s249_s23, 5 }
  0x10   : > { %s1042_s13 = smov (!%p263_p5, %s882_s13), 1  ;;  %s1044_s20 = smov (!%p253_p6, %s250_s20), 5 }
  0x11   : > { %s768_s24 = smul.u32 192, %s1042_s13  ;;  %s1046_s23 = smov (!%p251_p7, %s249_s23), 5  ;;  %v896_v0 = vmov (!%p709_p8), 0.0  }
  0x12   : > { %s769_s28 = smul.u32 3, %s1042_s13  ;;  %s708_s30 = sshll.u32 %s1046_s23, 1  ;;  %292 = vst [vmem:[#allocation2] sm:$0x1] (!%p709_p8), %v896_v0 }
  0x13   : > { %s957_s27 = scalar_lea.vmem %s1028_s1, %s768_s24  ;;  %s767_s29 = smul.u32 6, %s1046_s23 }
  0x14   : > { %s962_s6 = scalar_lea.vmem %s1029_s2, %s769_s28  ;;  %s964_s7 = sadd.s32 %s708_s30, %s1042_s13 }
  0x15   : > { %s966_s8 = sadd.s32 %s767_s29, %s1044_s20  ;;  %s282_s11 = scalar_lea.vmem %s1030_s3, %s964_s7 }
  0x16   : > { %s257_s22 = scalar_lea.vmem %s1027_s0, %s966_s8  ;;  %291 = sbr.rel (%p709_p8) target bundleno = 29 (0x1d), region = 36 }
  0x1d PF: > { %v814_v1 = vld [vmem:[%s957_s27 + $0x4] ss:$12 sps:$4 sm:$0xff]   ;;  %v816_v2 = vld [vmem:[%s957_s27] ss:$12 sps:$4 sm:$0xff]   ;;  %v897_v3 = vmov 0.0   ;;  %v898_v4 = vmov 0   ;;  %v458_v29 = vlaneseq }
  0x1e   : > { %747 = vmatprep.subr.bf16.mxu1 %v897_v3  ;;  %505 = vmatprep.mubr.bf16.mxu0 %v898_v4  ;;  %v817_v5 = vld [vmem:[%s957_s27 + $0x1c] ss:$12 sps:$4 sm:$0xff]   ;;  %vm899_vm0 = vmmov 0   ;;  %v819_v6 = vld [vmem:[%s957_s27 + $0x18] ss:$12 sps:$4 sm:$0xff]  }
  0x1f   : > { %473 = vmatprep.subr.bf16.mxu0 %v814_v1  ;;  %763 = vmatprep.mubr.msk.bf16.mxu1 %vm899_vm0, %v897_v3  ;;  %v820_v7 = vld [vmem:[%s957_s27 + $0x34] ss:$12 sps:$4 sm:$0xff]   ;;  %v822_v8 = vld [vmem:[%s957_s27 + $0x30] ss:$12 sps:$4 sm:$0xff]   ;;  %v823_v9 = vld [vmem:[%s957_s27 + $0x4c] ss:$12 sps:$4 sm:$0xff]  }
  0x20   : > { %474 = vmatpush1.bf16.msra.mxu0 %v816_v2  ;;  %v835_v10 = vld [vmem:[%s957_s27 + $0x8] ss:$12 sps:$4 sm:$0xff]   ;;  %v826_v12 = vld [vmem:[%s957_s27 + $0x64] ss:$12 sps:$4 sm:$0xff]   ;;  %v839_v13 = vld [vmem:[%s957_s27 + $0x20] ss:$12 sps:$4 sm:$0xff]  }
  0x21   : > { %475 = vmatprep.subr.bf16.mxu0 %v817_v5  ;;  %v825_v11 = vld [vmem:[%s957_s27 + $0x48] ss:$12 sps:$4 sm:$0xff]   ;;  %748 = vmatpush3.bf16.msra.mxu1 %v835_v10  ;;  %v828_v14 = vld [vmem:[%s957_s27 + $0x60] ss:$12 sps:$4 sm:$0xff]   ;;  %v840_v16 = vld [vmem:[%s957_s27 + $0x38] ss:$12 sps:$4 sm:$0xff]  }
  0x22   : > { %749 = vmatprep.subr.bf16.mxu1 %v897_v3  ;;  %v829_v15 = vld [vmem:[%s957_s27 + $0x7c] ss:$12 sps:$4 sm:$0xff]   ;;  %v831_v17 = vld [vmem:[%s957_s27 + $0x78] ss:$12 sps:$4 sm:$0xff]   ;;  %v832_v18 = vld [vmem:[%s957_s27 + $0x94] ss:$12 sps:$4 sm:$0xff]  }
  0x23   : > { %v841_v19 = vld [vmem:[%s957_s27 + $0x50] ss:$12 sps:$4 sm:$0xff]   ;;  %v836_v21 = vld [vmem:[%s957_s27 + $0xac] ss:$12 sps:$4 sm:$0xff]   ;;  %v842_v22 = vld [vmem:[%s957_s27 + $0x68] ss:$12 sps:$4 sm:$0xff]  }
  0x24   : > { %476 = vmatpush1.bf16.msra.mxu0 %v819_v6  ;;  %v834_v20 = vld [vmem:[%s957_s27 + $0x90] ss:$12 sps:$4 sm:$0xff]   ;;  %v838_v23 = vld [vmem:[%s957_s27 + $0xa8] ss:$12 sps:$4 sm:$0xff]   ;;  %v294_v24 = vld [vmem:[#allocation2] sm:$0x1] }
  0x25   : > { %477 = vmatprep.subr.bf16.mxu0 %v820_v7  ;;  %750 = vmatpush3.bf16.msra.mxu1 %v839_v13  ;;  %v843_v25 = vld [vmem:[%s957_s27 + $0x80] ss:$12 sps:$4 sm:$0xff]   ;;  %v295_v26 = vpack.c.bf16 %v294_v24, %v294_v24  ;;  %v844_v27 = vld [vmem:[%s957_s27 + $0x98] ss:$12 sps:$4 sm:$0xff]   ;;  %v845_v28 = vld [vmem:[%s957_s27 + $0xb0] ss:$12 sps:$4 sm:$0xff]  }
  0x26   : > { %751 = vmatprep.subr.bf16.mxu1 %v897_v3  ;;  %v459_v30 = vshrl.u32 %v458_v29, 7  ;;  %v328_v32 = vld [vmem:[%s962_s6] sm:$0x7] }
  0x27   : > { %v293_v36 = vld [vmem:[%s257_s22] sm:$0x7] }
  0x28   : > { %478 = vmatpush1.bf16.msra.mxu0 %v822_v8  ;;  %v460_v31 = vsub.s32 0, %v459_v30  ;;  %v464_v33 = vsub.s32 1, %v459_v30  ;;  %v562_v41 = vrot.slane %v293_v36, 1  ;;  %v468_v54 = vsub.s32 2, %v459_v30 }
  0x29   : > { %479 = vmatprep.subr.bf16.mxu0 %v823_v9  ;;  %752 = vmatpush3.bf16.msra.mxu1 %v840_v16  ;;  %v572_v59 = vrot.slane %v293_v36, 2 }
  0x2a   : > { %753 = vmatprep.subr.bf16.mxu1 %v897_v3  ;;  %v461_v34 = vrot.slane %v328_v32, %v460_v31  ;;  %v465_v35 = vrot.slane %v328_v32, %v464_v33  ;;  %v469_v55 = vrot.slane %v328_v32, %v468_v54 }
  0x2c   : > { %480 = vmatpush1.bf16.msra.mxu0 %v825_v11 }
  0x2d   : > { %481 = vmatprep.subr.bf16.mxu0 %v826_v12  ;;  %754 = vmatpush3.bf16.msra.mxu1 %v841_v19 }
  0x2e   : > { %755 = vmatprep.subr.bf16.mxu1 %v897_v3 }
  0x30   : > { %482 = vmatpush1.bf16.msra.mxu0 %v828_v14 }
  0x31   : > { %483 = vmatprep.subr.bf16.mxu0 %v829_v15  ;;  %756 = vmatpush3.bf16.msra.mxu1 %v842_v22 }
  0x32   : > { %757 = vmatprep.subr.bf16.mxu1 %v897_v3 }
  0x34   : > { %484 = vmatpush1.bf16.msra.mxu0 %v831_v17 }
  0x35   : > { %485 = vmatprep.subr.bf16.mxu0 %v832_v18  ;;  %758 = vmatpush3.bf16.msra.mxu1 %v843_v25 }
  0x36   : > { %759 = vmatprep.subr.bf16.mxu1 %v897_v3 }
  0x38   : > { %486 = vmatpush1.bf16.msra.mxu0 %v834_v20 }
  0x39   : > { %487 = vmatprep.subr.bf16.mxu0 %v836_v21  ;;  %760 = vmatpush3.bf16.msra.mxu1 %v844_v27 }
  0x3a   : > { %761 = vmatprep.subr.bf16.mxu1 %v897_v3 }
  0x3c   : > { %488 = vmatpush1.bf16.msra.mxu0 %v838_v23 }
  0x3d   : > { %762 = vmatpush3.bf16.msra.mxu1 %v845_v28 }
  0x3f   : > { %506 = vmatmul.mubr.bf16.vlgmr.msra.gmra.mrb[0].mxu0 %v295_v26 }
  0x40   : > { %764 = vmatmul.mubr.bf16.vlgmr.msra.gmra.mrb[0].mxu1 %v295_v26 }
 0x112   : > { %v507_v37 = vpop.f32.mrb[0].mxu0 }
 0x113   : > { %v508_v38 = vadd.f32 %v507_v37, %v461_v34  ;;  %v509_v39 = vpop.f32.mrb[1].mxu0  ;;  %v548_v47 = vpop.f32.mrb[0].mxu1 }
 0x114   : > { %v510_v40 = vadd.f32 %v509_v39, %v465_v35  ;;  %v511_v42 = vpop.f32.mrb[2].mxu0  ;;  %v765_v49 = vpop.f32.mrb[1].mxu1  ;;  %v549_v58 = vadd.f32 %v548_v47, %v469_v55 }
 0x115   : > { %v554_v43 = vadd.f32 %v508_v38, %v293_v36  ;;  %v512_v44 = vpop.f32.mrb[3].mxu0  ;;  %v551_v50 = vpop.f32.mrb[2].mxu1 }
 0x116   : > { %v564_v46 = vadd.f32 %v562_v41, %v510_v40  ;;  %v766_v51 = vpop.f32.mrb[3].mxu1 }
 0x117   : > { %v734_v45 = vmul.f32 -1.442695, %v554_v43 }
 0x118   : > { %v735_v48 = vmul.f32 -1.442695, %v564_v46 }
 0x119   : > { %846 = vpow2.f32 %v734_v45 }
 0x11a   : > { %848 = vpow2.f32 %v735_v48 }
 0x123   : > { %v847_v52 = vpop.eup %846 }
 0x124   : > { %v558_v53 = vadd.f32 1.0, %v847_v52  ;;  %v849_v56 = vpop.eup %848 }
 0x125   : > { %v568_v57 = vadd.f32 1.0, %v849_v56 }
 0x126   : > { %850 = vrcp.f32 %v558_v53 }
 0x127   : > { %852 = vrcp.f32 %v568_v57 }
 0x130   : > { %v851_v60 = vpop.eup %850 }
 0x131   : > { %v571_v61 = vmul.f32 %v851_v60, %v549_v58  ;;  %v853_v63 = vpop.eup %852 }
 0x132   : > { %v576_v0 = vsub.f32 1.0, %v853_v63  ;;  %v578_v2 = vmul.f32 %v853_v63, %v294_v24 }
 0x133   : > { %v574_v62 = vadd.f32 %v572_v59, %v571_v61 }
 0x135   : > { %854 = vtanh.f32 %v574_v62 }
 0x13f   : > { %v855_v1 = vpop.eup %854 }
 0x140   : > { %v577_v3 = vmul.f32 %v855_v1, %v576_v0 }
 0x142   : > { %v579_v4 = vadd.f32 %v578_v2, %v577_v3 }
 0x144   : > { %580 = vst [vmem:[#allocation2] sm:$0x1] %v579_v4  ;;  %581 = vst [vmem:[%s282_s11] sm:$0x1] %v579_v4 }
 0x145 PF: > { %s13_s16 = sadd.s32 1, %s894_s16   ;;  %s1031_s12 = smov %s886_s14 }
 0x146   : > { %p10_p9 = scmp.ge.s32.totalorder %s13_s16, 14   ;;  %s1032_s13 = smov %s890_s15 }
 0x147   : > { %s1033_s14 = smov %s1036_s17  ;;  %s1034_s15 = smov %s1040_s18 }
 0x148   :  { %12 = sbr.rel (!%p10_p9) target bundleno = 3 (0x3), region = 72 }

// kernel: siamese_forward.73
= control target key start
LH: loop header
LB: loop body
LE: loop exit
PB: predicated region body
PF: predicated region fallthrough
CT: control target
= control target key end

     0   :  { %s2773_s0 = inlined_call_operand.vmem [shape: f32[1,768], index: 0, kind: input, shape index: {}]   ;;  %s2774_s1 = inlined_call_operand.vmem [shape: f32[1,768], index: 1, kind: input, shape index: {}]   ;;  %s2775_s2 = inlined_call_operand.vmem [shape: bf16[768,256], index: 2, kind: input, shape index: {}]   ;;  %s2776_s3 = inlined_call_operand.vmem [shape: bf16[768,256], index: 3, kind: input, shape index: {}]   ;;  %s2777_s4 = inlined_call_operand.vmem [shape: f32[1,256], index: 4, kind: input, shape index: {}]   ;;  %s2778_s5 = inlined_call_operand.vmem [shape: f32[1,256], index: 5, kind: input, shape index: {}]   ;;  %s2779_s6 = inlined_call_operand.<no memory space> [shape: f32[1,1], index: 6, kind: input, shape index: {}]   ;;  %s2780_s7 = inlined_call_operand.hbm [shape: f32[1,1], index: 7, kind: output, shape index: {}]  }
   0x1   :  { %v12_v0 = vstv %s2779_s6 }
   0x2   :  { %13 = vst [vmem:[#allocation2] sm:$0x1] %v12_v0 }
   0x3   :  { %v1757_v1 = vld [vmem:[%s2776_s3 + $0x4] ss:$8 sps:$4 sm:$0xff]   ;;  %v1761_v3 = vld [vmem:[%s2776_s3] ss:$8 sps:$4 sm:$0xff]   ;;  %v1763_v5 = vld [vmem:[%s2776_s3 + $0x14] ss:$8 sps:$4 sm:$0xff]   ;;  %v31_v37 = vlaneseq }
   0x4   :  { %v1759_v2 = vld [vmem:[%s2776_s3 + $0x104] ss:$8 sps:$4 sm:$0xff]   ;;  %777 = vmatprep.subr.bf16.mxu0 %v1757_v1  ;;  %v1762_v4 = vld [vmem:[%s2776_s3 + $0x100] ss:$8 sps:$4 sm:$0xff]   ;;  %v1765_v6 = vld [vmem:[%s2776_s3 + $0x114] ss:$8 sps:$4 sm:$0xff]  }
   0x5   :  { %818 = vmatprep.subr.bf16.mxu1 %v1759_v2  ;;  %778 = vmatpush1.bf16.msra.mxu0 %v1761_v3  ;;  %v1767_v7 = vld [vmem:[%s2776_s3 + $0x10] ss:$8 sps:$4 sm:$0xff]   ;;  %v1769_v9 = vld [vmem:[%s2776_s3 + $0x24] ss:$8 sps:$4 sm:$0xff]   ;;  %v1773_v11 = vld [vmem:[%s2776_s3 + $0x20] ss:$8 sps:$4 sm:$0xff]  }
   0x6   :  { %819 = vmatpush1.bf16.msra.mxu1 %v1762_v4  ;;  %779 = vmatprep.subr.bf16.mxu0 %v1763_v5  ;;  %v1768_v8 = vld [vmem:[%s2776_s3 + $0x110] ss:$8 sps:$4 sm:$0xff]   ;;  %v1771_v10 = vld [vmem:[%s2776_s3 + $0x124] ss:$8 sps:$4 sm:$0xff]   ;;  %v1774_v12 = vld [vmem:[%s2776_s3 + $0x120] ss:$8 sps:$4 sm:$0xff]  }
   0x7   :  { %820 = vmatprep.subr.bf16.mxu1 %v1765_v6  ;;  %v1775_v13 = vld [vmem:[%s2776_s3 + $0x34] ss:$8 sps:$4 sm:$0xff]   ;;  %v1779_v15 = vld [vmem:[%s2776_s3 + $0x30] ss:$8 sps:$4 sm:$0xff]   ;;  %v1781_v17 = vld [vmem:[%s2776_s3 + $0x44] ss:$8 sps:$4 sm:$0xff]  }
   0x8   :  { %v1777_v14 = vld [vmem:[%s2776_s3 + $0x134] ss:$8 sps:$4 sm:$0xff]   ;;  %v1780_v16 = vld [vmem:[%s2776_s3 + $0x130] ss:$8 sps:$4 sm:$0xff]   ;;  %v1783_v18 = vld [vmem:[%s2776_s3 + $0x144] ss:$8 sps:$4 sm:$0xff]  }
   0x9   :  { %780 = vmatpush1.bf16.msra.mxu0 %v1767_v7  ;;  %v1785_v19 = vld [vmem:[%s2776_s3 + $0x40] ss:$8 sps:$4 sm:$0xff]   ;;  %v1787_v21 = vld [vmem:[%s2776_s3 + $0x54] ss:$8 sps:$4 sm:$0xff]   ;;  %v1791_v23 = vld [vmem:[%s2776_s3 + $0x50] ss:$8 sps:$4 sm:$0xff]  }
   0xa   :  { %821 = vmatpush1.bf16.msra.mxu1 %v1768_v8  ;;  %781 = vmatprep.subr.bf16.mxu0 %v1769_v9  ;;  %v1786_v20 = vld [vmem:[%s2776_s3 + $0x140] ss:$8 sps:$4 sm:$0xff]   ;;  %v1789_v22 = vld [vmem:[%s2776_s3 + $0x154] ss:$8 sps:$4 sm:$0xff]   ;;  %v1792_v24 = vld [vmem:[%s2776_s3 + $0x150] ss:$8 sps:$4 sm:$0xff]  }
   0xb   :  { %822 = vmatprep.subr.bf16.mxu1 %v1771_v10  ;;  %v1793_v25 = vld [vmem:[%s2776_s3 + $0x64] ss:$8 sps:$4 sm:$0xff]   ;;  %v1797_v27 = vld [vmem:[%s2776_s3 + $0x60] ss:$8 sps:$4 sm:$0xff]   ;;  %v1799_v29 = vld [vmem:[%s2776_s3 + $0x74] ss:$8 sps:$4 sm:$0xff]  }
   0xc   :  { %v1795_v26 = vld [vmem:[%s2776_s3 + $0x164] ss:$8 sps:$4 sm:$0xff]   ;;  %v1798_v28 = vld [vmem:[%s2776_s3 + $0x160] ss:$8 sps:$4 sm:$0xff]   ;;  %v1801_v30 = vld [vmem:[%s2776_s3 + $0x174] ss:$8 sps:$4 sm:$0xff]  }
   0xd   :  { %782 = vmatpush1.bf16.msra.mxu0 %v1773_v11  ;;  %v1803_v31 = vld [vmem:[%s2776_s3 + $0x70] ss:$8 sps:$4 sm:$0xff]   ;;  %v1805_v33 = vld [vmem:[%s2776_s3 + $0x84] ss:$8 sps:$4 sm:$0xff]   ;;  %v1809_v35 = vld [vmem:[%s2776_s3 + $0x80] ss:$8 sps:$4 sm:$0xff]  }
   0xe   :  { %823 = vmatpush1.bf16.msra.mxu1 %v1774_v12  ;;  %783 = vmatprep.subr.bf16.mxu0 %v1775_v13  ;;  %v1804_v32 = vld [vmem:[%s2776_s3 + $0x170] ss:$8 sps:$4 sm:$0xff]   ;;  %v1807_v34 = vld [vmem:[%s2776_s3 + $0x184] ss:$8 sps:$4 sm:$0xff]   ;;  %v1810_v36 = vld [vmem:[%s2776_s3 + $0x180] ss:$8 sps:$4 sm:$0xff]  }
   0xf   :  { %824 = vmatprep.subr.bf16.mxu1 %v1777_v14  ;;  %v1811_v38 = vld [vmem:[%s2776_s3 + $0x94] ss:$8 sps:$4 sm:$0xff]   ;;  %v1815_v40 = vld [vmem:[%s2776_s3 + $0x90] ss:$8 sps:$4 sm:$0xff]   ;;  %v2234_v41 = vshrl.u32 %v31_v37, 7 }
  0x10   :  { %v1813_v39 = vld [vmem:[%s2776_s3 + $0x194] ss:$8 sps:$4 sm:$0xff]   ;;  %v1816_v42 = vld [vmem:[%s2776_s3 + $0x190] ss:$8 sps:$4 sm:$0xff]   ;;  %v1817_v43 = vld [vmem:[%s2776_s3 + $0xa4] ss:$8 sps:$4 sm:$0xff]  }
  0x11   :  { %784 = vmatpush1.bf16.msra.mxu0 %v1779_v15  ;;  %v1819_v44 = vld [vmem:[%s2776_s3 + $0x1a4] ss:$8 sps:$4 sm:$0xff]   ;;  %v1821_v45 = vld [vmem:[%s2776_s3 + $0xa0] ss:$8 sps:$4 sm:$0xff]   ;;  %v2252_v47 = vsub.s32 1, %v2234_v41  ;;  %v45_v48 = vsub.s32 3, %v2234_v41 }
  0x12   :  { %825 = vmatpush1.bf16.msra.mxu1 %v1780_v16  ;;  %785 = vmatprep.subr.bf16.mxu0 %v1781_v17  ;;  %v1822_v46 = vld [vmem:[%s2776_s3 + $0x1a0] ss:$8 sps:$4 sm:$0xff]   ;;  %v1823_v49 = vld [vmem:[%s2776_s3 + $0xb4] ss:$8 sps:$4 sm:$0xff]   ;;  %v49_v50 = vsub.s32 4, %v2234_v41  ;;  %v2312_v7 = vsub.s32 0, %v2234_v41 }
  0x13   :  { %826 = vmatprep.subr.bf16.mxu1 %v1783_v18  ;;  %v1825_v51 = vld [vmem:[%s2776_s3 + $0x1b4] ss:$8 sps:$4 sm:$0xff]   ;;  %v163_v52 = vld [vmem:[%s2774_s1] sm:$0x3f]  ;;  %v1827_v53 = vld [vmem:[%s2776_s3 + $0xb0] ss:$8 sps:$4 sm:$0xff]  }
  0x14   :  { %v172_v54 = vrot.slane %v163_v52, %v2252_v47  ;;  %v180_v55 = vrot.slane %v163_v52, %v45_v48  ;;  %v1828_v56 = vld [vmem:[%s2776_s3 + $0x1b0] ss:$8 sps:$4 sm:$0xff]   ;;  %v2276_v57 = vrot.slane %v163_v52, %v49_v50  ;;  %v1829_v58 = vld [vmem:[%s2776_s3 + $0xc4] ss:$8 sps:$4 sm:$0xff]   ;;  %v1833_v62 = vld [vmem:[%s2776_s3 + $0xc0] ss:$8 sps:$4 sm:$0xff]   ;;  %v168_v14 = vrot.slane %v163_v52, %v2312_v7 }
  0x15   :  { %786 = vmatpush1.bf16.msra.mxu0 %v1785_v19  ;;  %v1831_v59 = vld [vmem:[%s2776_s3 + $0x1c4] ss:$8 sps:$4 sm:$0xff]   ;;  %v1834_v63 = vld [vmem:[%s2776_s3 + $0x1c0] ss:$8 sps:$4 sm:$0xff]   ;;  %v1835_v0 = vld [vmem:[%s2776_s3 + $0xd4] ss:$8 sps:$4 sm:$0xff]  }
  0x16   :  { %827 = vmatpush1.bf16.msra.mxu1 %v1786_v20  ;;  %787 = vmatprep.subr.bf16.mxu0 %v1787_v21  ;;  %v196_v60 = vpack.c.bf16 %v172_v54, %v172_v54  ;;  %v198_v61 = vpack.c.bf16 %v180_v55, %v180_v55  ;;  %v1837_v1 = vld [vmem:[%s2776_s3 + $0x1d4] ss:$8 sps:$4 sm:$0xff]   ;;  %v1839_v2 = vld [vmem:[%s2776_s3 + $0xd0] ss:$8 sps:$4 sm:$0xff]   ;;  %v1841_v4 = vld [vmem:[%s2776_s3 + $0xe4] ss:$8 sps:$4 sm:$0xff]   ;;  %v195_v20 = vpack.c.bf16 %v168_v14, %v168_v14 }
  0x17   :  { %828 = vmatprep.subr.bf16.mxu1 %v1789_v22  ;;  %v1840_v3 = vld [vmem:[%s2776_s3 + $0x1d0] ss:$8 sps:$4 sm:$0xff]   ;;  %v1843_v5 = vld [vmem:[%s2776_s3 + $0x1e4] ss:$8 sps:$4 sm:$0xff]   ;;  %v1845_v6 = vld [vmem:[%s2776_s3 + $0xe0] ss:$8 sps:$4 sm:$0xff]  }
  0x18   :  { %809 = vmatprep.mubr.bf16.mxu0 %v196_v60  ;;  %850 = vmatprep.mubr.bf16.mxu1 %v198_v61  ;;  %v41_v8 = vsub.s32 2, %v2234_v41  ;;  %v1846_v9 = vld [vmem:[%s2776_s3 + $0x1e0] ss:$8 sps:$4 sm:$0xff]   ;;  %v1847_v10 = vld [vmem:[%s2776_s3 + $0xf4] ss:$8 sps:$4 sm:$0xff]   ;;  %v53_v12 = vsub.s32 5, %v2234_v41 }
  0x19   :  { %788 = vmatpush1.bf16.msra.mxu0 %v1791_v23  ;;  %v1849_v11 = vld [vmem:[%s2776_s3 + $0x1f4] ss:$8 sps:$4 sm:$0xff]   ;;  %v1851_v13 = vld [vmem:[%s2776_s3 + $0xf0] ss:$8 sps:$4 sm:$0xff]   ;;  %v1855_v17 = vld [vmem:[%s2776_s3 + $0x204] ss:$8 sps:$4 sm:$0xff]  }
  0x1a   :  { %829 = vmatpush1.bf16.msra.mxu1 %v1792_v24  ;;  %789 = vmatprep.subr.bf16.mxu0 %v1793_v25  ;;  %v176_v15 = vrot.slane %v163_v52, %v41_v8  ;;  %v1852_v16 = vld [vmem:[%s2776_s3 + $0x1f0] ss:$8 sps:$4 sm:$0xff]   ;;  %v1858_v18 = vld [vmem:[%s2775_s2 + $0x4] ss:$8 sps:$4 sm:$0xff]   ;;  %v188_v19 = vrot.slane %v163_v52, %v53_v12  ;;  %v1853_v22 = vld [vmem:[%s2776_s3 + $0x200] ss:$8 sps:$4 sm:$0xff]  }
  0x1b   :  { %830 = vmatprep.subr.bf16.mxu1 %v1795_v26  ;;  %v1856_v23 = vld [vmem:[%s2775_s2] ss:$8 sps:$4 sm:$0xff]   ;;  %v1861_v24 = vld [vmem:[%s2776_s3 + $0x214] ss:$8 sps:$4 sm:$0xff]   ;;  %v1879_v37 = vld [vmem:[%s2776_s3 + $0x244] ss:$8 sps:$4 sm:$0xff]  }
  0x1c   :  { %v197_v21 = vpack.c.bf16 %v176_v15, %v176_v15  ;;  %v1864_v25 = vld [vmem:[%s2775_s2 + $0x14] ss:$8 sps:$4 sm:$0xff]   ;;  %v200_v26 = vpack.c.bf16 %v188_v19, %v188_v19  ;;  %v1889_v55 = vld [vmem:[%s2776_s3 + $0x260] ss:$8 sps:$4 sm:$0xff]   ;;  %v1895_v60 = vld [vmem:[%s2776_s3 + $0x270] ss:$8 sps:$4 sm:$0xff]  }
  0x1d   :  { %790 = vmatpush1.bf16.msra.mxu0 %v1797_v27  ;;  %v1859_v27 = vld [vmem:[%s2776_s3 + $0x210] ss:$8 sps:$4 sm:$0xff]   ;;  %v1928_v19 = vld [vmem:[%s2775_s2 + $0xc0] ss:$8 sps:$4 sm:$0xff]  }
  0x1e   :  { %831 = vmatpush1.bf16.msra.mxu1 %v1798_v28  ;;  %791 = vmatprep.subr.bf16.mxu0 %v1799_v29  ;;  %v1862_v28 = vld [vmem:[%s2775_s2 + $0x10] ss:$8 sps:$4 sm:$0xff]   ;;  %v1867_v29 = vld [vmem:[%s2776_s3 + $0x224] ss:$8 sps:$4 sm:$0xff]  }
  0x1f   :  { %832 = vmatprep.subr.bf16.mxu1 %v1801_v30  ;;  %v1870_v30 = vld [vmem:[%s2775_s2 + $0x24] ss:$8 sps:$4 sm:$0xff]   ;;  %v1898_v61 = vld [vmem:[%s2775_s2 + $0x70] ss:$8 sps:$4 sm:$0xff]  }
  0x20   :  { %v1919_v14 = vld [vmem:[%s2776_s3 + $0x2b0] ss:$8 sps:$4 sm:$0xff]  }
  0x21   :  { %792 = vmatpush1.bf16.msra.mxu0 %v1803_v31  ;;  %v1865_v31 = vld [vmem:[%s2776_s3 + $0x220] ss:$8 sps:$4 sm:$0xff]   ;;  %v1922_v15 = vld [vmem:[%s2775_s2 + $0xb0] ss:$8 sps:$4 sm:$0xff]  }
  0x22   :  { %833 = vmatpush1.bf16.msra.mxu1 %v1804_v32  ;;  %793 = vmatprep.subr.bf16.mxu0 %v1805_v33  ;;  %v1868_v32 = vld [vmem:[%s2775_s2 + $0x20] ss:$8 sps:$4 sm:$0xff]   ;;  %v1873_v33 = vld [vmem:[%s2776_s3 + $0x234] ss:$8 sps:$4 sm:$0xff]  }
  0x23   :  { %834 = vmatprep.subr.bf16.mxu1 %v1807_v34  ;;  %v1876_v34 = vld [vmem:[%s2775_s2 + $0x34] ss:$8 sps:$4 sm:$0xff]  }
  0x25   :  { %794 = vmatpush1.bf16.msra.mxu0 %v1809_v35  ;;  %v1871_v35 = vld [vmem:[%s2776_s3 + $0x230] ss:$8 sps:$4 sm:$0xff]  }
  0x26   :  { %835 = vmatpush1.bf16.msra.mxu1 %v1810_v36  ;;  %795 = vmatprep.subr.bf16.mxu0 %v1811_v38  ;;  %v1874_v36 = vld [vmem:[%s2775_s2 + $0x30] ss:$8 sps:$4 sm:$0xff]   ;;  %v1882_v38 = vld [vmem:[%s2775_s2 + $0x44] ss:$8 sps:$4 sm:$0xff]  }
  0x27   :  { %836 = vmatprep.subr.bf16.mxu1 %v1813_v39  ;;  %v1877_v39 = vld [vmem:[%s2776_s3 + $0x240] ss:$8 sps:$4 sm:$0xff]  }
  0x29   :  { %796 = vmatpush1.bf16.msra.mxu0 %v1815_v40  ;;  %v1880_v40 = vld [vmem:[%s2775_s2 + $0x40] ss:$8 sps:$4 sm:$0xff]  }
  0x2a   :  { %837 = vmatpush1.bf16.msra.mxu1 %v1816_v42  ;;  %797 = vmatprep.subr.bf16.mxu0 %v1817_v43  ;;  %v1885_v42 = vld [vmem:[%s2776_s3 + $0x254] ss:$8 sps:$4 sm:$0xff]  }
  0x2b   :  { %838 = vmatprep.subr.bf16.mxu1 %v1819_v44  ;;  %v1888_v43 = vld [vmem:[%s2775_s2 + $0x54] ss:$8 sps:$4 sm:$0xff]   ;;  %v1883_v44 = vld [vmem:[%s2776_s3 + $0x250] ss:$8 sps:$4 sm:$0xff]  }
  0x2d   :  { %798 = vmatpush1.bf16.msra.mxu0 %v1821_v45  ;;  %v1886_v45 = vld [vmem:[%s2775_s2 + $0x50] ss:$8 sps:$4 sm:$0xff]  }
  0x2e   :  { %839 = vmatpush1.bf16.msra.mxu1 %v1822_v46  ;;  %799 = vmatprep.subr.bf16.mxu0 %v1823_v49  ;;  %v1891_v46 = vld [vmem:[%s2776_s3 + $0x264] ss:$8 sps:$4 sm:$0xff]  }
  0x2f   :  { %840 = vmatprep.subr.bf16.mxu1 %v1825_v51  ;;  %v1894_v49 = vld [vmem:[%s2775_s2 + $0x64] ss:$8 sps:$4 sm:$0xff]  }
  0x30   :  { %v2417_v51 = vld [vmem:[%s2773_s0] sm:$0x3f] }
  0x31   :  { %800 = vmatpush1.bf16.msra.mxu0 %v1827_v53  ;;  %v38_v52 = vrot.slane %v2417_v51, %v2252_v47  ;;  %v2424_v53 = vrot.slane %v2417_v51, %v41_v8  ;;  %v2429_v54 = vrot.slane %v2417_v51, %v49_v50  ;;  %v1900_v50 = vld [vmem:[%s2775_s2 + $0x74] ss:$8 sps:$4 sm:$0xff]   ;;  %v1918_v8 = vld [vmem:[%s2775_s2 + $0xa4] ss:$8 sps:$4 sm:$0xff]  }
  0x32   :  { %841 = vmatpush1.bf16.msra.mxu1 %v1828_v56  ;;  %801 = vmatprep.subr.bf16.mxu0 %v1829_v58  ;;  %v1892_v56 = vld [vmem:[%s2775_s2 + $0x60] ss:$8 sps:$4 sm:$0xff]  }
  0x33   :  { %842 = vmatprep.subr.bf16.mxu1 %v1831_v59  ;;  %v62_v58 = vpack.c.bf16 %v38_v52, %v38_v52  ;;  %v1897_v59 = vld [vmem:[%s2776_s3 + $0x274] ss:$8 sps:$4 sm:$0xff]  }
  0x35   :  { %802 = vmatpush1.bf16.msra.mxu0 %v1833_v62  ;;  %v1903_v62 = vld [vmem:[%s2776_s3 + $0x284] ss:$8 sps:$4 sm:$0xff]  }
  0x36   :  { %843 = vmatpush1.bf16.msra.mxu1 %v1834_v63  ;;  %803 = vmatprep.subr.bf16.mxu0 %v1835_v0  ;;  %v1906_v63 = vld [vmem:[%s2775_s2 + $0x84] ss:$8 sps:$4 sm:$0xff]   ;;  %v1901_v0 = vld [vmem:[%s2776_s3 + $0x280] ss:$8 sps:$4 sm:$0xff]  }
  0x37   :  { %844 = vmatprep.subr.bf16.mxu1 %v1837_v1  ;;  %v1904_v1 = vld [vmem:[%s2775_s2 + $0x80] ss:$8 sps:$4 sm:$0xff]  }
  0x39   :  { %804 = vmatpush1.bf16.msra.mxu0 %v1839_v2  ;;  %v1909_v2 = vld [vmem:[%s2776_s3 + $0x294] ss:$8 sps:$4 sm:$0xff]  }
  0x3a   :  { %845 = vmatpush1.bf16.msra.mxu1 %v1840_v3  ;;  %805 = vmatprep.subr.bf16.mxu0 %v1841_v4  ;;  %v1912_v3 = vld [vmem:[%s2775_s2 + $0x94] ss:$8 sps:$4 sm:$0xff]   ;;  %v1907_v4 = vld [vmem:[%s2776_s3 + $0x290] ss:$8 sps:$4 sm:$0xff]  }
  0x3b   :  { %846 = vmatprep.subr.bf16.mxu1 %v1843_v5  ;;  %v1910_v5 = vld [vmem:[%s2775_s2 + $0x90] ss:$8 sps:$4 sm:$0xff]  }
  0x3d   :  { %806 = vmatpush1.bf16.msra.mxu0 %v1845_v6  ;;  %v1915_v6 = vld [vmem:[%s2776_s3 + $0x2a4] ss:$8 sps:$4 sm:$0xff]  }
  0x3e   :  { %847 = vmatpush1.bf16.msra.mxu1 %v1846_v9  ;;  %807 = vmatprep.subr.bf16.mxu0 %v1847_v10  ;;  %v1913_v9 = vld [vmem:[%s2776_s3 + $0x2a0] ss:$8 sps:$4 sm:$0xff]  }
  0x3f   :  { %848 = vmatprep.subr.bf16.mxu1 %v1849_v11  ;;  %v1916_v10 = vld [vmem:[%s2775_s2 + $0xa0] ss:$8 sps:$4 sm:$0xff]   ;;  %v1921_v11 = vld [vmem:[%s2776_s3 + $0x2b4] ss:$8 sps:$4 sm:$0xff]  }
  0x41   :  { %808 = vmatpush1.bf16.msra.mxu0 %v1851_v13  ;;  %v1924_v13 = vld [vmem:[%s2775_s2 + $0xb4] ss:$8 sps:$4 sm:$0xff]  }
  0x42   :  { %849 = vmatpush1.bf16.msra.mxu1 %v1852_v16  ;;  %859 = vmatprep.subr.bf16.mxu0 %v1855_v17  ;;  %v1927_v16 = vld [vmem:[%s2776_s3 + $0x2c4] ss:$8 sps:$4 sm:$0xff]  }
  0x43   :  { %1380 = vmatprep.subr.bf16.mxu1 %v1858_v18  ;;  %v1930_v17 = vld [vmem:[%s2775_s2 + $0xc4] ss:$8 sps:$4 sm:$0xff]   ;;  %v1925_v18 = vld [vmem:[%s2776_s3 + $0x2c0] ss:$8 sps:$4 sm:$0xff]  }
  0x44   :  { %810 = vmatmul.mubr.bf16.vlgmr.msra.gmra.mrb[0].mxu0 %v195_v20  ;;  %v1933_v20 = vld [vmem:[%s2776_s3 + $0x2d4] ss:$8 sps:$4 sm:$0xff]  }
  0x45   :  { %851 = vmatmul.mubr.bf16.vlgmr.msra.gmra.mrb[0].mxu1 %v197_v21  ;;  %860 = vmatpush1.bf16.msra.mxu0 %v1853_v22  ;;  %v1936_v21 = vld [vmem:[%s2775_s2 + $0xd4] ss:$8 sps:$4 sm:$0xff]   ;;  %v1931_v22 = vld [vmem:[%s2776_s3 + $0x2d0] ss:$8 sps:$4 sm:$0xff]  }
  0x46   :  { %1381 = vmatpush1.bf16.msra.mxu1 %v1856_v23  ;;  %861 = vmatprep.subr.bf16.mxu0 %v1861_v24  ;;  %v1934_v23 = vld [vmem:[%s2775_s2 + $0xd0] ss:$8 sps:$4 sm:$0xff]   ;;  %v1939_v24 = vld [vmem:[%s2776_s3 + $0x2e4] ss:$8 sps:$4 sm:$0xff]  }
  0x47   :  { %1382 = vmatprep.subr.bf16.mxu1 %v1864_v25  ;;  %891 = vmatprep.mubr.bf16.mxu0 %v200_v26  ;;  %v1942_v25 = vld [vmem:[%s2775_s2 + $0xe4] ss:$8 sps:$4 sm:$0xff]   ;;  %v1937_v26 = vld [vmem:[%s2776_s3 + $0x2e0] ss:$8 sps:$4 sm:$0xff]  }
  0x48   :  { %1412 = vmatprep.mubr.bf16.mxu1 %v62_v58 }
  0x49   :  { %862 = vmatpush1.bf16.msra.mxu0 %v1859_v27  ;;  %v1940_v27 = vld [vmem:[%s2775_s2 + $0xe0] ss:$8 sps:$4 sm:$0xff]  }
  0x4a   :  { %1383 = vmatpush1.bf16.msra.mxu1 %v1862_v28  ;;  %863 = vmatprep.subr.bf16.mxu0 %v1867_v29  ;;  %v1945_v28 = vld [vmem:[%s2776_s3 + $0x2f4] ss:$8 sps:$4 sm:$0xff]  }
  0x4b   :  { %1384 = vmatprep.subr.bf16.mxu1 %v1870_v30  ;;  %v1948_v29 = vld [vmem:[%s2775_s2 + $0xf4] ss:$8 sps:$4 sm:$0xff]   ;;  %v34_v30 = vrot.slane %v2417_v51, %v2312_v7 }
  0x4d   :  { %864 = vmatpush1.bf16.msra.mxu0 %v1865_v31  ;;  %v1943_v31 = vld [vmem:[%s2776_s3 + $0x2f0] ss:$8 sps:$4 sm:$0xff]  }
  0x4e   :  { %1385 = vmatpush1.bf16.msra.mxu1 %v1868_v32  ;;  %865 = vmatprep.subr.bf16.mxu0 %v1873_v33  ;;  %v1946_v32 = vld [vmem:[%s2775_s2 + $0xf0] ss:$8 sps:$4 sm:$0xff]   ;;  %v1951_v33 = vld [vmem:[%s2775_s2 + $0x104] ss:$8 sps:$4 sm:$0xff]  }
  0x4f   :  { %1386 = vmatprep.subr.bf16.mxu1 %v1876_v34  ;;  %v1954_v34 = vld [vmem:[%s2775_s2 + $0x204] ss:$8 sps:$4 sm:$0xff]  }
  0x51   :  { %866 = vmatpush1.bf16.msra.mxu0 %v1871_v35  ;;  %v46_v35 = vrot.slane %v2417_v51, %v45_v48 }
  0x52   :  { %1387 = vmatpush1.bf16.msra.mxu1 %v1874_v36  ;;  %867 = vmatprep.subr.bf16.mxu0 %v1879_v37  ;;  %v54_v36 = vrot.slane %v2417_v51, %v53_v12  ;;  %v199_v37 = vpack.c.bf16 %v2276_v57, %v2276_v57 }
  0x53   :  { %1388 = vmatprep.subr.bf16.mxu1 %v1882_v38  ;;  %v61_v38 = vpack.c.bf16 %v34_v30, %v34_v30 }
  0x55   :  { %868 = vmatpush1.bf16.msra.mxu0 %v1877_v39  ;;  %v1949_v39 = vld [vmem:[%s2775_s2 + $0x100] ss:$8 sps:$4 sm:$0xff]  }
  0x56   :  { %1389 = vmatpush1.bf16.msra.mxu1 %v1880_v40  ;;  %869 = vmatprep.subr.bf16.mxu0 %v1885_v42  ;;  %v1952_v40 = vld [vmem:[%s2775_s2 + $0x200] ss:$8 sps:$4 sm:$0xff]  }
  0x57   :  { %1390 = vmatprep.subr.bf16.mxu1 %v1888_v43 }
  0x59   :  { %870 = vmatpush1.bf16.msra.mxu0 %v1883_v44 }
  0x5a   :  { %1391 = vmatpush1.bf16.msra.mxu1 %v1886_v45  ;;  %871 = vmatprep.subr.bf16.mxu0 %v1891_v46 }
  0x5b   :  { %1392 = vmatprep.subr.bf16.mxu1 %v1894_v49 }
  0x5d   :  { %872 = vmatpush1.bf16.msra.mxu0 %v1889_v55 }
  0x5e   :  { %1393 = vmatpush1.bf16.msra.mxu1 %v1892_v56  ;;  %873 = vmatprep.subr.bf16.mxu0 %v1897_v59 }
  0x5f   :  { %1394 = vmatprep.subr.bf16.mxu1 %v1900_v50 }
  0x61   :  { %874 = vmatpush1.bf16.msra.mxu0 %v1895_v60 }
  0x62   :  { %1395 = vmatpush1.bf16.msra.mxu1 %v1898_v61  ;;  %875 = vmatprep.subr.bf16.mxu0 %v1903_v62 }
  0x63   :  { %1396 = vmatprep.subr.bf16.mxu1 %v1906_v63 }
  0x65   :  { %876 = vmatpush1.bf16.msra.mxu0 %v1901_v0 }
  0x66   :  { %1397 = vmatpush1.bf16.msra.mxu1 %v1904_v1  ;;  %877 = vmatprep.subr.bf16.mxu0 %v1909_v2 }
  0x67   :  { %1398 = vmatprep.subr.bf16.mxu1 %v1912_v3 }
  0x69   :  { %878 = vmatpush1.bf16.msra.mxu0 %v1907_v4 }
  0x6a   :  { %1399 = vmatpush1.bf16.msra.mxu1 %v1910_v5  ;;  %879 = vmatprep.subr.bf16.mxu0 %v1915_v6 }
  0x6b   :  { %1400 = vmatprep.subr.bf16.mxu1 %v1918_v8 }
  0x6d   :  { %880 = vmatpush1.bf16.msra.mxu0 %v1913_v9 }
  0x6e   :  { %1401 = vmatpush1.bf16.msra.mxu1 %v1916_v10  ;;  %881 = vmatprep.subr.bf16.mxu0 %v1921_v11 }
  0x6f   :  { %1402 = vmatprep.subr.bf16.mxu1 %v1924_v13 }
  0x71   :  { %882 = vmatpush1.bf16.msra.mxu0 %v1919_v14 }
  0x72   :  { %1403 = vmatpush1.bf16.msra.mxu1 %v1922_v15  ;;  %883 = vmatprep.subr.bf16.mxu0 %v1927_v16 }
  0x73   :  { %1404 = vmatprep.subr.bf16.mxu1 %v1930_v17 }
  0x75   :  { %884 = vmatpush1.bf16.msra.mxu0 %v1925_v18 }
  0x76   :  { %1405 = vmatpush1.bf16.msra.mxu1 %v1928_v19  ;;  %885 = vmatprep.subr.bf16.mxu0 %v1933_v20 }
  0x77   :  { %1406 = vmatprep.subr.bf16.mxu1 %v1936_v21 }
  0x79   :  { %886 = vmatpush1.bf16.msra.mxu0 %v1931_v22 }
  0x7a   :  { %1407 = vmatpush1.bf16.msra.mxu1 %v1934_v23  ;;  %887 = vmatprep.subr.bf16.mxu0 %v1939_v24 }
  0x7b   :  { %1408 = vmatprep.subr.bf16.mxu1 %v1942_v25 }
  0x7d   :  { %888 = vmatpush1.bf16.msra.mxu0 %v1937_v26 }
  0x7e   :  { %1409 = vmatpush1.bf16.msra.mxu1 %v1940_v27  ;;  %889 = vmatprep.subr.bf16.mxu0 %v1945_v28 }
  0x7f   :  { %1410 = vmatprep.subr.bf16.mxu1 %v1948_v29 }
  0x81   :  { %890 = vmatpush1.bf16.msra.mxu0 %v1943_v31 }
  0x82   :  { %1411 = vmatpush1.bf16.msra.mxu1 %v1946_v32 }
  0x83   :  { %14 = vsyncpa [#allocation4], 0  ;;  %1421 = vmatprep.subr.bf16.mxu0 %v1951_v33  ;;  %1462 = vmatprep.subr.bf16.mxu1 %v1954_v34  ;;  %v1957_v41 = vld [vmem:[%s2775_s2 + $0x114] ss:$8 sps:$4 sm:$0xff]   ;;  %v64_v57 = vpack.c.bf16 %v46_v35, %v46_v35  ;;  %v66_v12 = vpack.c.bf16 %v54_v36, %v54_v36  ;;  %v1955_v42 = vld [vmem:[%s2775_s2 + $0x110] ss:$8 sps:$4 sm:$0xff]  }
  0x84   :  { %v1960_v48 = vld [vmem:[%s2775_s2 + $0x214] ss:$8 sps:$4 sm:$0xff]   ;;  %892 = vmatmul.mubr.bf16.vlgmr.msra.gmra.mrb[4].mxu0 %v199_v37  ;;  %v1958_v43 = vld [vmem:[%s2775_s2 + $0x210] ss:$8 sps:$4 sm:$0xff]   ;;  %v1963_v44 = vld [vmem:[%s2775_s2 + $0x124] ss:$8 sps:$4 sm:$0xff]  }
  0x85   :  { %1413 = vmatmul.mubr.bf16.vlgmr.msra.gmra.mrb[4].mxu1 %v61_v38  ;;  %1422 = vmatpush1.bf16.msra.mxu0 %v1949_v39  ;;  %v1966_v45 = vld [vmem:[%s2775_s2 + $0x224] ss:$8 sps:$4 sm:$0xff]   ;;  %v1961_v46 = vld [vmem:[%s2775_s2 + $0x120] ss:$8 sps:$4 sm:$0xff]   ;;  %v1969_v51 = vld [vmem:[%s2775_s2 + $0x134] ss:$8 sps:$4 sm:$0xff]  }
  0x86   :  { %1463 = vmatpush1.bf16.msra.mxu1 %v1952_v40  ;;  %1423 = vmatprep.subr.bf16.mxu0 %v1957_v41  ;;  %v1964_v49 = vld [vmem:[%s2775_s2 + $0x220] ss:$8 sps:$4 sm:$0xff]   ;;  %v1972_v52 = vld [vmem:[%s2775_s2 + $0x234] ss:$8 sps:$4 sm:$0xff]   ;;  %v1967_v55 = vld [vmem:[%s2775_s2 + $0x130] ss:$8 sps:$4 sm:$0xff]  }
  0x87   :  { %1464 = vmatprep.subr.bf16.mxu1 %v1960_v48  ;;  %1453 = vmatprep.mubr.bf16.mxu0 %v64_v57  ;;  %v1970_v56 = vld [vmem:[%s2775_s2 + $0x230] ss:$8 sps:$4 sm:$0xff]   ;;  %v1975_v58 = vld [vmem:[%s2775_s2 + $0x144] ss:$8 sps:$4 sm:$0xff]   ;;  %v1973_v50 = vld [vmem:[%s2775_s2 + $0x140] ss:$8 sps:$4 sm:$0xff]   ;;  %v63_v57 = vpack.c.bf16 %v2424_v53, %v2424_v53 }
  0x88   :  { %1494 = vmatprep.mubr.bf16.mxu1 %v66_v12  ;;  %v1978_v59 = vld [vmem:[%s2775_s2 + $0x244] ss:$8 sps:$4 sm:$0xff]   ;;  %v1976_v60 = vld [vmem:[%s2775_s2 + $0x240] ss:$8 sps:$4 sm:$0xff]   ;;  %v1981_v61 = vld [vmem:[%s2775_s2 + $0x154] ss:$8 sps:$4 sm:$0xff]   ;;  %v65_v12 = vpack.c.bf16 %v2429_v54, %v2429_v54 }
  0x89   :  { %1424 = vmatpush1.bf16.msra.mxu0 %v1955_v42  ;;  %v1984_v62 = vld [vmem:[%s2775_s2 + $0x254] ss:$8 sps:$4 sm:$0xff]   ;;  %v1979_v63 = vld [vmem:[%s2775_s2 + $0x150] ss:$8 sps:$4 sm:$0xff]   ;;  %v1987_v1 = vld [vmem:[%s2775_s2 + $0x164] ss:$8 sps:$4 sm:$0xff]  }
  0x8a   :  { %1465 = vmatpush1.bf16.msra.mxu1 %v1958_v43  ;;  %1425 = vmatprep.subr.bf16.mxu0 %v1963_v44  ;;  %v1982_v0 = vld [vmem:[%s2775_s2 + $0x250] ss:$8 sps:$4 sm:$0xff]   ;;  %v1990_v2 = vld [vmem:[%s2775_s2 + $0x264] ss:$8 sps:$4 sm:$0xff]   ;;  %v1985_v3 = vld [vmem:[%s2775_s2 + $0x160] ss:$8 sps:$4 sm:$0xff]  }
  0x8b   :  { %1466 = vmatprep.subr.bf16.mxu1 %v1966_v45  ;;  %v1988_v4 = vld [vmem:[%s2775_s2 + $0x260] ss:$8 sps:$4 sm:$0xff]   ;;  %v1993_v5 = vld [vmem:[%s2775_s2 + $0x174] ss:$8 sps:$4 sm:$0xff]   ;;  %v1991_v8 = vld [vmem:[%s2775_s2 + $0x170] ss:$8 sps:$4 sm:$0xff]  }
  0x8c   :  { %v1996_v6 = vld [vmem:[%s2775_s2 + $0x274] ss:$8 sps:$4 sm:$0xff]   ;;  %v1994_v9 = vld [vmem:[%s2775_s2 + $0x270] ss:$8 sps:$4 sm:$0xff]   ;;  %v1999_v10 = vld [vmem:[%s2775_s2 + $0x184] ss:$8 sps:$4 sm:$0xff]  }
  0x8d   :  { %1426 = vmatpush1.bf16.msra.mxu0 %v1961_v46  ;;  %v2002_v11 = vld [vmem:[%s2775_s2 + $0x284] ss:$8 sps:$4 sm:$0xff]   ;;  %v1997_v13 = vld [vmem:[%s2775_s2 + $0x180] ss:$8 sps:$4 sm:$0xff]   ;;  %v2005_v15 = vld [vmem:[%s2775_s2 + $0x194] ss:$8 sps:$4 sm:$0xff]  }
  0x8e   :  { %1467 = vmatpush1.bf16.msra.mxu1 %v1964_v49  ;;  %1427 = vmatprep.subr.bf16.mxu0 %v1969_v51  ;;  %v2000_v14 = vld [vmem:[%s2775_s2 + $0x280] ss:$8 sps:$4 sm:$0xff]   ;;  %v2008_v16 = vld [vmem:[%s2775_s2 + $0x294] ss:$8 sps:$4 sm:$0xff]   ;;  %v2003_v17 = vld [vmem:[%s2775_s2 + $0x190] ss:$8 sps:$4 sm:$0xff]  }
  0x8f   :  { %1468 = vmatprep.subr.bf16.mxu1 %v1972_v52  ;;  %v2006_v18 = vld [vmem:[%s2775_s2 + $0x290] ss:$8 sps:$4 sm:$0xff]   ;;  %v2011_v19 = vld [vmem:[%s2775_s2 + $0x1a4] ss:$8 sps:$4 sm:$0xff]   ;;  %v2009_v21 = vld [vmem:[%s2775_s2 + $0x1a0] ss:$8 sps:$4 sm:$0xff]  }
  0x90   :  { %v2014_v20 = vld [vmem:[%s2775_s2 + $0x2a4] ss:$8 sps:$4 sm:$0xff]   ;;  %v2012_v22 = vld [vmem:[%s2775_s2 + $0x2a0] ss:$8 sps:$4 sm:$0xff]   ;;  %v2017_v23 = vld [vmem:[%s2775_s2 + $0x1b4] ss:$8 sps:$4 sm:$0xff]  }
  0x91   :  { %1428 = vmatpush1.bf16.msra.mxu0 %v1967_v55  ;;  %v2020_v24 = vld [vmem:[%s2775_s2 + $0x2b4] ss:$8 sps:$4 sm:$0xff]   ;;  %v2015_v25 = vld [vmem:[%s2775_s2 + $0x1b0] ss:$8 sps:$4 sm:$0xff]   ;;  %v2023_v27 = vld [vmem:[%s2775_s2 + $0x1c4] ss:$8 sps:$4 sm:$0xff]  }
  0x92   :  { %1469 = vmatpush1.bf16.msra.mxu1 %v1970_v56  ;;  %1429 = vmatprep.subr.bf16.mxu0 %v1975_v58  ;;  %v2018_v26 = vld [vmem:[%s2775_s2 + $0x2b0] ss:$8 sps:$4 sm:$0xff]   ;;  %v2026_v28 = vld [vmem:[%s2775_s2 + $0x2c4] ss:$8 sps:$4 sm:$0xff]   ;;  %v2021_v29 = vld [vmem:[%s2775_s2 + $0x1c0] ss:$8 sps:$4 sm:$0xff]  }
  0x93   :  { %1470 = vmatprep.subr.bf16.mxu1 %v1978_v59  ;;  %v2024_v30 = vld [vmem:[%s2775_s2 + $0x2c0] ss:$8 sps:$4 sm:$0xff]   ;;  %v2029_v31 = vld [vmem:[%s2775_s2 + $0x1d4] ss:$8 sps:$4 sm:$0xff]   ;;  %v2027_v33 = vld [vmem:[%s2775_s2 + $0x1d0] ss:$8 sps:$4 sm:$0xff]  }
  0x94   :  { %v2032_v32 = vld [vmem:[%s2775_s2 + $0x2d4] ss:$8 sps:$4 sm:$0xff]   ;;  %v2030_v34 = vld [vmem:[%s2775_s2 + $0x2d0] ss:$8 sps:$4 sm:$0xff]   ;;  %v2035_v35 = vld [vmem:[%s2775_s2 + $0x1e4] ss:$8 sps:$4 sm:$0xff]  }
  0x95   :  { %1430 = vmatpush1.bf16.msra.mxu0 %v1973_v50  ;;  %v2038_v36 = vld [vmem:[%s2775_s2 + $0x2e4] ss:$8 sps:$4 sm:$0xff]   ;;  %v2033_v37 = vld [vmem:[%s2775_s2 + $0x1e0] ss:$8 sps:$4 sm:$0xff]   ;;  %v2041_v39 = vld [vmem:[%s2775_s2 + $0x1f4] ss:$8 sps:$4 sm:$0xff]  }
  0x96   :  { %1471 = vmatpush1.bf16.msra.mxu1 %v1976_v60  ;;  %1431 = vmatprep.subr.bf16.mxu0 %v1981_v61  ;;  %v2036_v38 = vld [vmem:[%s2775_s2 + $0x2e0] ss:$8 sps:$4 sm:$0xff]   ;;  %v2044_v40 = vld [vmem:[%s2775_s2 + $0x2f4] ss:$8 sps:$4 sm:$0xff]   ;;  %v2039_v41 = vld [vmem:[%s2775_s2 + $0x1f0] ss:$8 sps:$4 sm:$0xff]  }
  0x97   :  { %1472 = vmatprep.subr.bf16.mxu1 %v1984_v62  ;;  %v2042_v48 = vld [vmem:[%s2775_s2 + $0x2f0] ss:$8 sps:$4 sm:$0xff]   ;;  %vm1533_vm0 = vcmask 1040384   ;;  %vm1547_vm1 = vcmask 0  }
  0x99   :  { %1432 = vmatpush1.bf16.msra.mxu0 %v1979_v63 }
  0x9a   :  { %1473 = vmatpush1.bf16.msra.mxu1 %v1982_v0  ;;  %1433 = vmatprep.subr.bf16.mxu0 %v1987_v1 }
  0x9b   :  { %1474 = vmatprep.subr.bf16.mxu1 %v1990_v2 }
  0x9d   :  { %1434 = vmatpush1.bf16.msra.mxu0 %v1985_v3  ;;  %v1503_v3 = vld [vmem:[%s2777_s4] sm:$0x3]  ;;  %s2073_s4 = smov [#allocation3]  }
  0x9e   :  { %1475 = vmatpush1.bf16.msra.mxu1 %v1988_v4  ;;  %1435 = vmatprep.subr.bf16.mxu0 %v1993_v5 }
  0x9f   :  { %1476 = vmatprep.subr.bf16.mxu1 %v1996_v6 }
  0xa1   :  { %1436 = vmatpush1.bf16.msra.mxu0 %v1991_v8  ;;  %v1508_v8 = vrot.slane %v1503_v3, %v2312_v7 }
  0xa2   :  { %1477 = vmatpush1.bf16.msra.mxu1 %v1994_v9  ;;  %1437 = vmatprep.subr.bf16.mxu0 %v1999_v10 }
  0xa3   :  { %1478 = vmatprep.subr.bf16.mxu1 %v2002_v11 }
  0xa5   :  { %1438 = vmatpush1.bf16.msra.mxu0 %v1997_v13  ;;  %v1512_v13 = vrot.slane %v1503_v3, %v2252_v47 }
  0xa6   :  { %1479 = vmatpush1.bf16.msra.mxu1 %v2000_v14  ;;  %1439 = vmatprep.subr.bf16.mxu0 %v2005_v15 }
  0xa7   :  { %1480 = vmatprep.subr.bf16.mxu1 %v2008_v16  ;;  %v1519_v16 = vld [vmem:[%s2778_s5] sm:$0x3]  ;;  %s1555_s5 = sshll.u32 %s2073_s4, 4  ;;  %s1556_s5 = int_to_ptr.vmem [resolvable:$true] %s1555_s5 }
  0xa8   :  { %s2049_s9 = scalar_lea.vmem %s1556_s5, 16  ;;  %s2053_s10 = scalar_lea.vmem %s1556_s5, 32 }
  0xa9   :  { %1440 = vmatpush1.bf16.msra.mxu0 %v2003_v17  ;;  %p2050_p0 = scmp.ne.s32.totalorder %s1556_s5, %s2049_s9  ;;  %p2054_p1 = scmp.lt.s32.totalorder %s1556_s5, %s1556_s5 }
  0xaa   :  { %1481 = vmatpush1.bf16.msra.mxu1 %v2006_v18  ;;  %1441 = vmatprep.subr.bf16.mxu0 %v2011_v19  ;;  %p2055_p2 = scmp.lt.s32.totalorder %s2053_s10, %s2049_s9 }
  0xab   :  { %1482 = vmatprep.subr.bf16.mxu1 %v2014_v20 }
  0xac   :  { %p2056_p3 = por %p2055_p2, %p2054_p1 }
  0xad   :  { %1442 = vmatpush1.bf16.msra.mxu0 %v2009_v21 }
  0xae   :  { %1483 = vmatpush1.bf16.msra.mxu1 %v2012_v22  ;;  %1443 = vmatprep.subr.bf16.mxu0 %v2017_v23  ;;  %v1524_v22 = vrot.slane %v1519_v16, %v2312_v7  ;;  %p2057_p4 = pnand %p2056_p3, %p2050_p0 }
  0xaf   :  { %1484 = vmatprep.subr.bf16.mxu1 %v2020_v24  ;;  %v1528_v24 = vrot.slane %v1519_v16, %v2252_v47 }
  0xb1   :  { %1444 = vmatpush1.bf16.msra.mxu0 %v2015_v25 }
  0xb2   :  { %1485 = vmatpush1.bf16.msra.mxu1 %v2018_v26  ;;  %1445 = vmatprep.subr.bf16.mxu0 %v2023_v27 }
  0xb3   :  { %1486 = vmatprep.subr.bf16.mxu1 %v2026_v28 }
  0xb5   :  { %1446 = vmatpush1.bf16.msra.mxu0 %v2021_v29 }
  0xb6   :  { %1487 = vmatpush1.bf16.msra.mxu1 %v2024_v30  ;;  %1447 = vmatprep.subr.bf16.mxu0 %v2029_v31 }
  0xb7   :  { %1488 = vmatprep.subr.bf16.mxu1 %v2032_v32  ;;  %v1539_v32 = vld [vmem:[#allocation2] sm:$0x1] }
  0xb9   :  { %1448 = vmatpush1.bf16.msra.mxu0 %v2027_v33 }
  0xba   :  { %1489 = vmatpush1.bf16.msra.mxu1 %v2030_v34  ;;  %1449 = vmatprep.subr.bf16.mxu0 %v2035_v35 }
  0xbb   :  { %1490 = vmatprep.subr.bf16.mxu1 %v2038_v36 }
  0xbd   :  { %1450 = vmatpush1.bf16.msra.mxu0 %v2033_v37 }
  0xbe   :  { %1491 = vmatpush1.bf16.msra.mxu1 %v2036_v38  ;;  %1451 = vmatprep.subr.bf16.mxu0 %v2041_v39 }
  0xbf   :  { %1492 = vmatprep.subr.bf16.mxu1 %v2044_v40 }
  0xc1   :  { %1452 = vmatpush1.bf16.msra.mxu0 %v2039_v41 }
  0xc2   :  { %1493 = vmatpush1.bf16.msra.mxu1 %v2042_v48 }
  0xc4   :  { %1454 = vmatmul.mubr.bf16.vlgmr.msra.gmra.mrb[8].mxu0 %v63_v57 }
  0xc5   :  { %1495 = vmatmul.mubr.bf16.vlgmr.msra.gmra.mrb[8].mxu1 %v65_v12 }
 0x117   :  { %v811_v42 = vpop.f32.mrb[0].mxu0 }
 0x118   :  { %v852_v43 = vpop.f32.mrb[0].mxu1  ;;  %v813_v45 = vpop.f32.mrb[1].mxu0 }
 0x119   :  { %v853_v44 = vadd.f32 %v852_v43, %v811_v42  ;;  %v854_v46 = vpop.f32.mrb[1].mxu1  ;;  %v815_v51 = vpop.f32.mrb[2].mxu0 }
 0x11a   :  { %v855_v49 = vadd.f32 %v854_v46, %v813_v45  ;;  %v856_v52 = vpop.f32.mrb[2].mxu1  ;;  %v816_v55 = vpop.f32.mrb[3].mxu0 }
 0x11b   :  { %v857_v56 = vpop.f32.mrb[3].mxu1 }
 0x157   :  { %v893_v58 = vpop.f32.mrb[4].mxu0 }
 0x158   :  { %v1414_v59 = vpop.f32.mrb[4].mxu1  ;;  %v894_v53 = vadd.f32 %v893_v58, %v853_v44  ;;  %v895_v50 = vpop.f32.mrb[5].mxu0 }
 0x159   :  { %v1416_v60 = vpop.f32.mrb[5].mxu1  ;;  %v896_v54 = vadd.f32 %v895_v50, %v855_v49  ;;  %v897_v61 = vpop.f32.mrb[6].mxu0 }
 0x15a   :  { %v1418_v62 = vpop.f32.mrb[6].mxu1  ;;  %v1415_v63 = vadd.f32 %v1414_v59, %v894_v53  ;;  %v898_v0 = vpop.f32.mrb[7].mxu0 }
 0x15b   :  { %v1419_v1 = vpop.f32.mrb[7].mxu1  ;;  %v1417_v2 = vadd.f32 %v1416_v60, %v896_v54 }
 0x197   :  { %v1455_v4 = vpop.f32.mrb[8].mxu0 }
 0x198   :  { %v1496_v5 = vpop.f32.mrb[8].mxu1  ;;  %v1456_v6 = vadd.f32 %v1455_v4, %v1415_v63  ;;  %v1457_v9 = vpop.f32.mrb[9].mxu0 }
 0x199   :  { %v1498_v10 = vpop.f32.mrb[9].mxu1  ;;  %v1458_v11 = vadd.f32 %v1457_v9, %v1417_v2  ;;  %v1459_v14 = vpop.f32.mrb[10].mxu0 }
 0x19a   :  { %v1500_v15 = vpop.f32.mrb[10].mxu1  ;;  %v1497_v17 = vadd.f32 %v1496_v5, %v1456_v6  ;;  %v1460_v18 = vpop.f32.mrb[11].mxu0 }
 0x19b   :  { %v1501_v19 = vpop.f32.mrb[11].mxu1  ;;  %v1499_v20 = vadd.f32 %v1498_v10, %v1458_v11 }
 0x19c   :  { %v1515_v21 = vadd.f32 %v1508_v8, %v1497_v17 }
 0x19d   :  { %v1516_v23 = vadd.f32 %v1512_v13, %v1499_v20 }
 0x19e   :  { %v1517_v25 = vmax.f32 %v1515_v21, 0.0 }
 0x19f   :  { %v1518_v26 = vmax.f32 %v1516_v23, 0.0 }
 0x1a0   :  { %v1531_v27 = vmul.f32 %v1524_v22, %v1517_v25 }
 0x1a1   :  { %v1532_v28 = vmul.f32 %v1528_v24, %v1518_v26 }
 0x1a2   :  { %v1534_v29 = vsel %vm1533_vm0, %v1531_v27, 0.0 }
 0x1a3   :  { %v1535_v30 = vsel %vm1533_vm0, %v1532_v28, 0.0 }
 0x1a4   :  { %v1536_v31 = vadd.f32 %v1535_v30, %v1534_v29 }
 0x1a6   :  { %1537 = vadd.xlane.f32.xlu0 %v1536_v31 }
 0x233   :  { %v1538_v33 = vpop.xlane.xlu0 %1537 }
 0x234   :  { %v1540_v34 = vadd.f32 %v1539_v32, %v1538_v33 }
 0x236   :  { %v1755_v35 = vmul.f32 -1.442695, %v1540_v34 }
 0x238   :  { %2045 = vpow2.f32 %v1755_v35 }
 0x242   :  { %v2046_v36 = vpop.eup %2045 }
 0x243   :  { %v1544_v37 = vadd.f32 1.0, %v2046_v36 }
 0x245   :  { %2047 = vrcp.f32 %v1544_v37 }
 0x24f   :  { %v2048_v47 = vpop.eup %2047 }
 0x250   :  { %1548 = vst.msk [vmem:[#allocation3] sm:$0x1] %vm1547_vm1, %v2048_v47 }
 0x251   :  { %2060 = shalt.err (!%p2057_p4)
}
 0x252   :  { %s2061_s12 = scalar_lea.hbm %s2780_s7, 16 }
 0x253   :  { %p2062_p5 = scmp.ne.s32.totalorder %s2780_s7, %s2061_s12  ;;  %p2065_p6 = scmp.lt.u32.totalorder %s2061_s12, %s2780_s7 }
 0x255   :  { %p2067_p7 = pnand %p2065_p6, %p2062_p5 }
 0x257   :  { %2070 = shalt.err (!%p2067_p7)
}
 0x258   :  { %1558 = dma.vmem_to_hbm [thread:$0]  %s1556_s5, 16, %s2780_s7, [#allocation4]  }
 0x259   :  { %2071 = dma.done.wait [#allocation4], 16  }
 0x25a   :  { %2072 = vsyncadd [#allocation4], 4294967280 }
 0x25b   :  { %1562 = vsyncpa [#allocation4], 1 }

</bundles_post_ra>
